<compile_context>
chip_gen: v7x
topology: tpu7x:2x2x1
jax: 0.10.0
libtpu: 0.0.40
codegen_flags: <defaults>
</compile_context>

<pallas_src>
import jax
import jax.numpy as jnp
from jax.experimental import pallas as pl
from jax.experimental.pallas import tpu as pltpu


# ----------------------------------------------------------------------------
# Kernel 1: fused conv3x3 (4 pool-parity GEMMs) + bias + ReLU + 2x2 max-pool.
#   a_ref : (4, G, K)  bf16  im2col patches; axis 0 = pool parity (p, q),
#                            rows are (n, ho, wo), K = 9 * Cin.
#   w_ref : (K, Cout)  bf16  conv weight as a GEMM matrix ((kh, kw, cin) rows).
#   b_ref : (1, Cout)  f32   bias.
#   o_ref : (G, Cout)  bf16  pooled activation, rows (n, ho, wo).
# ----------------------------------------------------------------------------
def _conv_relu_pool_kernel(a_ref, w_ref, b_ref, o_ref):
    w = w_ref[...]
    b = b_ref[...]
    pooled = None
    for p in range(4):                                    # unrolled at trace time
        acc = jnp.dot(a_ref[p], w, preferred_element_type=jnp.float32)
        y = jnp.maximum(acc + b, 0.0)                     # bias + ReLU (f32 epilogue)
        pooled = y if pooled is None else jnp.maximum(pooled, y)
    o_ref[...] = pooled.astype(o_ref.dtype)               # bf16 writeback


# ----------------------------------------------------------------------------
# Kernel 2: classifier, out = x @ w + b (bf16 operands, f32 accumulate & out).
# ----------------------------------------------------------------------------
def _fc_kernel(x_ref, w_ref, b_ref, o_ref):
    acc = jnp.dot(x_ref[...], w_ref[...], preferred_element_type=jnp.float32)
    o_ref[...] = (acc + b_ref[...]).astype(o_ref.dtype)


# ----------------------------------------------------------------------------
# Stage wrappers.
# ----------------------------------------------------------------------------
def conv_relu_pool(x, w_mat, bias):
    """x: (N, H, W, Cin) bf16 NHWC -> (N, H//2, W//2, Cout) bf16."""
    N, H, W, Cin = x.shape
    K, Cout = w_mat.shape
    Ho, Wo = H // 2, W // 2
    G = N * Ho * Wo

    # im2col with pool-parity-major row order: plane (p, q) holds the 3x3
    # patches of conv-output pixels (2*ho + p, 2*wo + q).  Pure strided
    # slicing / concat on a tiny bf16 tensor -> a single XLA fusion.
    xp = jnp.pad(x, ((0, 0), (1, 1), (1, 1), (0, 0)))
    planes = []
    for p in range(2):
        for q in range(2):
            taps = [xp[:, p + di:p + di + 2 * Ho:2, q + dj:q + dj + 2 * Wo:2, :]
                    for di in range(3) for dj in range(3)]
            planes.append(jnp.concatenate(taps, axis=-1).reshape(G, K))
    patches = jnp.stack(planes, axis=0)                    # (4, G, K) bf16

    out = pl.pallas_call(
        _conv_relu_pool_kernel,
        out_shape=jax.ShapeDtypeStruct((G, Cout), jnp.bfloat16),
        grid=(1,),
        in_specs=[
            pl.BlockSpec((4, G, K), lambda i: (0, 0, 0)),
            pl.BlockSpec((K, Cout), lambda i: (0, 0)),
            pl.BlockSpec((1, Cout), lambda i: (0, 0)),
        ],
        out_specs=pl.BlockSpec((G, Cout), lambda i: (0, 0)),
        compiler_params=pltpu.CompilerParams(dimension_semantics=("arbitrary",)),
    )(patches, w_mat, bias)
    return out.reshape(N, Ho, Wo, Cout)


def fc_layer(x, w_mat, bias):
    """x: (M, K) bf16; w_mat: (K, Nc) bf16; bias: (1, Nc) f32 -> (M, Nc) f32."""
    M, K = x.shape
    _, Nc = w_mat.shape
    return pl.pallas_call(
        _fc_kernel,
        out_shape=jax.ShapeDtypeStruct((M, Nc), jnp.float32),
        grid=(1,),
        in_specs=[
            pl.BlockSpec((M, K), lambda i: (0, 0)),
            pl.BlockSpec((K, Nc), lambda i: (0, 0)),
            pl.BlockSpec((1, Nc), lambda i: (0, 0)),
        ],
        out_specs=pl.BlockSpec((M, Nc), lambda i: (0, 0)),
        compiler_params=pltpu.CompilerParams(dimension_semantics=("arbitrary",)),
    )(x, w_mat, bias)


# ----------------------------------------------------------------------------
# Parameters: raw (PyTorch layout) + one-time repack (outside jit, arrays only).
# ----------------------------------------------------------------------------
def init_params(key, num_classes=10):
    shapes = {
        "w1": (32, 3, 3, 3), "w2": (64, 32, 3, 3), "w3": (128, 64, 3, 3),
        "fw": (num_classes, 128 * 4 * 4),
        "b1": (32,), "b2": (64,), "b3": (128,), "fb": (num_classes,),
    }
    raw = {}
    for name, shape in shapes.items():
        key, sub = jax.random.split(key)
        raw[name] = 0.05 * jax.random.normal(sub, shape, dtype=jnp.float32)
    return raw


def prepare_params(raw):
    """One-time weight repack (outside jit). The pytree contains arrays only."""
    def conv_mat(w):
        cout, cin, kh, kw = w.shape
        # Rows ordered (kh, kw, cin) to match the im2col tap/concat order.
        return w.transpose(2, 3, 1, 0).reshape(kh * kw * cin, cout).astype(jnp.bfloat16)

    def fc_mat(w):
        nc, k = w.shape                                    # k = 128*4*4, (C, H, W) order
        # Reorder the input-feature axis to the NHWC (H, W, C) flatten order.
        return (w.reshape(nc, 128, 4, 4).transpose(0, 2, 3, 1)
                .reshape(nc, k).T).astype(jnp.bfloat16)    # (k, nc)

    return {
        "w1": conv_mat(raw["w1"]), "b1": raw["b1"].reshape(1, -1),
        "w2": conv_mat(raw["w2"]), "b2": raw["b2"].reshape(1, -1),
        "w3": conv_mat(raw["w3"]), "b3": raw["b3"].reshape(1, -1),
        "fw": fc_mat(raw["fw"]),   "fb": raw["fb"].reshape(1, -1),
    }


# ----------------------------------------------------------------------------
# Forward pass (matches Net.forward semantics).
# ----------------------------------------------------------------------------
def net_forward(prepped, x):
    """x: (N, 3, 32, 32) f32 NCHW -> logits (N, num_classes) f32."""
    x = x.transpose(0, 2, 3, 1).astype(jnp.bfloat16)       # NCHW -> NHWC, bf16, once
    x = conv_relu_pool(x, prepped["w1"], prepped["b1"])    # (N, 16, 16, 32)
    x = conv_relu_pool(x, prepped["w2"], prepped["b2"])    # (N,  8,  8, 64)
    x = conv_relu_pool(x, prepped["w3"], prepped["b3"])    # (N,  4,  4, 128)
    x = x.reshape(x.shape[0], -1)                          # (N, 2048) NHWC flatten
    return fc_layer(x, prepped["fw"], prepped["fb"])


# ----------------------------------------------------------------------------
# Plain-JAX f32 reference (validation only).
# ----------------------------------------------------------------------------
def reference_forward(raw, x):
    def conv(x, w, b):
        y = jax.lax.conv_general_dilated(
            x, w, window_strides=(1, 1), padding=((1, 1), (1, 1)),
            dimension_numbers=("NCHW", "OIHW", "NCHW"))
        return jax.nn.relu(y + b[None, :, None, None])

    def pool(x):
        return jax.lax.reduce_window(x, -jnp.inf, jax.lax.max,
                                     (1, 1, 2, 2), (1, 1, 2, 2), "VALID")

    x = pool(conv(x, raw["w1"], raw["b1"]))
    x = pool(conv(x, raw["w2"], raw["b2"]))
    x = pool(conv(x, raw["w3"], raw["b3"]))
    x = x.reshape(x.shape[0], -1)                          # PyTorch NCHW flatten
    return x @ raw["fw"].T + raw["fb"]


if __name__ == "__main__":
    num_classes = 10
    key = jax.random.PRNGKey(0)
    pkey, xkey = jax.random.split(key)
    raw = init_params(pkey, num_classes=num_classes)
    prepped = prepare_params(raw)                          # one-time, outside jit

    # Input consistent with fc = Linear(128*4*4, .): 32 -> 16 -> 8 -> 4 spatial.
    x = jax.random.normal(xkey, (2, 3, 32, 32), dtype=jnp.float32)

    fwd = jax.jit(net_forward)
    out = jax.block_until_ready(fwd(prepped, x))
    assert out.shape == (2, num_classes), out.shape
    assert bool(jnp.all(jnp.isfinite(out)))

    # Validate against the f32 reference (bf16 MXU operands -> loose tolerance).
    ref = jax.block_until_ready(jax.jit(reference_forward)(raw, x))
    rel_err = float(jnp.max(jnp.abs(out - ref)) / (jnp.max(jnp.abs(ref)) + 1e-6))
    assert rel_err < 0.1, f"relative error too large: {rel_err}"

    print("KERNEL_OK")
</pallas_src>

<mosaic_0001>
module attributes {stable_mosaic.version = 11 : i64} {
  func.func @_conv_relu_pool_kernel(%arg0: i32, %arg1: memref<4x512x27xbf16, #tpu.memory_space<vmem>>, %arg2: memref<27x32xbf16, #tpu.memory_space<vmem>>, %arg3: memref<1x32xf32, #tpu.memory_space<vmem>>, %arg4: memref<512x32xbf16, #tpu.memory_space<vmem>>) attributes {dimension_semantics = [#tpu.dimension_semantics<arbitrary>], iteration_bounds = array<i64: 1>, scalar_prefetch = 0 : i64, scratch_operands = 0 : i64, tpu.core_type = #tpu.core_type<tc>, window_params = [{pipeline_mode = #tpu.pipeline_mode<synchronous>, transform_indices = @transform_0, window_bounds = array<i64: 4, 512, 27>}, {pipeline_mode = #tpu.pipeline_mode<synchronous>, transform_indices = @transform_1, window_bounds = array<i64: 27, 32>}, {pipeline_mode = #tpu.pipeline_mode<synchronous>, transform_indices = @transform_2, window_bounds = array<i64: 1, 32>}, {pipeline_mode = #tpu.pipeline_mode<synchronous>, transform_indices = @transform_3, window_bounds = array<i64: 512, 32>}]} {
    %c0 = arith.constant 0 : index
    %c0_0 = arith.constant 0 : index
    %0 = vector.load %arg2[%c0, %c0_0] : memref<27x32xbf16, #tpu.memory_space<vmem>>, vector<27x32xbf16>
    %c0_1 = arith.constant 0 : index
    %c0_2 = arith.constant 0 : index
    %1 = vector.load %arg3[%c0_1, %c0_2] : memref<1x32xf32, #tpu.memory_space<vmem>>, vector<1x32xf32>
    %c0_3 = arith.constant 0 : index
    %c0_4 = arith.constant 0 : index
    %c0_5 = arith.constant 0 : index
    %2 = vector.load %arg1[%c0_3, %c0_4, %c0_5] : memref<4x512x27xbf16, #tpu.memory_space<vmem>>, vector<1x512x27xbf16>
    %3 = vector.shape_cast %2 : vector<1x512x27xbf16> to vector<512x27xbf16>
    %cst = arith.constant dense<0.000000e+00> : vector<512x32xf32>
    %4 = tpu.matmul %3, %0, %cst {dimension_numbers = #tpu.dot_dimension_numbers<[1], [0], [0], [1], [0, 0, 1, 1], [], []>} : vector<512x27xbf16>, vector<27x32xbf16>, vector<512x32xf32> -> vector<512x32xf32>
    %5 = vector.broadcast %1 : vector<1x32xf32> to vector<512x32xf32>
    %6 = arith.addf %4, %5 : vector<512x32xf32>
    %cst_6 = arith.constant 0.000000e+00 : f32
    %7 = vector.broadcast %cst_6 : f32 to vector<512x32xf32>
    %8 = arith.maximumf %6, %7 : vector<512x32xf32>
    %c1 = arith.constant 1 : index
    %c0_7 = arith.constant 0 : index
    %c0_8 = arith.constant 0 : index
    %9 = vector.load %arg1[%c1, %c0_7, %c0_8] : memref<4x512x27xbf16, #tpu.memory_space<vmem>>, vector<1x512x27xbf16>
    %10 = vector.shape_cast %9 : vector<1x512x27xbf16> to vector<512x27xbf16>
    %cst_9 = arith.constant dense<0.000000e+00> : vector<512x32xf32>
    %11 = tpu.matmul %10, %0, %cst_9 {dimension_numbers = #tpu.dot_dimension_numbers<[1], [0], [0], [1], [0, 0, 1, 1], [], []>} : vector<512x27xbf16>, vector<27x32xbf16>, vector<512x32xf32> -> vector<512x32xf32>
    %12 = vector.broadcast %1 : vector<1x32xf32> to vector<512x32xf32>
    %13 = arith.addf %11, %12 : vector<512x32xf32>
    %cst_10 = arith.constant 0.000000e+00 : f32
    %14 = vector.broadcast %cst_10 : f32 to vector<512x32xf32>
    %15 = arith.maximumf %13, %14 : vector<512x32xf32>
    %16 = arith.maximumf %8, %15 : vector<512x32xf32>
    %c2 = arith.constant 2 : index
    %c0_11 = arith.constant 0 : index
    %c0_12 = arith.constant 0 : index
    %17 = vector.load %arg1[%c2, %c0_11, %c0_12] : memref<4x512x27xbf16, #tpu.memory_space<vmem>>, vector<1x512x27xbf16>
    %18 = vector.shape_cast %17 : vector<1x512x27xbf16> to vector<512x27xbf16>
    %cst_13 = arith.constant dense<0.000000e+00> : vector<512x32xf32>
    %19 = tpu.matmul %18, %0, %cst_13 {dimension_numbers = #tpu.dot_dimension_numbers<[1], [0], [0], [1], [0, 0, 1, 1], [], []>} : vector<512x27xbf16>, vector<27x32xbf16>, vector<512x32xf32> -> vector<512x32xf32>
    %20 = vector.broadcast %1 : vector<1x32xf32> to vector<512x32xf32>
    %21 = arith.addf %19, %20 : vector<512x32xf32>
    %cst_14 = arith.constant 0.000000e+00 : f32
    %22 = vector.broadcast %cst_14 : f32 to vector<512x32xf32>
    %23 = arith.maximumf %21, %22 : vector<512x32xf32>
    %24 = arith.maximumf %16, %23 : vector<512x32xf32>
    %c3 = arith.constant 3 : index
    %c0_15 = arith.constant 0 : index
    %c0_16 = arith.constant 0 : index
    %25 = vector.load %arg1[%c3, %c0_15, %c0_16] : memref<4x512x27xbf16, #tpu.memory_space<vmem>>, vector<1x512x27xbf16>
    %26 = vector.shape_cast %25 : vector<1x512x27xbf16> to vector<512x27xbf16>
    %cst_17 = arith.constant dense<0.000000e+00> : vector<512x32xf32>
    %27 = tpu.matmul %26, %0, %cst_17 {dimension_numbers = #tpu.dot_dimension_numbers<[1], [0], [0], [1], [0, 0, 1, 1], [], []>} : vector<512x27xbf16>, vector<27x32xbf16>, vector<512x32xf32> -> vector<512x32xf32>
    %28 = vector.broadcast %1 : vector<1x32xf32> to vector<512x32xf32>
    %29 = arith.addf %27, %28 : vector<512x32xf32>
    %cst_18 = arith.constant 0.000000e+00 : f32
    %30 = vector.broadcast %cst_18 : f32 to vector<512x32xf32>
    %31 = arith.maximumf %29, %30 : vector<512x32xf32>
    %32 = arith.maximumf %24, %31 : vector<512x32xf32>
    %33 = arith.truncf %32 : vector<512x32xf32> to vector<512x32xbf16>
    %c0_19 = arith.constant 0 : index
    %c0_20 = arith.constant 0 : index
    %34 = vector.load %arg4[%c0_19, %c0_20] : memref<512x32xbf16, #tpu.memory_space<vmem>>, vector<512x32xbf16>
    tpu.vector_store %arg4[%c0_19, %c0_20], %33 {strides = array<i32>} : memref<512x32xbf16, #tpu.memory_space<vmem>>, vector<512x32xbf16>,
    return
  }
  func.func @transform_0(%arg0: i32) -> (i32, i32, i32) {
    %c0_i32 = arith.constant 0 : i32
    %c0_i32_0 = arith.constant 0 : i32
    %c0_i32_1 = arith.constant 0 : i32
    %c0_i32_2 = arith.constant 0 : i32
    return %c0_i32, %c0_i32_0, %c0_i32_1 : i32, i32, i32
  }
  func.func @transform_1(%arg0: i32) -> (i32, i32) {
    %c0_i32 = arith.constant 0 : i32
    %c0_i32_0 = arith.constant 0 : i32
    %c0_i32_1 = arith.constant 0 : i32
    return %c0_i32, %c0_i32_0 : i32, i32
  }
  func.func @transform_2(%arg0: i32) -> (i32, i32) {
    %c0_i32 = arith.constant 0 : i32
    %c0_i32_0 = arith.constant 0 : i32
    %c0_i32_1 = arith.constant 0 : i32
    return %c0_i32, %c0_i32_0 : i32, i32
  }
  func.func @transform_3(%arg0: i32) -> (i32, i32) {
    %c0_i32 = arith.constant 0 : i32
    %c0_i32_0 = arith.constant 0 : i32
    %c0_i32_1 = arith.constant 0 : i32
    return %c0_i32, %c0_i32_0 : i32, i32
  }
}

module attributes {stable_mosaic.version = 11 : i64} {
  func.func @_conv_relu_pool_kernel(%arg0: i32, %arg1: memref<4x128x288xbf16, #tpu.memory_space<vmem>>, %arg2: memref<288x64xbf16, #tpu.memory_space<vmem>>, %arg3: memref<1x64xf32, #tpu.memory_space<vmem>>, %arg4: memref<128x64xbf16, #tpu.memory_space<vmem>>) attributes {dimension_semantics = [#tpu.dimension_semantics<arbitrary>], iteration_bounds = array<i64: 1>, scalar_prefetch = 0 : i64, scratch_operands = 0 : i64, tpu.core_type = #tpu.core_type<tc>, window_params = [{pipeline_mode = #tpu.pipeline_mode<synchronous>, transform_indices = @transform_0, window_bounds = array<i64: 4, 128, 288>}, {pipeline_mode = #tpu.pipeline_mode<synchronous>, transform_indices = @transform_1, window_bounds = array<i64: 288, 64>}, {pipeline_mode = #tpu.pipeline_mode<synchronous>, transform_indices = @transform_2, window_bounds = array<i64: 1, 64>}, {pipeline_mode = #tpu.pipeline_mode<synchronous>, transform_indices = @transform_3, window_bounds = array<i64: 128, 64>}]} {
    %c0 = arith.constant 0 : index
    %c0_0 = arith.constant 0 : index
    %0 = vector.load %arg2[%c0, %c0_0] : memref<288x64xbf16, #tpu.memory_space<vmem>>, vector<288x64xbf16>
    %c0_1 = arith.constant 0 : index
    %c0_2 = arith.constant 0 : index
    %1 = vector.load %arg3[%c0_1, %c0_2] : memref<1x64xf32, #tpu.memory_space<vmem>>, vector<1x64xf32>
    %c0_3 = arith.constant 0 : index
    %c0_4 = arith.constant 0 : index
    %c0_5 = arith.constant 0 : index
    %2 = vector.load %arg1[%c0_3, %c0_4, %c0_5] : memref<4x128x288xbf16, #tpu.memory_space<vmem>>, vector<1x128x288xbf16>
    %3 = vector.shape_cast %2 : vector<1x128x288xbf16> to vector<128x288xbf16>
    %cst = arith.constant dense<0.000000e+00> : vector<128x64xf32>
    %4 = tpu.matmul %3, %0, %cst {dimension_numbers = #tpu.dot_dimension_numbers<[1], [0], [0], [1], [0, 0, 1, 1], [], []>} : vector<128x288xbf16>, vector<288x64xbf16>, vector<128x64xf32> -> vector<128x64xf32>
    %5 = vector.broadcast %1 : vector<1x64xf32> to vector<128x64xf32>
    %6 = arith.addf %4, %5 : vector<128x64xf32>
    %cst_6 = arith.constant 0.000000e+00 : f32
    %7 = vector.broadcast %cst_6 : f32 to vector<128x64xf32>
    %8 = arith.maximumf %6, %7 : vector<128x64xf32>
    %c1 = arith.constant 1 : index
    %c0_7 = arith.constant 0 : index
    %c0_8 = arith.constant 0 : index
    %9 = vector.load %arg1[%c1, %c0_7, %c0_8] : memref<4x128x288xbf16, #tpu.memory_space<vmem>>, vector<1x128x288xbf16>
    %10 = vector.shape_cast %9 : vector<1x128x288xbf16> to vector<128x288xbf16>
    %cst_9 = arith.constant dense<0.000000e+00> : vector<128x64xf32>
    %11 = tpu.matmul %10, %0, %cst_9 {dimension_numbers = #tpu.dot_dimension_numbers<[1], [0], [0], [1], [0, 0, 1, 1], [], []>} : vector<128x288xbf16>, vector<288x64xbf16>, vector<128x64xf32> -> vector<128x64xf32>
    %12 = vector.broadcast %1 : vector<1x64xf32> to vector<128x64xf32>
    %13 = arith.addf %11, %12 : vector<128x64xf32>
    %cst_10 = arith.constant 0.000000e+00 : f32
    %14 = vector.broadcast %cst_10 : f32 to vector<128x64xf32>
    %15 = arith.maximumf %13, %14 : vector<128x64xf32>
    %16 = arith.maximumf %8, %15 : vector<128x64xf32>
    %c2 = arith.constant 2 : index
    %c0_11 = arith.constant 0 : index
    %c0_12 = arith.constant 0 : index
    %17 = vector.load %arg1[%c2, %c0_11, %c0_12] : memref<4x128x288xbf16, #tpu.memory_space<vmem>>, vector<1x128x288xbf16>
    %18 = vector.shape_cast %17 : vector<1x128x288xbf16> to vector<128x288xbf16>
    %cst_13 = arith.constant dense<0.000000e+00> : vector<128x64xf32>
    %19 = tpu.matmul %18, %0, %cst_13 {dimension_numbers = #tpu.dot_dimension_numbers<[1], [0], [0], [1], [0, 0, 1, 1], [], []>} : vector<128x288xbf16>, vector<288x64xbf16>, vector<128x64xf32> -> vector<128x64xf32>
    %20 = vector.broadcast %1 : vector<1x64xf32> to vector<128x64xf32>
    %21 = arith.addf %19, %20 : vector<128x64xf32>
    %cst_14 = arith.constant 0.000000e+00 : f32
    %22 = vector.broadcast %cst_14 : f32 to vector<128x64xf32>
    %23 = arith.maximumf %21, %22 : vector<128x64xf32>
    %24 = arith.maximumf %16, %23 : vector<128x64xf32>
    %c3 = arith.constant 3 : index
    %c0_15 = arith.constant 0 : index
    %c0_16 = arith.constant 0 : index
    %25 = vector.load %arg1[%c3, %c0_15, %c0_16] : memref<4x128x288xbf16, #tpu.memory_space<vmem>>, vector<1x128x288xbf16>
    %26 = vector.shape_cast %25 : vector<1x128x288xbf16> to vector<128x288xbf16>
    %cst_17 = arith.constant dense<0.000000e+00> : vector<128x64xf32>
    %27 = tpu.matmul %26, %0, %cst_17 {dimension_numbers = #tpu.dot_dimension_numbers<[1], [0], [0], [1], [0, 0, 1, 1], [], []>} : vector<128x288xbf16>, vector<288x64xbf16>, vector<128x64xf32> -> vector<128x64xf32>
    %28 = vector.broadcast %1 : vector<1x64xf32> to vector<128x64xf32>
    %29 = arith.addf %27, %28 : vector<128x64xf32>
    %cst_18 = arith.constant 0.000000e+00 : f32
    %30 = vector.broadcast %cst_18 : f32 to vector<128x64xf32>
    %31 = arith.maximumf %29, %30 : vector<128x64xf32>
    %32 = arith.maximumf %24, %31 : vector<128x64xf32>
    %33 = arith.truncf %32 : vector<128x64xf32> to vector<128x64xbf16>
    %c0_19 = arith.constant 0 : index
    %c0_20 = arith.constant 0 : index
    %34 = vector.load %arg4[%c0_19, %c0_20] : memref<128x64xbf16, #tpu.memory_space<vmem>>, vector<128x64xbf16>
    tpu.vector_store %arg4[%c0_19, %c0_20], %33 {strides = array<i32>} : memref<128x64xbf16, #tpu.memory_space<vmem>>, vector<128x64xbf16>,
    return
  }
  func.func @transform_0(%arg0: i32) -> (i32, i32, i32) {
    %c0_i32 = arith.constant 0 : i32
    %c0_i32_0 = arith.constant 0 : i32
    %c0_i32_1 = arith.constant 0 : i32
    %c0_i32_2 = arith.constant 0 : i32
    return %c0_i32, %c0_i32_0, %c0_i32_1 : i32, i32, i32
  }
  func.func @transform_1(%arg0: i32) -> (i32, i32) {
    %c0_i32 = arith.constant 0 : i32
    %c0_i32_0 = arith.constant 0 : i32
    %c0_i32_1 = arith.constant 0 : i32
    return %c0_i32, %c0_i32_0 : i32, i32
  }
  func.func @transform_2(%arg0: i32) -> (i32, i32) {
    %c0_i32 = arith.constant 0 : i32
    %c0_i32_0 = arith.constant 0 : i32
    %c0_i32_1 = arith.constant 0 : i32
    return %c0_i32, %c0_i32_0 : i32, i32
  }
  func.func @transform_3(%arg0: i32) -> (i32, i32) {
    %c0_i32 = arith.constant 0 : i32
    %c0_i32_0 = arith.constant 0 : i32
    %c0_i32_1 = arith.constant 0 : i32
    return %c0_i32, %c0_i32_0 : i32, i32
  }
}

module attributes {stable_mosaic.version = 11 : i64} {
  func.func @_conv_relu_pool_kernel(%arg0: i32, %arg1: memref<4x32x576xbf16, #tpu.memory_space<vmem>>, %arg2: memref<576x128xbf16, #tpu.memory_space<vmem>>, %arg3: memref<1x128xf32, #tpu.memory_space<vmem>>, %arg4: memref<32x128xbf16, #tpu.memory_space<vmem>>) attributes {dimension_semantics = [#tpu.dimension_semantics<arbitrary>], iteration_bounds = array<i64: 1>, scalar_prefetch = 0 : i64, scratch_operands = 0 : i64, tpu.core_type = #tpu.core_type<tc>, window_params = [{pipeline_mode = #tpu.pipeline_mode<synchronous>, transform_indices = @transform_0, window_bounds = array<i64: 4, 32, 576>}, {pipeline_mode = #tpu.pipeline_mode<synchronous>, transform_indices = @transform_1, window_bounds = array<i64: 576, 128>}, {pipeline_mode = #tpu.pipeline_mode<synchronous>, transform_indices = @transform_2, window_bounds = array<i64: 1, 128>}, {pipeline_mode = #tpu.pipeline_mode<synchronous>, transform_indices = @transform_3, window_bounds = array<i64: 32, 128>}]} {
    %c0 = arith.constant 0 : index
    %c0_0 = arith.constant 0 : index
    %0 = vector.load %arg2[%c0, %c0_0] : memref<576x128xbf16, #tpu.memory_space<vmem>>, vector<576x128xbf16>
    %c0_1 = arith.constant 0 : index
    %c0_2 = arith.constant 0 : index
    %1 = vector.load %arg3[%c0_1, %c0_2] : memref<1x128xf32, #tpu.memory_space<vmem>>, vector<1x128xf32>
    %c0_3 = arith.constant 0 : index
    %c0_4 = arith.constant 0 : index
    %c0_5 = arith.constant 0 : index
    %2 = vector.load %arg1[%c0_3, %c0_4, %c0_5] : memref<4x32x576xbf16, #tpu.memory_space<vmem>>, vector<1x32x576xbf16>
    %3 = vector.shape_cast %2 : vector<1x32x576xbf16> to vector<32x576xbf16>
    %cst = arith.constant dense<0.000000e+00> : vector<32x128xf32>
    %4 = tpu.matmul %3, %0, %cst {dimension_numbers = #tpu.dot_dimension_numbers<[1], [0], [0], [1], [0, 0, 1, 1], [], []>} : vector<32x576xbf16>, vector<576x128xbf16>, vector<32x128xf32> -> vector<32x128xf32>
    %5 = vector.broadcast %1 : vector<1x128xf32> to vector<32x128xf32>
    %6 = arith.addf %4, %5 : vector<32x128xf32>
    %cst_6 = arith.constant 0.000000e+00 : f32
    %7 = vector.broadcast %cst_6 : f32 to vector<32x128xf32>
    %8 = arith.maximumf %6, %7 : vector<32x128xf32>
    %c1 = arith.constant 1 : index
    %c0_7 = arith.constant 0 : index
    %c0_8 = arith.constant 0 : index
    %9 = vector.load %arg1[%c1, %c0_7, %c0_8] : memref<4x32x576xbf16, #tpu.memory_space<vmem>>, vector<1x32x576xbf16>
    %10 = vector.shape_cast %9 : vector<1x32x576xbf16> to vector<32x576xbf16>
    %cst_9 = arith.constant dense<0.000000e+00> : vector<32x128xf32>
    %11 = tpu.matmul %10, %0, %cst_9 {dimension_numbers = #tpu.dot_dimension_numbers<[1], [0], [0], [1], [0, 0, 1, 1], [], []>} : vector<32x576xbf16>, vector<576x128xbf16>, vector<32x128xf32> -> vector<32x128xf32>
    %12 = vector.broadcast %1 : vector<1x128xf32> to vector<32x128xf32>
    %13 = arith.addf %11, %12 : vector<32x128xf32>
    %cst_10 = arith.constant 0.000000e+00 : f32
    %14 = vector.broadcast %cst_10 : f32 to vector<32x128xf32>
    %15 = arith.maximumf %13, %14 : vector<32x128xf32>
    %16 = arith.maximumf %8, %15 : vector<32x128xf32>
    %c2 = arith.constant 2 : index
    %c0_11 = arith.constant 0 : index
    %c0_12 = arith.constant 0 : index
    %17 = vector.load %arg1[%c2, %c0_11, %c0_12] : memref<4x32x576xbf16, #tpu.memory_space<vmem>>, vector<1x32x576xbf16>
    %18 = vector.shape_cast %17 : vector<1x32x576xbf16> to vector<32x576xbf16>
    %cst_13 = arith.constant dense<0.000000e+00> : vector<32x128xf32>
    %19 = tpu.matmul %18, %0, %cst_13 {dimension_numbers = #tpu.dot_dimension_numbers<[1], [0], [0], [1], [0, 0, 1, 1], [], []>} : vector<32x576xbf16>, vector<576x128xbf16>, vector<32x128xf32> -> vector<32x128xf32>
    %20 = vector.broadcast %1 : vector<1x128xf32> to vector<32x128xf32>
    %21 = arith.addf %19, %20 : vector<32x128xf32>
    %cst_14 = arith.constant 0.000000e+00 : f32
    %22 = vector.broadcast %cst_14 : f32 to vector<32x128xf32>
    %23 = arith.maximumf %21, %22 : vector<32x128xf32>
    %24 = arith.maximumf %16, %23 : vector<32x128xf32>
    %c3 = arith.constant 3 : index
    %c0_15 = arith.constant 0 : index
    %c0_16 = arith.constant 0 : index
    %25 = vector.load %arg1[%c3, %c0_15, %c0_16] : memref<4x32x576xbf16, #tpu.memory_space<vmem>>, vector<1x32x576xbf16>
    %26 = vector.shape_cast %25 : vector<1x32x576xbf16> to vector<32x576xbf16>
    %cst_17 = arith.constant dense<0.000000e+00> : vector<32x128xf32>
    %27 = tpu.matmul %26, %0, %cst_17 {dimension_numbers = #tpu.dot_dimension_numbers<[1], [0], [0], [1], [0, 0, 1, 1], [], []>} : vector<32x576xbf16>, vector<576x128xbf16>, vector<32x128xf32> -> vector<32x128xf32>
    %28 = vector.broadcast %1 : vector<1x128xf32> to vector<32x128xf32>
    %29 = arith.addf %27, %28 : vector<32x128xf32>
    %cst_18 = arith.constant 0.000000e+00 : f32
    %30 = vector.broadcast %cst_18 : f32 to vector<32x128xf32>
    %31 = arith.maximumf %29, %30 : vector<32x128xf32>
    %32 = arith.maximumf %24, %31 : vector<32x128xf32>
    %33 = arith.truncf %32 : vector<32x128xf32> to vector<32x128xbf16>
    %c0_19 = arith.constant 0 : index
    %c0_20 = arith.constant 0 : index
    %34 = vector.load %arg4[%c0_19, %c0_20] : memref<32x128xbf16, #tpu.memory_space<vmem>>, vector<32x128xbf16>
    tpu.vector_store %arg4[%c0_19, %c0_20], %33 {strides = array<i32>} : memref<32x128xbf16, #tpu.memory_space<vmem>>, vector<32x128xbf16>,
    return
  }
  func.func @transform_0(%arg0: i32) -> (i32, i32, i32) {
    %c0_i32 = arith.constant 0 : i32
    %c0_i32_0 = arith.constant 0 : i32
    %c0_i32_1 = arith.constant 0 : i32
    %c0_i32_2 = arith.constant 0 : i32
    return %c0_i32, %c0_i32_0, %c0_i32_1 : i32, i32, i32
  }
  func.func @transform_1(%arg0: i32) -> (i32, i32) {
    %c0_i32 = arith.constant 0 : i32
    %c0_i32_0 = arith.constant 0 : i32
    %c0_i32_1 = arith.constant 0 : i32
    return %c0_i32, %c0_i32_0 : i32, i32
  }
  func.func @transform_2(%arg0: i32) -> (i32, i32) {
    %c0_i32 = arith.constant 0 : i32
    %c0_i32_0 = arith.constant 0 : i32
    %c0_i32_1 = arith.constant 0 : i32
    return %c0_i32, %c0_i32_0 : i32, i32
  }
  func.func @transform_3(%arg0: i32) -> (i32, i32) {
    %c0_i32 = arith.constant 0 : i32
    %c0_i32_0 = arith.constant 0 : i32
    %c0_i32_1 = arith.constant 0 : i32
    return %c0_i32, %c0_i32_0 : i32, i32
  }
}

module attributes {stable_mosaic.version = 11 : i64} {
  func.func @_fc_kernel(%arg0: i32, %arg1: memref<2x2048xbf16, #tpu.memory_space<vmem>>, %arg2: memref<2048x10xbf16, #tpu.memory_space<vmem>>, %arg3: memref<1x10xf32, #tpu.memory_space<vmem>>, %arg4: memref<2x10xf32, #tpu.memory_space<vmem>>) attributes {dimension_semantics = [#tpu.dimension_semantics<arbitrary>], iteration_bounds = array<i64: 1>, scalar_prefetch = 0 : i64, scratch_operands = 0 : i64, tpu.core_type = #tpu.core_type<tc>, window_params = [{pipeline_mode = #tpu.pipeline_mode<synchronous>, transform_indices = @transform_0, window_bounds = array<i64: 2, 2048>}, {pipeline_mode = #tpu.pipeline_mode<synchronous>, transform_indices = @transform_1, window_bounds = array<i64: 2048, 10>}, {pipeline_mode = #tpu.pipeline_mode<synchronous>, transform_indices = @transform_2, window_bounds = array<i64: 1, 10>}, {pipeline_mode = #tpu.pipeline_mode<synchronous>, transform_indices = @transform_3, window_bounds = array<i64: 2, 10>}]} {
    %c0 = arith.constant 0 : index
    %c0_0 = arith.constant 0 : index
    %0 = vector.load %arg1[%c0, %c0_0] : memref<2x2048xbf16, #tpu.memory_space<vmem>>, vector<2x2048xbf16>
    %c0_1 = arith.constant 0 : index
    %c0_2 = arith.constant 0 : index
    %1 = vector.load %arg2[%c0_1, %c0_2] : memref<2048x10xbf16, #tpu.memory_space<vmem>>, vector<2048x10xbf16>
    %cst = arith.constant dense<0.000000e+00> : vector<2x10xf32>
    %2 = tpu.matmul %0, %1, %cst {dimension_numbers = #tpu.dot_dimension_numbers<[1], [0], [0], [1], [0, 0, 1, 1], [], []>} : vector<2x2048xbf16>, vector<2048x10xbf16>, vector<2x10xf32> -> vector<2x10xf32>
    %c0_3 = arith.constant 0 : index
    %c0_4 = arith.constant 0 : index
    %3 = vector.load %arg3[%c0_3, %c0_4] : memref<1x10xf32, #tpu.memory_space<vmem>>, vector<1x10xf32>
    %4 = vector.broadcast %3 : vector<1x10xf32> to vector<2x10xf32>
    %5 = arith.addf %2, %4 : vector<2x10xf32>
    %c0_5 = arith.constant 0 : index
    %c0_6 = arith.constant 0 : index
    %6 = vector.load %arg4[%c0_5, %c0_6] : memref<2x10xf32, #tpu.memory_space<vmem>>, vector<2x10xf32>
    tpu.vector_store %arg4[%c0_5, %c0_6], %5 {strides = array<i32>} : memref<2x10xf32, #tpu.memory_space<vmem>>, vector<2x10xf32>,
    return
  }
  func.func @transform_0(%arg0: i32) -> (i32, i32) {
    %c0_i32 = arith.constant 0 : i32
    %c0_i32_0 = arith.constant 0 : i32
    %c0_i32_1 = arith.constant 0 : i32
    return %c0_i32, %c0_i32_0 : i32, i32
  }
  func.func @transform_1(%arg0: i32) -> (i32, i32) {
    %c0_i32 = arith.constant 0 : i32
    %c0_i32_0 = arith.constant 0 : i32
    %c0_i32_1 = arith.constant 0 : i32
    return %c0_i32, %c0_i32_0 : i32, i32
  }
  func.func @transform_2(%arg0: i32) -> (i32, i32) {
    %c0_i32 = arith.constant 0 : i32
    %c0_i32_0 = arith.constant 0 : i32
    %c0_i32_1 = arith.constant 0 : i32
    return %c0_i32, %c0_i32_0 : i32, i32
  }
  func.func @transform_3(%arg0: i32) -> (i32, i32) {
    %c0_i32 = arith.constant 0 : i32
    %c0_i32_0 = arith.constant 0 : i32
    %c0_i32_1 = arith.constant 0 : i32
    return %c0_i32, %c0_i32_0 : i32, i32
  }
}

</mosaic_0001>

<bundles_post_ra>
// kernel: net_forward.4
= control target key start
LH: loop header
LB: loop body
LE: loop exit
PB: predicated region body
PF: predicated region fallthrough
CT: control target
= control target key end

     0   :  { %vm358_vm0 = vcmask 1044480   ;;  %vm359_vm1 = vcmask 1045504   ;;  %vm261_vm2 = vcmask 220160   ;;  %v4377_v1 = vmov 65535   ;;  %s5635_s1 = inlined_call_operand.vmem [shape: bf16[27,32], index: 1, kind: input, shape index: {}]   ;;  %s5636_s0 = inlined_call_operand.vmem [shape: bf16[4,512,27], index: 0, kind: input, shape index: {}]   ;;  %s5637_s2 = inlined_call_operand.vmem [shape: f32[1,32], index: 2, kind: input, shape index: {}]   ;;  %s5638_s3 = inlined_call_operand.vmem [shape: bf16[512,32], index: 3, kind: output, shape index: {}]  }
   0x1   :  { %v4245_v0 = vld [vmem:[%s5635_s1] sm:$0xff]   ;;  %v360_v2 = vsel %vm358_vm0, 4294967295, %v4377_v1  ;;  %v4246_v3 = vld [vmem:[%s5635_s1 + $0x8] sm:$0x3f]   ;;  %v4251_v10 = vld [vmem:[%s5636_s0 + $0x10] sm:$0xff]   ;;  %vm3188_vm3 = vcmask 257024  }
   0x2   :  { %3972 = vmatprep.subr.bf16.mxu0 %v4245_v0  ;;  %4040 = vmatprep.subr.bf16.mxu1 %v4245_v0  ;;  %v361_v4 = vsel %vm359_vm1, %v360_v2, 0  ;;  %v4247_v5 = vld [vmem:[%s5636_s0] sm:$0xff]   ;;  %v4249_v8 = vld [vmem:[%s5636_s0 + $0x8] sm:$0xff]   ;;  %v4252_v11 = vld [vmem:[%s5636_s0 + $0x110] sm:$0xff]  }
   0x3   :  { %3973 = vmatpush3.bf16.msra.mxu0 %v4245_v0  ;;  %4041 = vmatpush3.bf16.msra.mxu1 %v4245_v0  ;;  %v363_v6 = vand.u32 %v4246_v3, %v361_v4  ;;  %v4248_v7 = vld [vmem:[%s5636_s0 + $0x100] sm:$0xff]   ;;  %v4250_v9 = vld [vmem:[%s5636_s0 + $0x108] sm:$0xff]   ;;  %v4253_v12 = vld [vmem:[%s5636_s0 + $0x18] sm:$0xff]  }
   0x4   :  { %3976 = vmatprep.mubr.msk.bf16.mxu0 %vm261_vm2, %v4247_v5  ;;  %4044 = vmatprep.mubr.msk.bf16.mxu1 %vm261_vm2, %v4248_v7  ;;  %v4254_v13 = vld [vmem:[%s5636_s0 + $0x118] sm:$0xff]   ;;  %v4255_v14 = vld [vmem:[%s5636_s0 + $0x20] sm:$0xff]   ;;  %v4257_v16 = vld [vmem:[%s5636_s0 + $0x28] sm:$0xff]  }
   0x5   :  { %3974 = vmatprep.subr.bf16.mxu0 %v363_v6  ;;  %4042 = vmatprep.subr.bf16.mxu1 %v363_v6  ;;  %v4256_v15 = vld [vmem:[%s5636_s0 + $0x120] sm:$0xff]   ;;  %v4258_v17 = vld [vmem:[%s5636_s0 + $0x128] sm:$0xff]   ;;  %v4259_v18 = vld [vmem:[%s5636_s0 + $0x30] sm:$0xff]  }
   0x6   :  { %v4260_v19 = vld [vmem:[%s5636_s0 + $0x130] sm:$0xff]   ;;  %v4261_v20 = vld [vmem:[%s5636_s0 + $0x38] sm:$0xff]   ;;  %v4263_v22 = vld [vmem:[%s5636_s0 + $0x40] sm:$0xff]  }
   0x7   :  { %3975 = vmatpush3.bf16.msra.mxu0 %v363_v6  ;;  %4043 = vmatpush3.bf16.msra.mxu1 %v363_v6  ;;  %v4262_v21 = vld [vmem:[%s5636_s0 + $0x138] sm:$0xff]   ;;  %v4264_v23 = vld [vmem:[%s5636_s0 + $0x140] sm:$0xff]   ;;  %v4265_v24 = vld [vmem:[%s5636_s0 + $0x48] sm:$0xff]  }
   0x8   :  { %4108 = vmatprep.subr.bf16.mxu0 %v4245_v0  ;;  %4176 = vmatprep.subr.bf16.mxu1 %v4245_v0  ;;  %v4266_v25 = vld [vmem:[%s5636_s0 + $0x148] sm:$0xff]   ;;  %v4267_v26 = vld [vmem:[%s5636_s0 + $0x50] sm:$0xff]   ;;  %v4269_v28 = vld [vmem:[%s5636_s0 + $0x58] sm:$0xff]  }
   0x9   :  { %v4268_v27 = vld [vmem:[%s5636_s0 + $0x150] sm:$0xff]   ;;  %v4270_v29 = vld [vmem:[%s5636_s0 + $0x158] sm:$0xff]   ;;  %v4271_v30 = vld [vmem:[%s5636_s0 + $0x60] sm:$0xff]  }
   0xa   :  { %3977 = vmatmul.mubr.msk.bf16.vlgmr.msra.gmra.mrb[0].mxu0 %vm261_vm2, %v4249_v8  ;;  %4045 = vmatmul.mubr.msk.bf16.vlgmr.msra.gmra.mrb[0].mxu1 %vm261_vm2, %v4250_v9  ;;  %v4272_v31 = vld [vmem:[%s5636_s0 + $0x160] sm:$0xff]   ;;  %v4273_v32 = vld [vmem:[%s5636_s0 + $0x68] sm:$0xff]   ;;  %v4275_v34 = vld [vmem:[%s5636_s0 + $0x70] sm:$0xff]  }
   0xb   :  { %4109 = vmatpush3.bf16.msra.mxu0 %v4245_v0  ;;  %4177 = vmatpush3.bf16.msra.mxu1 %v4245_v0  ;;  %v4274_v33 = vld [vmem:[%s5636_s0 + $0x168] sm:$0xff]   ;;  %v4276_v35 = vld [vmem:[%s5636_s0 + $0x170] sm:$0xff]   ;;  %v4277_v36 = vld [vmem:[%s5636_s0 + $0x78] sm:$0xff]  }
   0xc   :  { %3980 = vmatprep.mubr.msk.bf16.mxu0 %vm261_vm2, %v4251_v10  ;;  %4048 = vmatprep.mubr.msk.bf16.mxu1 %vm261_vm2, %v4252_v11  ;;  %v4278_v37 = vld [vmem:[%s5636_s0 + $0x178] sm:$0xff]   ;;  %v4279_v38 = vld [vmem:[%s5636_s0 + $0x80] sm:$0xff]   ;;  %v4281_v40 = vld [vmem:[%s5636_s0 + $0x88] sm:$0xff]  }
   0xd   :  { %4110 = vmatprep.subr.bf16.mxu0 %v363_v6  ;;  %4178 = vmatprep.subr.bf16.mxu1 %v363_v6  ;;  %v4280_v39 = vld [vmem:[%s5636_s0 + $0x180] sm:$0xff]   ;;  %v4282_v41 = vld [vmem:[%s5636_s0 + $0x188] sm:$0xff]   ;;  %v4283_v42 = vld [vmem:[%s5636_s0 + $0x90] sm:$0xff]  }
   0xe   :  { %v4284_v43 = vld [vmem:[%s5636_s0 + $0x190] sm:$0xff]   ;;  %v4285_v44 = vld [vmem:[%s5636_s0 + $0x98] sm:$0xff]   ;;  %v4287_v46 = vld [vmem:[%s5636_s0 + $0xa0] sm:$0xff]  }
   0xf   :  { %4111 = vmatpush3.bf16.msra.mxu0 %v363_v6  ;;  %4179 = vmatpush3.bf16.msra.mxu1 %v363_v6  ;;  %v4286_v45 = vld [vmem:[%s5636_s0 + $0x198] sm:$0xff]   ;;  %v4288_v47 = vld [vmem:[%s5636_s0 + $0x1a0] sm:$0xff]   ;;  %v4289_v48 = vld [vmem:[%s5636_s0 + $0xa8] sm:$0xff]  }
  0x10   :  { %v4290_v49 = vld [vmem:[%s5636_s0 + $0x1a8] sm:$0xff]   ;;  %v4291_v50 = vld [vmem:[%s5636_s0 + $0xb0] sm:$0xff]   ;;  %v4293_v52 = vld [vmem:[%s5636_s0 + $0xb8] sm:$0xff]  }
  0x11   :  { %v4292_v51 = vld [vmem:[%s5636_s0 + $0x1b0] sm:$0xff]   ;;  %v4294_v53 = vld [vmem:[%s5636_s0 + $0x1b8] sm:$0xff]   ;;  %v4295_v54 = vld [vmem:[%s5636_s0 + $0xc0] sm:$0xff]  }
  0x12   :  { %3981 = vmatmul.mubr.msk.bf16.gmra.mrb[4].mxu0 %vm261_vm2, %v4253_v12  ;;  %4049 = vmatmul.mubr.msk.bf16.gmra.mrb[4].mxu1 %vm261_vm2, %v4254_v13  ;;  %v4296_v55 = vld [vmem:[%s5636_s0 + $0x1c0] sm:$0xff]   ;;  %v4297_v56 = vld [vmem:[%s5636_s0 + $0xc8] sm:$0xff]   ;;  %v4299_v58 = vld [vmem:[%s5636_s0 + $0xd0] sm:$0xff]  }
  0x13   :  { %3984 = vmatprep.mubr.msk.bf16.mxu0 %vm261_vm2, %v4255_v14  ;;  %4052 = vmatprep.mubr.msk.bf16.mxu1 %vm261_vm2, %v4256_v15  ;;  %v4298_v57 = vld [vmem:[%s5636_s0 + $0x1c8] sm:$0xff]   ;;  %v4300_v59 = vld [vmem:[%s5636_s0 + $0x1d0] sm:$0xff]   ;;  %v4301_v60 = vld [vmem:[%s5636_s0 + $0xd8] sm:$0xff]  }
  0x14   :  { %v4302_v61 = vld [vmem:[%s5636_s0 + $0x1d8] sm:$0xff]   ;;  %v4303_v62 = vld [vmem:[%s5636_s0 + $0xe0] sm:$0xff]   ;;  %v4305_v0 = vld [vmem:[%s5636_s0 + $0xe8] sm:$0xff]  }
  0x15   :  { %v4304_v63 = vld [vmem:[%s5636_s0 + $0x1e0] sm:$0xff]   ;;  %v4306_v1 = vld [vmem:[%s5636_s0 + $0x1e8] sm:$0xff]   ;;  %v4307_v2 = vld [vmem:[%s5636_s0 + $0xf0] sm:$0xff]  }
  0x16   :  { %v4308_v3 = vld [vmem:[%s5636_s0 + $0x1f0] sm:$0xff]   ;;  %v4309_v4 = vld [vmem:[%s5636_s0 + $0xf8] sm:$0xff]   ;;  %v4311_v6 = vld [vmem:[%s5636_s0 + $0x200] sm:$0xff]  }
  0x17   :  { %v4310_v5 = vld [vmem:[%s5636_s0 + $0x1f8] sm:$0xff]   ;;  %v4312_v7 = vld [vmem:[%s5636_s0 + $0x300] sm:$0xff]   ;;  %v4313_v8 = vld [vmem:[%s5636_s0 + $0x208] sm:$0xff]  }
  0x18   :  { %v4314_v9 = vld [vmem:[%s5636_s0 + $0x308] sm:$0xff]   ;;  %v4315_v10 = vld [vmem:[%s5636_s0 + $0x210] sm:$0xff]   ;;  %v4317_v12 = vld [vmem:[%s5636_s0 + $0x218] sm:$0xff]  }
  0x19   :  { %v4316_v11 = vld [vmem:[%s5636_s0 + $0x310] sm:$0xff]   ;;  %v4318_v13 = vld [vmem:[%s5636_s0 + $0x318] sm:$0xff]   ;;  %v4319_v14 = vld [vmem:[%s5636_s0 + $0x220] sm:$0xff]  }
  0x1a   :  { %3985 = vmatmul.mubr.msk.bf16.gmra.mrb[8].mxu0 %vm261_vm2, %v4257_v16  ;;  %4053 = vmatmul.mubr.msk.bf16.gmra.mrb[8].mxu1 %vm261_vm2, %v4258_v17  ;;  %v4320_v15 = vld [vmem:[%s5636_s0 + $0x320] sm:$0xff]   ;;  %v4321_v16 = vld [vmem:[%s5636_s0 + $0x228] sm:$0xff]  }
  0x1b   :  { %3988 = vmatprep.mubr.msk.bf16.mxu0 %vm261_vm2, %v4259_v18  ;;  %4056 = vmatprep.mubr.msk.bf16.mxu1 %vm261_vm2, %v4260_v19  ;;  %v4322_v17 = vld [vmem:[%s5636_s0 + $0x328] sm:$0xff]   ;;  %v4323_v18 = vld [vmem:[%s5636_s0 + $0x230] sm:$0xff]  }
  0x1c   :  { %v4324_v19 = vld [vmem:[%s5636_s0 + $0x330] sm:$0xff]  }
  0x22   :  { %3989 = vmatmul.mubr.msk.bf16.gmra.mrb[12].mxu0 %vm261_vm2, %v4261_v20  ;;  %4057 = vmatmul.mubr.msk.bf16.gmra.mrb[12].mxu1 %vm261_vm2, %v4262_v21  ;;  %v4325_v20 = vld [vmem:[%s5636_s0 + $0x238] sm:$0xff]  }
  0x23   :  { %3992 = vmatprep.mubr.msk.bf16.mxu0 %vm261_vm2, %v4263_v22  ;;  %4060 = vmatprep.mubr.msk.bf16.mxu1 %vm261_vm2, %v4264_v23  ;;  %v4326_v21 = vld [vmem:[%s5636_s0 + $0x338] sm:$0xff]   ;;  %v4327_v22 = vld [vmem:[%s5636_s0 + $0x240] sm:$0xff]  }
  0x24   :  { %v4328_v23 = vld [vmem:[%s5636_s0 + $0x340] sm:$0xff]  }
  0x2a   :  { %3993 = vmatmul.mubr.msk.bf16.gmra.mrb[16].mxu0 %vm261_vm2, %v4265_v24  ;;  %4061 = vmatmul.mubr.msk.bf16.gmra.mrb[16].mxu1 %vm261_vm2, %v4266_v25  ;;  %v4329_v24 = vld [vmem:[%s5636_s0 + $0x248] sm:$0xff]  }
  0x2b   :  { %3996 = vmatprep.mubr.msk.bf16.mxu0 %vm261_vm2, %v4267_v26  ;;  %4064 = vmatprep.mubr.msk.bf16.mxu1 %vm261_vm2, %v4268_v27  ;;  %v4330_v25 = vld [vmem:[%s5636_s0 + $0x348] sm:$0xff]   ;;  %v4331_v26 = vld [vmem:[%s5636_s0 + $0x250] sm:$0xff]  }
  0x2c   :  { %v4332_v27 = vld [vmem:[%s5636_s0 + $0x350] sm:$0xff]  }
  0x32   :  { %3997 = vmatmul.mubr.msk.bf16.gmra.mrb[20].mxu0 %vm261_vm2, %v4269_v28  ;;  %4065 = vmatmul.mubr.msk.bf16.gmra.mrb[20].mxu1 %vm261_vm2, %v4270_v29  ;;  %v4333_v28 = vld [vmem:[%s5636_s0 + $0x258] sm:$0xff]  }
  0x33   :  { %4000 = vmatprep.mubr.msk.bf16.mxu0 %vm261_vm2, %v4271_v30  ;;  %4068 = vmatprep.mubr.msk.bf16.mxu1 %vm261_vm2, %v4272_v31  ;;  %v4334_v29 = vld [vmem:[%s5636_s0 + $0x358] sm:$0xff]   ;;  %v4335_v30 = vld [vmem:[%s5636_s0 + $0x260] sm:$0xff]  }
  0x34   :  { %v4336_v31 = vld [vmem:[%s5636_s0 + $0x360] sm:$0xff]  }
  0x3a   :  { %4001 = vmatmul.mubr.msk.bf16.gmra.mrb[24].mxu0 %vm261_vm2, %v4273_v32  ;;  %4069 = vmatmul.mubr.msk.bf16.gmra.mrb[24].mxu1 %vm261_vm2, %v4274_v33  ;;  %v4337_v32 = vld [vmem:[%s5636_s0 + $0x268] sm:$0xff]  }
  0x3b   :  { %4004 = vmatprep.mubr.msk.bf16.mxu0 %vm261_vm2, %v4275_v34  ;;  %4072 = vmatprep.mubr.msk.bf16.mxu1 %vm261_vm2, %v4276_v35  ;;  %v4338_v33 = vld [vmem:[%s5636_s0 + $0x368] sm:$0xff]   ;;  %v4339_v34 = vld [vmem:[%s5636_s0 + $0x270] sm:$0xff]  }
  0x3c   :  { %v4340_v35 = vld [vmem:[%s5636_s0 + $0x370] sm:$0xff]  }
  0x42   :  { %4005 = vmatmul.mubr.msk.bf16.gmra.mrb[28].mxu0 %vm261_vm2, %v4277_v36  ;;  %4073 = vmatmul.mubr.msk.bf16.gmra.mrb[28].mxu1 %vm261_vm2, %v4278_v37  ;;  %v4341_v36 = vld [vmem:[%s5636_s0 + $0x278] sm:$0xff]  }
  0x43   :  { %4008 = vmatprep.mubr.msk.bf16.mxu0 %vm261_vm2, %v4279_v38  ;;  %4076 = vmatprep.mubr.msk.bf16.mxu1 %vm261_vm2, %v4280_v39  ;;  %v4342_v37 = vld [vmem:[%s5636_s0 + $0x378] sm:$0xff]   ;;  %v4343_v38 = vld [vmem:[%s5636_s0 + $0x280] sm:$0xff]  }
  0x44   :  { %v4344_v39 = vld [vmem:[%s5636_s0 + $0x380] sm:$0xff]  }
  0x4a   :  { %4009 = vmatmul.mubr.msk.bf16.gmra.mrb[32].mxu0 %vm261_vm2, %v4281_v40  ;;  %4077 = vmatmul.mubr.msk.bf16.gmra.mrb[32].mxu1 %vm261_vm2, %v4282_v41  ;;  %v4345_v40 = vld [vmem:[%s5636_s0 + $0x288] sm:$0xff]  }
  0x4b   :  { %4012 = vmatprep.mubr.msk.bf16.mxu0 %vm261_vm2, %v4283_v42  ;;  %4080 = vmatprep.mubr.msk.bf16.mxu1 %vm261_vm2, %v4284_v43  ;;  %v4346_v41 = vld [vmem:[%s5636_s0 + $0x388] sm:$0xff]   ;;  %v4347_v42 = vld [vmem:[%s5636_s0 + $0x290] sm:$0xff]  }
  0x4c   :  { %v4348_v43 = vld [vmem:[%s5636_s0 + $0x390] sm:$0xff]  }
  0x52   :  { %4013 = vmatmul.mubr.msk.bf16.gmra.mrb[36].mxu0 %vm261_vm2, %v4285_v44  ;;  %4081 = vmatmul.mubr.msk.bf16.gmra.mrb[36].mxu1 %vm261_vm2, %v4286_v45  ;;  %v4349_v44 = vld [vmem:[%s5636_s0 + $0x298] sm:$0xff]  }
  0x53   :  { %4016 = vmatprep.mubr.msk.bf16.mxu0 %vm261_vm2, %v4287_v46  ;;  %4084 = vmatprep.mubr.msk.bf16.mxu1 %vm261_vm2, %v4288_v47  ;;  %v4350_v45 = vld [vmem:[%s5636_s0 + $0x398] sm:$0xff]   ;;  %v4351_v46 = vld [vmem:[%s5636_s0 + $0x2a0] sm:$0xff]  }
  0x54   :  { %v4352_v47 = vld [vmem:[%s5636_s0 + $0x3a0] sm:$0xff]  }
  0x5a   :  { %4017 = vmatmul.mubr.msk.bf16.gmra.mrb[40].mxu0 %vm261_vm2, %v4289_v48  ;;  %4085 = vmatmul.mubr.msk.bf16.gmra.mrb[40].mxu1 %vm261_vm2, %v4290_v49  ;;  %v4353_v48 = vld [vmem:[%s5636_s0 + $0x2a8] sm:$0xff]  }
  0x5b   :  { %4020 = vmatprep.mubr.msk.bf16.mxu0 %vm261_vm2, %v4291_v50  ;;  %4088 = vmatprep.mubr.msk.bf16.mxu1 %vm261_vm2, %v4292_v51  ;;  %v4354_v49 = vld [vmem:[%s5636_s0 + $0x3a8] sm:$0xff]   ;;  %v4355_v50 = vld [vmem:[%s5636_s0 + $0x2b0] sm:$0xff]  }
  0x5c   :  { %v4356_v51 = vld [vmem:[%s5636_s0 + $0x3b0] sm:$0xff]  }
  0x62   :  { %4021 = vmatmul.mubr.msk.bf16.gmra.mrb[44].mxu0 %vm261_vm2, %v4293_v52  ;;  %4089 = vmatmul.mubr.msk.bf16.gmra.mrb[44].mxu1 %vm261_vm2, %v4294_v53  ;;  %v4845_v52 = vld [vmem:[%s5637_s2] ss:$0 sm:$0xff] }
  0x63   :  { %4024 = vmatprep.mubr.msk.bf16.mxu0 %vm261_vm2, %v4295_v54  ;;  %4092 = vmatprep.mubr.msk.bf16.mxu1 %vm261_vm2, %v4296_v55 }
  0x6a   :  { %4025 = vmatmul.mubr.msk.bf16.gmra.mrb[48].mxu0 %vm261_vm2, %v4297_v56  ;;  %4093 = vmatmul.mubr.msk.bf16.gmra.mrb[48].mxu1 %vm261_vm2, %v4298_v57 }
  0x6b   :  { %4028 = vmatprep.mubr.msk.bf16.mxu0 %vm261_vm2, %v4299_v58  ;;  %4096 = vmatprep.mubr.msk.bf16.mxu1 %vm261_vm2, %v4300_v59  ;;  %v4357_v59 = vld [vmem:[%s5636_s0 + $0x2b8] sm:$0xff]  }
  0x72   :  { %4029 = vmatmul.mubr.msk.bf16.gmra.mrb[52].mxu0 %vm261_vm2, %v4301_v60  ;;  %4097 = vmatmul.mubr.msk.bf16.gmra.mrb[52].mxu1 %vm261_vm2, %v4302_v61  ;;  %v4358_v60 = vld [vmem:[%s5636_s0 + $0x3b8] sm:$0xff]  }
  0x73   :  { %4032 = vmatprep.mubr.msk.bf16.mxu0 %vm261_vm2, %v4303_v62  ;;  %4100 = vmatprep.mubr.msk.bf16.mxu1 %vm261_vm2, %v4304_v63 }
  0x7a   :  { %4033 = vmatmul.mubr.msk.bf16.gmra.mrb[56].mxu0 %vm261_vm2, %v4305_v0  ;;  %4101 = vmatmul.mubr.msk.bf16.gmra.mrb[56].mxu1 %vm261_vm2, %v4306_v1  ;;  %v4359_v1 = vld [vmem:[%s5636_s0 + $0x2c0] sm:$0xff]  }
  0x7b   :  { %4036 = vmatprep.mubr.msk.bf16.mxu0 %vm261_vm2, %v4307_v2  ;;  %4104 = vmatprep.mubr.msk.bf16.mxu1 %vm261_vm2, %v4308_v3  ;;  %v4360_v2 = vld [vmem:[%s5636_s0 + $0x3c0] sm:$0xff]  }
  0x82   :  { %4037 = vmatmul.mubr.msk.bf16.gmra.mrb[60].mxu0 %vm261_vm2, %v4309_v4  ;;  %4105 = vmatmul.mubr.msk.bf16.gmra.mrb[60].mxu1 %vm261_vm2, %v4310_v5 }
  0x83   :  { %4112 = vmatprep.mubr.msk.bf16.mxu0 %vm261_vm2, %v4311_v6  ;;  %4180 = vmatprep.mubr.msk.bf16.mxu1 %vm261_vm2, %v4312_v7 }
  0x8a   :  { %4113 = vmatmul.mubr.msk.bf16.vlgmr.msra.gmra.mrb[64].mxu0 %vm261_vm2, %v4313_v8  ;;  %4181 = vmatmul.mubr.msk.bf16.vlgmr.msra.gmra.mrb[64].mxu1 %vm261_vm2, %v4314_v9 }
  0x8b   :  { %4116 = vmatprep.mubr.msk.bf16.mxu0 %vm261_vm2, %v4315_v10  ;;  %4184 = vmatprep.mubr.msk.bf16.mxu1 %vm261_vm2, %v4316_v11 }
  0x92   :  { %4117 = vmatmul.mubr.msk.bf16.gmra.mrb[68].mxu0 %vm261_vm2, %v4317_v12  ;;  %4185 = vmatmul.mubr.msk.bf16.gmra.mrb[68].mxu1 %vm261_vm2, %v4318_v13 }
  0x93   :  { %4120 = vmatprep.mubr.msk.bf16.mxu0 %vm261_vm2, %v4319_v14  ;;  %4188 = vmatprep.mubr.msk.bf16.mxu1 %vm261_vm2, %v4320_v15 }
  0x9a   :  { %4121 = vmatmul.mubr.msk.bf16.gmra.mrb[72].mxu0 %vm261_vm2, %v4321_v16  ;;  %4189 = vmatmul.mubr.msk.bf16.gmra.mrb[72].mxu1 %vm261_vm2, %v4322_v17 }
  0x9b   :  { %4124 = vmatprep.mubr.msk.bf16.mxu0 %vm261_vm2, %v4323_v18  ;;  %4192 = vmatprep.mubr.msk.bf16.mxu1 %vm261_vm2, %v4324_v19 }
  0xa2   :  { %4125 = vmatmul.mubr.msk.bf16.gmra.mrb[76].mxu0 %vm261_vm2, %v4325_v20  ;;  %4193 = vmatmul.mubr.msk.bf16.gmra.mrb[76].mxu1 %vm261_vm2, %v4326_v21 }
  0xa3   :  { %4128 = vmatprep.mubr.msk.bf16.mxu0 %vm261_vm2, %v4327_v22  ;;  %4196 = vmatprep.mubr.msk.bf16.mxu1 %vm261_vm2, %v4328_v23 }
  0xaa   :  { %4129 = vmatmul.mubr.msk.bf16.gmra.mrb[80].mxu0 %vm261_vm2, %v4329_v24  ;;  %4197 = vmatmul.mubr.msk.bf16.gmra.mrb[80].mxu1 %vm261_vm2, %v4330_v25 }
  0xab   :  { %4132 = vmatprep.mubr.msk.bf16.mxu0 %vm261_vm2, %v4331_v26  ;;  %4200 = vmatprep.mubr.msk.bf16.mxu1 %vm261_vm2, %v4332_v27  ;;  %v4361_v27 = vld [vmem:[%s5636_s0 + $0x2c8] sm:$0xff]  }
  0xb2   :  { %4133 = vmatmul.mubr.msk.bf16.gmra.mrb[84].mxu0 %vm261_vm2, %v4333_v28  ;;  %4201 = vmatmul.mubr.msk.bf16.gmra.mrb[84].mxu1 %vm261_vm2, %v4334_v29  ;;  %v4362_v28 = vld [vmem:[%s5636_s0 + $0x3c8] sm:$0xff]  }
  0xb3   :  { %4136 = vmatprep.mubr.msk.bf16.mxu0 %vm261_vm2, %v4335_v30  ;;  %4204 = vmatprep.mubr.msk.bf16.mxu1 %vm261_vm2, %v4336_v31 }
  0xba   :  { %4137 = vmatmul.mubr.msk.bf16.gmra.mrb[88].mxu0 %vm261_vm2, %v4337_v32  ;;  %4205 = vmatmul.mubr.msk.bf16.gmra.mrb[88].mxu1 %vm261_vm2, %v4338_v33  ;;  %v4363_v33 = vld [vmem:[%s5636_s0 + $0x2d0] sm:$0xff]  }
  0xbb   :  { %4140 = vmatprep.mubr.msk.bf16.mxu0 %vm261_vm2, %v4339_v34  ;;  %4208 = vmatprep.mubr.msk.bf16.mxu1 %vm261_vm2, %v4340_v35  ;;  %v4364_v34 = vld [vmem:[%s5636_s0 + $0x3d0] sm:$0xff]  }
  0xc2   :  { %4141 = vmatmul.mubr.msk.bf16.gmra.mrb[92].mxu0 %vm261_vm2, %v4341_v36  ;;  %4209 = vmatmul.mubr.msk.bf16.gmra.mrb[92].mxu1 %vm261_vm2, %v4342_v37 }
  0xc3   :  { %4144 = vmatprep.mubr.msk.bf16.mxu0 %vm261_vm2, %v4343_v38  ;;  %4212 = vmatprep.mubr.msk.bf16.mxu1 %vm261_vm2, %v4344_v39 }
  0xca   :  { %4145 = vmatmul.mubr.msk.bf16.gmra.mrb[96].mxu0 %vm261_vm2, %v4345_v40  ;;  %4213 = vmatmul.mubr.msk.bf16.gmra.mrb[96].mxu1 %vm261_vm2, %v4346_v41 }
  0xcb   :  { %4148 = vmatprep.mubr.msk.bf16.mxu0 %vm261_vm2, %v4347_v42  ;;  %4216 = vmatprep.mubr.msk.bf16.mxu1 %vm261_vm2, %v4348_v43 }
  0xd2   :  { %4149 = vmatmul.mubr.msk.bf16.gmra.mrb[100].mxu0 %vm261_vm2, %v4349_v44  ;;  %4217 = vmatmul.mubr.msk.bf16.gmra.mrb[100].mxu1 %vm261_vm2, %v4350_v45 }
  0xd3   :  { %4152 = vmatprep.mubr.msk.bf16.mxu0 %vm261_vm2, %v4351_v46  ;;  %4220 = vmatprep.mubr.msk.bf16.mxu1 %vm261_vm2, %v4352_v47 }
  0xda   :  { %4153 = vmatmul.mubr.msk.bf16.gmra.mrb[104].mxu0 %vm261_vm2, %v4353_v48  ;;  %4221 = vmatmul.mubr.msk.bf16.gmra.mrb[104].mxu1 %vm261_vm2, %v4354_v49 }
  0xdb   :  { %4156 = vmatprep.mubr.msk.bf16.mxu0 %vm261_vm2, %v4355_v50  ;;  %4224 = vmatprep.mubr.msk.bf16.mxu1 %vm261_vm2, %v4356_v51 }
  0xdd   :  { %v3978_v53 = vpop.f32.mrb[0].mxu0  ;;  %v4046_v54 = vpop.f32.mrb[0].mxu1 }
  0xde   :  { %v408_v55 = vadd.f32 %v3978_v53, %v4845_v52  ;;  %v1082_v56 = vadd.f32 %v4046_v54, %v4845_v52  ;;  %v399_v57 = vpop.f32.mrb[1].mxu0  ;;  %v1073_v58 = vpop.f32.mrb[1].mxu1 }
  0xdf   :  { %v400_v61 = vadd.f32 %v4845_v52, %v399_v57  ;;  %v1074_v62 = vadd.f32 %v4845_v52, %v1073_v58  ;;  %v3979_v63 = vpop.f32.mrb[2].mxu0  ;;  %v4047_v0 = vpop.f32.mrb[2].mxu1 }
  0xe0   :  { %v656_v3 = vmax.f32 %v408_v55, 0.0  ;;  %v1330_v4 = vmax.f32 %v1082_v56, 0.0  ;;  %v411_v5 = vadd.f32 %v3979_v63, %v4845_v52  ;;  %v1085_v6 = vadd.f32 %v4047_v0, %v4845_v52  ;;  %v402_v7 = vpop.f32.mrb[3].mxu0  ;;  %v1076_v8 = vpop.f32.mrb[3].mxu1 }
  0xe1   :  { %v654_v9 = vmax.f32 %v400_v61, 0.0  ;;  %v1328_v10 = vmax.f32 %v1074_v62, 0.0  ;;  %v403_v11 = vadd.f32 %v4845_v52, %v402_v7  ;;  %v1077_v12 = vadd.f32 %v4845_v52, %v1076_v8  ;;  %v4366_v61 = vld [vmem:[%s5636_s0 + $0x3d8] sm:$0xff]  }
  0xe2   :  { %v4869_v13 = vmax.f32 %v656_v3, %v1330_v4  ;;  %v657_v14 = vmax.f32 %v411_v5, 0.0  ;;  %v1331_v15 = vmax.f32 %v1085_v6, 0.0  ;;  %4157 = vmatmul.mubr.msk.bf16.gmra.mrb[108].mxu0 %vm261_vm2, %v4357_v59  ;;  %4225 = vmatmul.mubr.msk.bf16.gmra.mrb[108].mxu1 %vm261_vm2, %v4358_v60  ;;  %v4365_v60 = vld [vmem:[%s5636_s0 + $0x2d8] sm:$0xff]   ;;  %v4368_v3 = vld [vmem:[%s5636_s0 + $0x3e0] sm:$0xff]  }
  0xe3   :  { %v4873_v16 = vmax.f32 %v654_v9, %v1328_v10  ;;  %v655_v17 = vmax.f32 %v403_v11, 0.0  ;;  %v1329_v18 = vmax.f32 %v1077_v12, 0.0  ;;  %4160 = vmatprep.mubr.msk.bf16.mxu0 %vm261_vm2, %v4359_v1  ;;  %4228 = vmatprep.mubr.msk.bf16.mxu1 %vm261_vm2, %v4360_v2  ;;  %v4367_v2 = vld [vmem:[%s5636_s0 + $0x2e0] sm:$0xff]  }
  0xe4   :  { %v4877_v19 = vmax.f32 %v657_v14, %v1331_v15 }
  0xe5   :  { %v4879_v20 = vmax.f32 %v655_v17, %v1329_v18  ;;  %v3982_v21 = vpop.f32.mrb[4].mxu0  ;;  %v4050_v22 = vpop.f32.mrb[4].mxu1 }
  0xe6   :  { %v424_v23 = vadd.f32 %v3982_v21, %v4845_v52  ;;  %v1098_v24 = vadd.f32 %v4050_v22, %v4845_v52  ;;  %v415_v25 = vpop.f32.mrb[5].mxu0  ;;  %v1089_v26 = vpop.f32.mrb[5].mxu1 }
  0xe7   :  { %v416_v29 = vadd.f32 %v4845_v52, %v415_v25  ;;  %v1090_v30 = vadd.f32 %v4845_v52, %v1089_v26  ;;  %v3983_v31 = vpop.f32.mrb[6].mxu0  ;;  %v4051_v32 = vpop.f32.mrb[6].mxu1 }
  0xe8   :  { %v660_v35 = vmax.f32 %v424_v23, 0.0  ;;  %v1334_v36 = vmax.f32 %v1098_v24, 0.0  ;;  %v427_v37 = vadd.f32 %v3983_v31, %v4845_v52  ;;  %v1101_v38 = vadd.f32 %v4051_v32, %v4845_v52  ;;  %v418_v39 = vpop.f32.mrb[7].mxu0  ;;  %v1092_v40 = vpop.f32.mrb[7].mxu1  ;;  %v4369_v32 = vld [vmem:[%s5636_s0 + $0x2e8] sm:$0xff]  }
  0xe9   :  { %v658_v41 = vmax.f32 %v416_v29, 0.0  ;;  %v1332_v42 = vmax.f32 %v1090_v30, 0.0  ;;  %v419_v43 = vadd.f32 %v4845_v52, %v418_v39  ;;  %v1093_v44 = vadd.f32 %v4845_v52, %v1092_v40  ;;  %v4372_v39 = vld [vmem:[%s5636_s0 + $0x3f0] sm:$0xff]  }
  0xea   :  { %v4901_v45 = vmax.f32 %v660_v35, %v1334_v36  ;;  %v661_v46 = vmax.f32 %v427_v37, 0.0  ;;  %v1335_v47 = vmax.f32 %v1101_v38, 0.0  ;;  %4161 = vmatmul.mubr.msk.bf16.gmra.mrb[112].mxu0 %vm261_vm2, %v4361_v27  ;;  %4229 = vmatmul.mubr.msk.bf16.gmra.mrb[112].mxu1 %vm261_vm2, %v4362_v28  ;;  %v4371_v38 = vld [vmem:[%s5636_s0 + $0x2f0] sm:$0xff]  }
  0xeb   :  { %v4905_v48 = vmax.f32 %v658_v41, %v1332_v42  ;;  %v659_v49 = vmax.f32 %v419_v43, 0.0  ;;  %v1333_v50 = vmax.f32 %v1093_v44, 0.0  ;;  %4164 = vmatprep.mubr.msk.bf16.mxu0 %vm261_vm2, %v4363_v33  ;;  %4232 = vmatprep.mubr.msk.bf16.mxu1 %vm261_vm2, %v4364_v34  ;;  %v4370_v33 = vld [vmem:[%s5636_s0 + $0x3e8] sm:$0xff]  }
  0xec   :  { %v4909_v51 = vmax.f32 %v661_v46, %v1335_v47 }
  0xed   :  { %v4911_v53 = vmax.f32 %v659_v49, %v1333_v50  ;;  %v3986_v54 = vpop.f32.mrb[8].mxu0  ;;  %v4054_v55 = vpop.f32.mrb[8].mxu1 }
  0xee   :  { %v440_v56 = vadd.f32 %v3986_v54, %v4845_v52  ;;  %v1114_v57 = vadd.f32 %v4054_v55, %v4845_v52  ;;  %v431_v58 = vpop.f32.mrb[9].mxu0  ;;  %v1105_v59 = vpop.f32.mrb[9].mxu1 }
  0xef   :  { %v432_v62 = vadd.f32 %v4845_v52, %v431_v58  ;;  %v1106_v63 = vadd.f32 %v4845_v52, %v1105_v59  ;;  %v3987_v0 = vpop.f32.mrb[10].mxu0  ;;  %v4055_v1 = vpop.f32.mrb[10].mxu1 }
  0xf0   :  { %v664_v4 = vmax.f32 %v440_v56, 0.0  ;;  %v1338_v5 = vmax.f32 %v1114_v57, 0.0  ;;  %v443_v6 = vadd.f32 %v3987_v0, %v4845_v52  ;;  %v1117_v7 = vadd.f32 %v4055_v1, %v4845_v52  ;;  %v434_v8 = vpop.f32.mrb[11].mxu0  ;;  %v1108_v9 = vpop.f32.mrb[11].mxu1 }
  0xf1   :  { %v662_v10 = vmax.f32 %v432_v62, 0.0  ;;  %v1336_v11 = vmax.f32 %v1106_v63, 0.0  ;;  %v435_v12 = vadd.f32 %v4845_v52, %v434_v8  ;;  %v1109_v14 = vadd.f32 %v4845_v52, %v1108_v9 }
  0xf2   :  { %v4933_v15 = vmax.f32 %v664_v4, %v1338_v5  ;;  %v665_v17 = vmax.f32 %v443_v6, 0.0  ;;  %v1339_v18 = vmax.f32 %v1117_v7, 0.0  ;;  %4165 = vmatmul.mubr.msk.bf16.gmra.mrb[116].mxu0 %vm261_vm2, %v4365_v60  ;;  %4233 = vmatmul.mubr.msk.bf16.gmra.mrb[116].mxu1 %vm261_vm2, %v4366_v61  ;;  %v4373_v5 = vld [vmem:[%s5636_s0 + $0x2f8] sm:$0xff]  }
  0xf3   :  { %v4937_v21 = vmax.f32 %v662_v10, %v1336_v11  ;;  %v663_v22 = vmax.f32 %v435_v12, 0.0  ;;  %v1337_v23 = vmax.f32 %v1109_v14, 0.0  ;;  %4168 = vmatprep.mubr.msk.bf16.mxu0 %vm261_vm2, %v4367_v2  ;;  %4236 = vmatprep.mubr.msk.bf16.mxu1 %vm261_vm2, %v4368_v3  ;;  %v4374_v6 = vld [vmem:[%s5636_s0 + $0x3f8] sm:$0xff]  }
  0xf4   :  { %v4941_v24 = vmax.f32 %v665_v17, %v1339_v18 }
  0xf5   :  { %v4943_v25 = vmax.f32 %v663_v22, %v1337_v23  ;;  %v3990_v26 = vpop.f32.mrb[12].mxu0  ;;  %v4058_v27 = vpop.f32.mrb[12].mxu1 }
  0xf6   :  { %v456_v28 = vadd.f32 %v3990_v26, %v4845_v52  ;;  %v1130_v29 = vadd.f32 %v4058_v27, %v4845_v52  ;;  %v447_v30 = vpop.f32.mrb[13].mxu0  ;;  %v1121_v31 = vpop.f32.mrb[13].mxu1 }
  0xf7   :  { %v448_v34 = vadd.f32 %v4845_v52, %v447_v30  ;;  %v1122_v35 = vadd.f32 %v4845_v52, %v1121_v31  ;;  %v3991_v36 = vpop.f32.mrb[14].mxu0  ;;  %v4059_v37 = vpop.f32.mrb[14].mxu1 }
  0xf8   :  { %v668_v40 = vmax.f32 %v456_v28, 0.0  ;;  %v1342_v41 = vmax.f32 %v1130_v29, 0.0  ;;  %v459_v42 = vadd.f32 %v3991_v36, %v4845_v52  ;;  %v1133_v43 = vadd.f32 %v4059_v37, %v4845_v52  ;;  %v450_v44 = vpop.f32.mrb[15].mxu0  ;;  %v1124_v46 = vpop.f32.mrb[15].mxu1 }
  0xf9   :  { %v666_v47 = vmax.f32 %v448_v34, 0.0  ;;  %v1340_v49 = vmax.f32 %v1122_v35, 0.0  ;;  %v451_v50 = vadd.f32 %v4845_v52, %v450_v44  ;;  %v1125_v54 = vadd.f32 %v4845_v52, %v1124_v46 }
  0xfa   :  { %v4965_v55 = vmax.f32 %v668_v40, %v1342_v41  ;;  %v669_v56 = vmax.f32 %v459_v42, 0.0  ;;  %v1343_v57 = vmax.f32 %v1133_v43, 0.0  ;;  %4169 = vmatmul.mubr.msk.bf16.gmra.mrb[120].mxu0 %vm261_vm2, %v4369_v32  ;;  %4237 = vmatmul.mubr.msk.bf16.gmra.mrb[120].mxu1 %vm261_vm2, %v4370_v33 }
  0xfb   :  { %v4969_v58 = vmax.f32 %v666_v47, %v1340_v49  ;;  %v667_v59 = vmax.f32 %v451_v50, 0.0  ;;  %v1341_v60 = vmax.f32 %v1125_v54, 0.0  ;;  %4172 = vmatprep.mubr.msk.bf16.mxu0 %vm261_vm2, %v4371_v38  ;;  %4240 = vmatprep.mubr.msk.bf16.mxu1 %vm261_vm2, %v4372_v39 }
  0xfc   :  { %v4973_v61 = vmax.f32 %v669_v56, %v1343_v57 }
  0xfd   :  { %v4975_v62 = vmax.f32 %v667_v59, %v1341_v60  ;;  %v3994_v63 = vpop.f32.mrb[16].mxu0  ;;  %v4062_v0 = vpop.f32.mrb[16].mxu1 }
  0xfe   :  { %v472_v1 = vadd.f32 %v3994_v63, %v4845_v52  ;;  %v1146_v2 = vadd.f32 %v4062_v0, %v4845_v52  ;;  %v463_v3 = vpop.f32.mrb[17].mxu0  ;;  %v1137_v4 = vpop.f32.mrb[17].mxu1 }
  0xff   :  { %v464_v7 = vadd.f32 %v4845_v52, %v463_v3  ;;  %v1138_v8 = vadd.f32 %v4845_v52, %v1137_v4  ;;  %v3995_v9 = vpop.f32.mrb[18].mxu0  ;;  %v4063_v10 = vpop.f32.mrb[18].mxu1 }
 0x100   :  { %v672_v11 = vmax.f32 %v472_v1, 0.0  ;;  %v1346_v12 = vmax.f32 %v1146_v2, 0.0  ;;  %v475_v14 = vadd.f32 %v3995_v9, %v4845_v52  ;;  %v1149_v17 = vadd.f32 %v4063_v10, %v4845_v52  ;;  %v466_v18 = vpop.f32.mrb[19].mxu0  ;;  %v1140_v22 = vpop.f32.mrb[19].mxu1 }
 0x101   :  { %v670_v23 = vmax.f32 %v464_v7, 0.0  ;;  %v1344_v26 = vmax.f32 %v1138_v8, 0.0  ;;  %v467_v27 = vadd.f32 %v4845_v52, %v466_v18  ;;  %v1141_v28 = vadd.f32 %v4845_v52, %v1140_v22 }
 0x102   :  { %v4991_v29 = vmax.f32 %v672_v11, %v1346_v12  ;;  %v673_v30 = vmax.f32 %v475_v14, 0.0  ;;  %v1347_v31 = vmax.f32 %v1149_v17, 0.0  ;;  %4173 = vmatmul.mubr.msk.bf16.gmra.mrb[124].mxu0 %vm261_vm2, %v4373_v5  ;;  %4241 = vmatmul.mubr.msk.bf16.gmra.mrb[124].mxu1 %vm261_vm2, %v4374_v6 }
 0x103   :  { %v4995_v32 = vmax.f32 %v670_v23, %v1344_v26  ;;  %v671_v33 = vmax.f32 %v467_v27, 0.0  ;;  %v1345_v34 = vmax.f32 %v1141_v28, 0.0 }
 0x104   :  { %v4997_v35 = vmax.f32 %v673_v30, %v1347_v31 }
 0x105   :  { %v4999_v36 = vmax.f32 %v671_v33, %v1345_v34  ;;  %v3998_v37 = vpop.f32.mrb[20].mxu0  ;;  %v4066_v38 = vpop.f32.mrb[20].mxu1 }
 0x106   :  { %v488_v39 = vadd.f32 %v3998_v37, %v4845_v52  ;;  %v1162_v40 = vadd.f32 %v4066_v38, %v4845_v52  ;;  %v479_v41 = vpop.f32.mrb[21].mxu0  ;;  %v1153_v42 = vpop.f32.mrb[21].mxu1 }
 0x107   :  { %v480_v43 = vadd.f32 %v4845_v52, %v479_v41  ;;  %v1154_v44 = vadd.f32 %v4845_v52, %v1153_v42  ;;  %v3999_v46 = vpop.f32.mrb[22].mxu0  ;;  %v4067_v47 = vpop.f32.mrb[22].mxu1 }
 0x108   :  { %v676_v49 = vmax.f32 %v488_v39, 0.0  ;;  %v1350_v50 = vmax.f32 %v1162_v40, 0.0  ;;  %v491_v54 = vadd.f32 %v3999_v46, %v4845_v52  ;;  %v1165_v56 = vadd.f32 %v4067_v47, %v4845_v52  ;;  %v482_v57 = vpop.f32.mrb[23].mxu0  ;;  %v1156_v59 = vpop.f32.mrb[23].mxu1 }
 0x109   :  { %v674_v60 = vmax.f32 %v480_v43, 0.0  ;;  %v1348_v63 = vmax.f32 %v1154_v44, 0.0  ;;  %v483_v0 = vadd.f32 %v4845_v52, %v482_v57  ;;  %v1157_v1 = vadd.f32 %v4845_v52, %v1156_v59 }
 0x10a   :  { %v5009_v2 = vmax.f32 %v676_v49, %v1350_v50  ;;  %v677_v3 = vmax.f32 %v491_v54, 0.0  ;;  %v1351_v4 = vmax.f32 %v1165_v56, 0.0 }
 0x10b   :  { %v5011_v5 = vmax.f32 %v674_v60, %v1348_v63  ;;  %v675_v6 = vmax.f32 %v483_v0, 0.0  ;;  %v1349_v7 = vmax.f32 %v1157_v1, 0.0 }
 0x10c   :  { %v5013_v8 = vmax.f32 %v677_v3, %v1351_v4 }
 0x10d   :  { %v5015_v9 = vmax.f32 %v675_v6, %v1349_v7  ;;  %v4002_v10 = vpop.f32.mrb[24].mxu0  ;;  %v4070_v11 = vpop.f32.mrb[24].mxu1 }
 0x10e   :  { %v504_v12 = vadd.f32 %v4002_v10, %v4845_v52  ;;  %v1178_v14 = vadd.f32 %v4070_v11, %v4845_v52  ;;  %v495_v17 = vpop.f32.mrb[25].mxu0  ;;  %v1169_v18 = vpop.f32.mrb[25].mxu1 }
 0x10f   :  { %v496_v22 = vadd.f32 %v4845_v52, %v495_v17  ;;  %v1170_v23 = vadd.f32 %v4845_v52, %v1169_v18  ;;  %v4003_v26 = vpop.f32.mrb[26].mxu0  ;;  %v4071_v27 = vpop.f32.mrb[26].mxu1 }
 0x110   :  { %v680_v28 = vmax.f32 %v504_v12, 0.0  ;;  %v1354_v30 = vmax.f32 %v1178_v14, 0.0  ;;  %v507_v31 = vadd.f32 %v4003_v26, %v4845_v52  ;;  %v1181_v33 = vadd.f32 %v4071_v27, %v4845_v52  ;;  %v498_v34 = vpop.f32.mrb[27].mxu0  ;;  %v1172_v37 = vpop.f32.mrb[27].mxu1 }
 0x111   :  { %v678_v38 = vmax.f32 %v496_v22, 0.0  ;;  %v1352_v39 = vmax.f32 %v1170_v23, 0.0  ;;  %v499_v40 = vadd.f32 %v4845_v52, %v498_v34  ;;  %v1173_v41 = vadd.f32 %v4845_v52, %v1172_v37 }
 0x112   :  { %v5025_v42 = vmax.f32 %v680_v28, %v1354_v30  ;;  %v681_v43 = vmax.f32 %v507_v31, 0.0  ;;  %v1355_v44 = vmax.f32 %v1181_v33, 0.0 }
 0x113   :  { %v5027_v46 = vmax.f32 %v678_v38, %v1352_v39  ;;  %v679_v47 = vmax.f32 %v499_v40, 0.0  ;;  %v1353_v49 = vmax.f32 %v1173_v41, 0.0 }
 0x114   :  { %v5029_v50 = vmax.f32 %v681_v43, %v1355_v44 }
 0x115   :  { %v5031_v54 = vmax.f32 %v679_v47, %v1353_v49  ;;  %v4006_v56 = vpop.f32.mrb[28].mxu0  ;;  %v4074_v57 = vpop.f32.mrb[28].mxu1 }
 0x116   :  { %v520_v59 = vadd.f32 %v4006_v56, %v4845_v52  ;;  %v1194_v60 = vadd.f32 %v4074_v57, %v4845_v52  ;;  %v511_v63 = vpop.f32.mrb[29].mxu0  ;;  %v1185_v0 = vpop.f32.mrb[29].mxu1 }
 0x117   :  { %v512_v1 = vadd.f32 %v4845_v52, %v511_v63  ;;  %v1186_v3 = vadd.f32 %v4845_v52, %v1185_v0  ;;  %v4007_v4 = vpop.f32.mrb[30].mxu0  ;;  %v4075_v6 = vpop.f32.mrb[30].mxu1 }
 0x118   :  { %v684_v7 = vmax.f32 %v520_v59, 0.0  ;;  %v1358_v10 = vmax.f32 %v1194_v60, 0.0  ;;  %v523_v11 = vadd.f32 %v4007_v4, %v4845_v52  ;;  %v1197_v12 = vadd.f32 %v4075_v6, %v4845_v52  ;;  %v514_v14 = vpop.f32.mrb[31].mxu0  ;;  %v1188_v17 = vpop.f32.mrb[31].mxu1 }
 0x119   :  { %v682_v18 = vmax.f32 %v512_v1, 0.0  ;;  %v1356_v22 = vmax.f32 %v1186_v3, 0.0  ;;  %v515_v23 = vadd.f32 %v4845_v52, %v514_v14  ;;  %v1189_v26 = vadd.f32 %v4845_v52, %v1188_v17 }
 0x11a   :  { %v5041_v27 = vmax.f32 %v684_v7, %v1358_v10  ;;  %v685_v28 = vmax.f32 %v523_v11, 0.0  ;;  %v1359_v30 = vmax.f32 %v1197_v12, 0.0 }
 0x11b   :  { %v5043_v31 = vmax.f32 %v682_v18, %v1356_v22  ;;  %v683_v33 = vmax.f32 %v515_v23, 0.0  ;;  %v1357_v34 = vmax.f32 %v1189_v26, 0.0 }
 0x11c   :  { %v5045_v37 = vmax.f32 %v685_v28, %v1359_v30 }
 0x11d   :  { %v5047_v38 = vmax.f32 %v683_v33, %v1357_v34  ;;  %v4010_v39 = vpop.f32.mrb[32].mxu0  ;;  %v4078_v40 = vpop.f32.mrb[32].mxu1 }
 0x11e   :  { %v536_v41 = vadd.f32 %v4010_v39, %v4845_v52  ;;  %v1210_v43 = vadd.f32 %v4078_v40, %v4845_v52  ;;  %v527_v44 = vpop.f32.mrb[33].mxu0  ;;  %v1201_v47 = vpop.f32.mrb[33].mxu1 }
 0x11f   :  { %v528_v49 = vadd.f32 %v4845_v52, %v527_v44  ;;  %v1202_v56 = vadd.f32 %v4845_v52, %v1201_v47  ;;  %v4011_v57 = vpop.f32.mrb[34].mxu0  ;;  %v4079_v59 = vpop.f32.mrb[34].mxu1 }
 0x120   :  { %v688_v60 = vmax.f32 %v536_v41, 0.0  ;;  %v1362_v63 = vmax.f32 %v1210_v43, 0.0  ;;  %v539_v0 = vadd.f32 %v4011_v57, %v4845_v52  ;;  %v1213_v1 = vadd.f32 %v4079_v59, %v4845_v52  ;;  %v530_v3 = vpop.f32.mrb[35].mxu0  ;;  %v1204_v4 = vpop.f32.mrb[35].mxu1 }
 0x121   :  { %v686_v6 = vmax.f32 %v528_v49, 0.0  ;;  %v1360_v7 = vmax.f32 %v1202_v56, 0.0  ;;  %v531_v10 = vadd.f32 %v4845_v52, %v530_v3  ;;  %v1205_v11 = vadd.f32 %v4845_v52, %v1204_v4 }
 0x122   :  { %v5057_v12 = vmax.f32 %v688_v60, %v1362_v63  ;;  %v689_v14 = vmax.f32 %v539_v0, 0.0  ;;  %v1363_v17 = vmax.f32 %v1213_v1, 0.0 }
 0x123   :  { %v5059_v18 = vmax.f32 %v686_v6, %v1360_v7  ;;  %v687_v22 = vmax.f32 %v531_v10, 0.0  ;;  %v1361_v23 = vmax.f32 %v1205_v11, 0.0 }
 0x124   :  { %v5061_v26 = vmax.f32 %v689_v14, %v1363_v17 }
 0x125   :  { %v5063_v28 = vmax.f32 %v687_v22, %v1361_v23  ;;  %v4014_v30 = vpop.f32.mrb[36].mxu0  ;;  %v4082_v33 = vpop.f32.mrb[36].mxu1 }
 0x126   :  { %v552_v34 = vadd.f32 %v4014_v30, %v4845_v52  ;;  %v1226_v39 = vadd.f32 %v4082_v33, %v4845_v52  ;;  %v543_v40 = vpop.f32.mrb[37].mxu0  ;;  %v1217_v41 = vpop.f32.mrb[37].mxu1 }
 0x127   :  { %v544_v43 = vadd.f32 %v4845_v52, %v543_v40  ;;  %v1218_v44 = vadd.f32 %v4845_v52, %v1217_v41  ;;  %v4015_v47 = vpop.f32.mrb[38].mxu0  ;;  %v4083_v49 = vpop.f32.mrb[38].mxu1 }
 0x128   :  { %v692_v56 = vmax.f32 %v552_v34, 0.0  ;;  %v1366_v57 = vmax.f32 %v1226_v39, 0.0  ;;  %v555_v59 = vadd.f32 %v4015_v47, %v4845_v52  ;;  %v1229_v60 = vadd.f32 %v4083_v49, %v4845_v52  ;;  %v546_v63 = vpop.f32.mrb[39].mxu0  ;;  %v1220_v0 = vpop.f32.mrb[39].mxu1 }
 0x129   :  { %v690_v1 = vmax.f32 %v544_v43, 0.0  ;;  %v1364_v3 = vmax.f32 %v1218_v44, 0.0  ;;  %v547_v4 = vadd.f32 %v4845_v52, %v546_v63  ;;  %v1221_v6 = vadd.f32 %v4845_v52, %v1220_v0 }
 0x12a   :  { %v5073_v7 = vmax.f32 %v692_v56, %v1366_v57  ;;  %v693_v10 = vmax.f32 %v555_v59, 0.0  ;;  %v1367_v11 = vmax.f32 %v1229_v60, 0.0 }
 0x12b   :  { %v5075_v14 = vmax.f32 %v690_v1, %v1364_v3  ;;  %v691_v17 = vmax.f32 %v547_v4, 0.0  ;;  %v1365_v22 = vmax.f32 %v1221_v6, 0.0 }
 0x12c   :  { %v5077_v23 = vmax.f32 %v693_v10, %v1367_v11 }
 0x12d   :  { %v5079_v30 = vmax.f32 %v691_v17, %v1365_v22  ;;  %v4018_v33 = vpop.f32.mrb[40].mxu0  ;;  %v4086_v34 = vpop.f32.mrb[40].mxu1 }
 0x12e   :  { %v568_v39 = vadd.f32 %v4018_v33, %v4845_v52  ;;  %v1242_v40 = vadd.f32 %v4086_v34, %v4845_v52  ;;  %v559_v41 = vpop.f32.mrb[41].mxu0  ;;  %v1233_v43 = vpop.f32.mrb[41].mxu1 }
 0x12f   :  { %v560_v44 = vadd.f32 %v4845_v52, %v559_v41  ;;  %v1234_v47 = vadd.f32 %v4845_v52, %v1233_v43  ;;  %v4019_v49 = vpop.f32.mrb[42].mxu0  ;;  %v4087_v56 = vpop.f32.mrb[42].mxu1 }
 0x130   :  { %v696_v57 = vmax.f32 %v568_v39, 0.0  ;;  %v1370_v59 = vmax.f32 %v1242_v40, 0.0  ;;  %v571_v60 = vadd.f32 %v4019_v49, %v4845_v52  ;;  %v1245_v63 = vadd.f32 %v4087_v56, %v4845_v52  ;;  %v562_v0 = vpop.f32.mrb[43].mxu0  ;;  %v1236_v1 = vpop.f32.mrb[43].mxu1 }
 0x131   :  { %v694_v3 = vmax.f32 %v560_v44, 0.0  ;;  %v1368_v4 = vmax.f32 %v1234_v47, 0.0  ;;  %v563_v6 = vadd.f32 %v4845_v52, %v562_v0  ;;  %v1237_v10 = vadd.f32 %v4845_v52, %v1236_v1 }
 0x132   :  { %v5089_v11 = vmax.f32 %v696_v57, %v1370_v59  ;;  %v697_v17 = vmax.f32 %v571_v60, 0.0  ;;  %v1371_v22 = vmax.f32 %v1245_v63, 0.0 }
 0x133   :  { %v5091_v33 = vmax.f32 %v694_v3, %v1368_v4  ;;  %v695_v34 = vmax.f32 %v563_v6, 0.0  ;;  %v1369_v39 = vmax.f32 %v1237_v10, 0.0 }
 0x134   :  { %5639 = vst [vmem:[#allocation2_spill] sm:$0xff] %v5089_v11  ;;  %v5093_v40 = vmax.f32 %v697_v17, %v1371_v22 }
 0x135   :  { %5640 = vst [vmem:[#allocation3_spill] sm:$0xff] %v5091_v33  ;;  %v5095_v41 = vmax.f32 %v695_v34, %v1369_v39  ;;  %v4022_v43 = vpop.f32.mrb[44].mxu0  ;;  %v4090_v49 = vpop.f32.mrb[44].mxu1 }
 0x136   :  { %5641 = vst [vmem:[#allocation4_spill] sm:$0xff] %v5093_v40  ;;  %v584_v44 = vadd.f32 %v4022_v43, %v4845_v52  ;;  %v1258_v47 = vadd.f32 %v4090_v49, %v4845_v52  ;;  %v575_v56 = vpop.f32.mrb[45].mxu0  ;;  %v1249_v0 = vpop.f32.mrb[45].mxu1 }
 0x137   :  { %5642 = vst [vmem:[#allocation5_spill] sm:$0xff] %v5095_v41  ;;  %v576_v57 = vadd.f32 %v4845_v52, %v575_v56  ;;  %v1250_v59 = vadd.f32 %v4845_v52, %v1249_v0  ;;  %v4023_v60 = vpop.f32.mrb[46].mxu0  ;;  %v4091_v63 = vpop.f32.mrb[46].mxu1 }
 0x138   :  { %v700_v1 = vmax.f32 %v584_v44, 0.0  ;;  %v1374_v3 = vmax.f32 %v1258_v47, 0.0  ;;  %v587_v4 = vadd.f32 %v4023_v60, %v4845_v52  ;;  %v1261_v6 = vadd.f32 %v4091_v63, %v4845_v52  ;;  %v578_v10 = vpop.f32.mrb[47].mxu0  ;;  %v1252_v17 = vpop.f32.mrb[47].mxu1 }
 0x139   :  { %v698_v22 = vmax.f32 %v576_v57, 0.0  ;;  %v1372_v34 = vmax.f32 %v1250_v59, 0.0  ;;  %v579_v39 = vadd.f32 %v4845_v52, %v578_v10  ;;  %v1253_v43 = vadd.f32 %v4845_v52, %v1252_v17 }
 0x13a   :  { %v5105_v49 = vmax.f32 %v700_v1, %v1374_v3  ;;  %v701_v56 = vmax.f32 %v587_v4, 0.0  ;;  %v1375_v0 = vmax.f32 %v1261_v6, 0.0 }
 0x13b   :  { %v5107_v41 = vmax.f32 %v698_v22, %v1372_v34  ;;  %v699_v44 = vmax.f32 %v579_v39, 0.0  ;;  %v1373_v47 = vmax.f32 %v1253_v43, 0.0 }
 0x13c   :  { %5643 = vst [vmem:[#allocation6_spill] sm:$0xff] %v5105_v49  ;;  %v5109_v40 = vmax.f32 %v701_v56, %v1375_v0 }
 0x13d   :  { %5644 = vst [vmem:[#allocation7_spill] sm:$0xff] %v5107_v41  ;;  %v5111_v60 = vmax.f32 %v699_v44, %v1373_v47  ;;  %v4026_v63 = vpop.f32.mrb[48].mxu0  ;;  %v4094_v33 = vpop.f32.mrb[48].mxu1 }
 0x13e   :  { %5645 = vst [vmem:[#allocation8_spill] sm:$0xff] %v5109_v40  ;;  %v600_v57 = vadd.f32 %v4026_v63, %v4845_v52  ;;  %v1274_v59 = vadd.f32 %v4094_v33, %v4845_v52  ;;  %v591_v10 = vpop.f32.mrb[49].mxu0  ;;  %v1265_v17 = vpop.f32.mrb[49].mxu1 }
 0x13f   :  { %5646 = vst [vmem:[#allocation9_spill] sm:$0xff] %v5111_v60  ;;  %v592_v1 = vadd.f32 %v4845_v52, %v591_v10  ;;  %v1266_v3 = vadd.f32 %v4845_v52, %v1265_v17  ;;  %v4027_v4 = vpop.f32.mrb[50].mxu0  ;;  %v4095_v6 = vpop.f32.mrb[50].mxu1 }
 0x140   :  { %v704_v22 = vmax.f32 %v600_v57, 0.0  ;;  %v1378_v34 = vmax.f32 %v1274_v59, 0.0  ;;  %v603_v39 = vadd.f32 %v4027_v4, %v4845_v52  ;;  %v1277_v43 = vadd.f32 %v4095_v6, %v4845_v52  ;;  %v594_v56 = vpop.f32.mrb[51].mxu0  ;;  %v1268_v0 = vpop.f32.mrb[51].mxu1 }
 0x141   :  { %v702_v44 = vmax.f32 %v592_v1, 0.0  ;;  %v1376_v47 = vmax.f32 %v1266_v3, 0.0  ;;  %v595_v33 = vadd.f32 %v4845_v52, %v594_v56  ;;  %v1269_v63 = vadd.f32 %v4845_v52, %v1268_v0 }
 0x142   :  { %v5121_v60 = vmax.f32 %v704_v22, %v1378_v34  ;;  %v705_v10 = vmax.f32 %v603_v39, 0.0  ;;  %v1379_v17 = vmax.f32 %v1277_v43, 0.0 }
 0x143   :  { %v5123_v40 = vmax.f32 %v702_v44, %v1376_v47  ;;  %v703_v57 = vmax.f32 %v595_v33, 0.0  ;;  %v1377_v59 = vmax.f32 %v1269_v63, 0.0 }
 0x144   :  { %5647 = vst [vmem:[#allocation10_spill] sm:$0xff] %v5121_v60  ;;  %v5125_v41 = vmax.f32 %v705_v10, %v1379_v17 }
 0x145   :  { %5648 = vst [vmem:[#allocation11_spill] sm:$0xff] %v5123_v40  ;;  %v5127_v4 = vmax.f32 %v703_v57, %v1377_v59  ;;  %v4030_v6 = vpop.f32.mrb[52].mxu0  ;;  %v4098_v49 = vpop.f32.mrb[52].mxu1 }
 0x146   :  { %5649 = vst [vmem:[#allocation12_spill] sm:$0xff] %v5125_v41  ;;  %v616_v1 = vadd.f32 %v4030_v6, %v4845_v52  ;;  %v1290_v3 = vadd.f32 %v4098_v49, %v4845_v52  ;;  %v607_v56 = vpop.f32.mrb[53].mxu0  ;;  %v1281_v0 = vpop.f32.mrb[53].mxu1 }
 0x147   :  { %5650 = vst [vmem:[#allocation13_spill] sm:$0xff] %v5127_v4  ;;  %v608_v22 = vadd.f32 %v4845_v52, %v607_v56  ;;  %v1282_v34 = vadd.f32 %v4845_v52, %v1281_v0  ;;  %v4031_v39 = vpop.f32.mrb[54].mxu0  ;;  %v4099_v43 = vpop.f32.mrb[54].mxu1 }
 0x148   :  { %v708_v44 = vmax.f32 %v616_v1, 0.0  ;;  %v1382_v47 = vmax.f32 %v1290_v3, 0.0  ;;  %v619_v33 = vadd.f32 %v4031_v39, %v4845_v52  ;;  %v1293_v63 = vadd.f32 %v4099_v43, %v4845_v52  ;;  %v610_v10 = vpop.f32.mrb[55].mxu0  ;;  %v1284_v17 = vpop.f32.mrb[55].mxu1 }
 0x149   :  { %v706_v57 = vmax.f32 %v608_v22, 0.0  ;;  %v1380_v59 = vmax.f32 %v1282_v34, 0.0  ;;  %v611_v49 = vadd.f32 %v4845_v52, %v610_v10  ;;  %v1285_v6 = vadd.f32 %v4845_v52, %v1284_v17 }
 0x14a   :  { %v5137_v4 = vmax.f32 %v708_v44, %v1382_v47  ;;  %v709_v56 = vmax.f32 %v619_v33, 0.0  ;;  %v1383_v0 = vmax.f32 %v1293_v63, 0.0 }
 0x14b   :  { %v5139_v41 = vmax.f32 %v706_v57, %v1380_v59  ;;  %v707_v1 = vmax.f32 %v611_v49, 0.0  ;;  %v1381_v3 = vmax.f32 %v1285_v6, 0.0 }
 0x14c   :  { %5651 = vst [vmem:[#allocation14_spill] sm:$0xff] %v5137_v4  ;;  %v5141_v40 = vmax.f32 %v709_v56, %v1383_v0 }
 0x14d   :  { %5652 = vst [vmem:[#allocation15_spill] sm:$0xff] %v5139_v41  ;;  %v5143_v39 = vmax.f32 %v707_v1, %v1381_v3  ;;  %v4034_v43 = vpop.f32.mrb[56].mxu0  ;;  %v4102_v60 = vpop.f32.mrb[56].mxu1 }
 0x14e   :  { %5653 = vst [vmem:[#allocation16_spill] sm:$0xff] %v5141_v40  ;;  %v632_v22 = vadd.f32 %v4034_v43, %v4845_v52  ;;  %v1306_v34 = vadd.f32 %v4102_v60, %v4845_v52  ;;  %v623_v10 = vpop.f32.mrb[57].mxu0  ;;  %v1297_v17 = vpop.f32.mrb[57].mxu1 }
 0x14f   :  { %5654 = vst [vmem:[#allocation17_spill] sm:$0xff] %v5143_v39  ;;  %v624_v44 = vadd.f32 %v4845_v52, %v623_v10  ;;  %v1298_v47 = vadd.f32 %v4845_v52, %v1297_v17  ;;  %v4035_v33 = vpop.f32.mrb[58].mxu0  ;;  %v4103_v63 = vpop.f32.mrb[58].mxu1 }
 0x150   :  { %v712_v57 = vmax.f32 %v632_v22, 0.0  ;;  %v1386_v59 = vmax.f32 %v1306_v34, 0.0  ;;  %v635_v49 = vadd.f32 %v4035_v33, %v4845_v52  ;;  %v1309_v6 = vadd.f32 %v4103_v63, %v4845_v52  ;;  %v626_v56 = vpop.f32.mrb[59].mxu0  ;;  %v1300_v0 = vpop.f32.mrb[59].mxu1 }
 0x151   :  { %v710_v1 = vmax.f32 %v624_v44, 0.0  ;;  %v1384_v3 = vmax.f32 %v1298_v47, 0.0  ;;  %v627_v60 = vadd.f32 %v4845_v52, %v626_v56  ;;  %v1301_v43 = vadd.f32 %v4845_v52, %v1300_v0 }
 0x152   :  { %v5153_v39 = vmax.f32 %v712_v57, %v1386_v59  ;;  %v713_v10 = vmax.f32 %v635_v49, 0.0  ;;  %v1387_v17 = vmax.f32 %v1309_v6, 0.0 }
 0x153   :  { %v5155_v40 = vmax.f32 %v710_v1, %v1384_v3  ;;  %v711_v22 = vmax.f32 %v627_v60, 0.0  ;;  %v1385_v34 = vmax.f32 %v1301_v43, 0.0 }
 0x154   :  { %5655 = vst [vmem:[#allocation18_spill] sm:$0xff] %v5153_v39  ;;  %v5157_v41 = vmax.f32 %v713_v10, %v1387_v17 }
 0x155   :  { %5656 = vst [vmem:[#allocation19_spill] sm:$0xff] %v5155_v40  ;;  %v5159_v33 = vmax.f32 %v711_v22, %v1385_v34  ;;  %v4038_v63 = vpop.f32.mrb[60].mxu0  ;;  %v4106_v4 = vpop.f32.mrb[60].mxu1 }
 0x156   :  { %5657 = vst [vmem:[#allocation20_spill] sm:$0xff] %v5157_v41  ;;  %v648_v44 = vadd.f32 %v4038_v63, %v4845_v52  ;;  %v1322_v47 = vadd.f32 %v4106_v4, %v4845_v52  ;;  %v639_v56 = vpop.f32.mrb[61].mxu0  ;;  %v1313_v0 = vpop.f32.mrb[61].mxu1 }
 0x157   :  { %5658 = vst [vmem:[#allocation21_spill] sm:$0xff] %v5159_v33  ;;  %v640_v57 = vadd.f32 %v4845_v52, %v639_v56  ;;  %v1314_v59 = vadd.f32 %v4845_v52, %v1313_v0  ;;  %v4039_v49 = vpop.f32.mrb[62].mxu0  ;;  %v4107_v6 = vpop.f32.mrb[62].mxu1 }
 0x158   :  { %v716_v1 = vmax.f32 %v648_v44, 0.0  ;;  %v1390_v3 = vmax.f32 %v1322_v47, 0.0  ;;  %v651_v60 = vadd.f32 %v4039_v49, %v4845_v52  ;;  %v1325_v43 = vadd.f32 %v4107_v6, %v4845_v52  ;;  %v642_v10 = vpop.f32.mrb[63].mxu0  ;;  %v1316_v17 = vpop.f32.mrb[63].mxu1 }
 0x159   :  { %v714_v22 = vmax.f32 %v640_v57, 0.0  ;;  %v1388_v34 = vmax.f32 %v1314_v59, 0.0  ;;  %v643_v4 = vadd.f32 %v4845_v52, %v642_v10  ;;  %v1317_v63 = vadd.f32 %v4845_v52, %v1316_v17 }
 0x15a   :  { %v5169_v33 = vmax.f32 %v716_v1, %v1390_v3  ;;  %v717_v56 = vmax.f32 %v651_v60, 0.0  ;;  %v1391_v0 = vmax.f32 %v1325_v43, 0.0 }
 0x15b   :  { %v5171_v41 = vmax.f32 %v714_v22, %v1388_v34  ;;  %v715_v44 = vmax.f32 %v643_v4, 0.0  ;;  %v1389_v47 = vmax.f32 %v1317_v63, 0.0 }
 0x15c   :  { %5659 = vst [vmem:[#allocation22_spill] sm:$0xff] %v5169_v33  ;;  %v5173_v40 = vmax.f32 %v717_v56, %v1391_v0 }
 0x15d   :  { %5660 = vst [vmem:[#allocation23_spill] sm:$0xff] %v5171_v41  ;;  %v5175_v49 = vmax.f32 %v715_v44, %v1389_v47  ;;  %v4114_v6 = vpop.f32.mrb[64].mxu0  ;;  %v4182_v39 = vpop.f32.mrb[64].mxu1 }
 0x15e   :  { %5661 = vst [vmem:[#allocation24_spill] sm:$0xff] %v5173_v40  ;;  %v1820_v57 = vadd.f32 %v4114_v6, %v4845_v52  ;;  %v2558_v59 = vadd.f32 %v4182_v39, %v4845_v52  ;;  %v1811_v10 = vpop.f32.mrb[65].mxu0  ;;  %v2549_v17 = vpop.f32.mrb[65].mxu1 }
 0x15f   :  { %5662 = vst [vmem:[#allocation25_spill] sm:$0xff] %v5175_v49  ;;  %v1812_v1 = vadd.f32 %v4845_v52, %v1811_v10  ;;  %v2550_v3 = vadd.f32 %v4845_v52, %v2549_v17  ;;  %v4115_v60 = vpop.f32.mrb[66].mxu0  ;;  %v4183_v43 = vpop.f32.mrb[66].mxu1 }
 0x160   :  { %v2068_v22 = vmax.f32 %v1820_v57, 0.0  ;;  %v2806_v34 = vmax.f32 %v2558_v59, 0.0  ;;  %v1823_v4 = vadd.f32 %v4115_v60, %v4845_v52  ;;  %v2561_v63 = vadd.f32 %v4183_v43, %v4845_v52  ;;  %v1814_v56 = vpop.f32.mrb[67].mxu0  ;;  %v2552_v0 = vpop.f32.mrb[67].mxu1 }
 0x161   :  { %v2066_v44 = vmax.f32 %v1812_v1, 0.0  ;;  %v2804_v47 = vmax.f32 %v2550_v3, 0.0  ;;  %v1815_v39 = vadd.f32 %v4845_v52, %v1814_v56  ;;  %v2553_v6 = vadd.f32 %v4845_v52, %v2552_v0  ;;  %v5192_v52 = vld [vmem:[%s5637_s2] ss:$0 sm:$0xff] }
 0x162   :  { %v2132_v10 = vmax.f32 %v4869_v13, %v2068_v22  ;;  %v2069_v49 = vmax.f32 %v1823_v4, 0.0  ;;  %v2807_v60 = vmax.f32 %v2561_v63, 0.0 }
 0x163   :  { %v2130_v17 = vmax.f32 %v4873_v16, %v2066_v44  ;;  %v2067_v40 = vmax.f32 %v1815_v39, 0.0  ;;  %v2805_v1 = vmax.f32 %v2553_v6, 0.0 }
 0x164   :  { %v2870_v57 = vmax.f32 %v2132_v10, %v2806_v34  ;;  %v2133_v59 = vmax.f32 %v4877_v19, %v2069_v49 }
 0x165   :  { %v2868_v43 = vmax.f32 %v2130_v17, %v2804_v47  ;;  %v2131_v41 = vmax.f32 %v4879_v20, %v2067_v40  ;;  %v4118_v3 = vpop.f32.mrb[68].mxu0  ;;  %v4186_v33 = vpop.f32.mrb[68].mxu1 }
 0x166   :  { %v3774_v56 = vpack.c.bf16 %v2870_v57, %v2870_v57  ;;  %v2871_v11 = vmax.f32 %v2133_v59, %v2807_v60  ;;  %v1836_v13 = vadd.f32 %v5192_v52, %v4118_v3  ;;  %v2574_v16 = vadd.f32 %v5192_v52, %v4186_v33  ;;  %v1827_v19 = vpop.f32.mrb[69].mxu0  ;;  %v2565_v49 = vpop.f32.mrb[69].mxu1 }
 0x167   :  { %v3772_v22 = vpack.c.bf16 %v2868_v43, %v2868_v43  ;;  %v2869_v34 = vmax.f32 %v2131_v41, %v2805_v1  ;;  %v1828_v20 = vadd.f32 %v5192_v52, %v1827_v19  ;;  %v2566_v40 = vadd.f32 %v5192_v52, %v2565_v49  ;;  %v4119_v4 = vpop.f32.mrb[70].mxu0  ;;  %v4187_v63 = vpop.f32.mrb[70].mxu1 }
 0x168   :  { %3191 = vst.msk [vmem:[%s5638_s3 + $0x8] sm:$0xf] %vm3188_vm3, %v3774_v56  ;;  %v3775_v0 = vpack.c.bf16 %v2871_v11, %v2871_v11  ;;  %v2072_v44 = vmax.f32 %v1836_v13, 0.0  ;;  %v2810_v47 = vmax.f32 %v2574_v16, 0.0  ;;  %v1839_v33 = vadd.f32 %v5192_v52, %v4119_v4  ;;  %v1830_v39 = vpop.f32.mrb[71].mxu0  ;;  %v2568_v6 = vpop.f32.mrb[71].mxu1 }
 0x169   :  { %3189 = vst.msk [vmem:[%s5638_s3] sm:$0xf] %vm3188_vm3, %v3772_v22  ;;  %v3773_v41 = vpack.c.bf16 %v2869_v34, %v2869_v34  ;;  %v2070_v10 = vmax.f32 %v1828_v20, 0.0  ;;  %v2808_v17 = vmax.f32 %v2566_v40, 0.0  ;;  %v2577_v57 = vadd.f32 %v5192_v52, %v4187_v63 }
 0x16a   :  { %3192 = vst.msk [vmem:[%s5638_s3 + $0xc] sm:$0xf] %vm3188_vm3, %v3775_v0  ;;  %v2136_v11 = vmax.f32 %v4901_v45, %v2072_v44  ;;  %v2073_v59 = vmax.f32 %v1839_v33, 0.0  ;;  %v1831_v60 = vadd.f32 %v5192_v52, %v1830_v39  ;;  %v2569_v43 = vadd.f32 %v5192_v52, %v2568_v6 }
 0x16b   :  { %3190 = vst.msk [vmem:[%s5638_s3 + $0x4] sm:$0xf] %vm3188_vm3, %v3773_v41  ;;  %v2134_v1 = vmax.f32 %v4905_v48, %v2070_v10  ;;  %v2811_v13 = vmax.f32 %v2577_v57, 0.0 }
 0x16c   :  { %v2874_v3 = vmax.f32 %v2136_v11, %v2810_v47  ;;  %v2137_v56 = vmax.f32 %v4909_v51, %v2073_v59  ;;  %v2071_v16 = vmax.f32 %v1831_v60, 0.0  ;;  %v2809_v49 = vmax.f32 %v2569_v43, 0.0 }
 0x16d   :  { %v2872_v19 = vmax.f32 %v2134_v1, %v2808_v17  ;;  %v4122_v45 = vpop.f32.mrb[72].mxu0  ;;  %v4190_v22 = vpop.f32.mrb[72].mxu1 }
 0x16e   :  { %v3778_v34 = vpack.c.bf16 %v2874_v3, %v2874_v3  ;;  %v2875_v20 = vmax.f32 %v2137_v56, %v2811_v13  ;;  %v2135_v40 = vmax.f32 %v4911_v53, %v2071_v16  ;;  %v1852_v4 = vadd.f32 %v5192_v52, %v4122_v45  ;;  %v1843_v63 = vpop.f32.mrb[73].mxu0  ;;  %v2581_v0 = vpop.f32.mrb[73].mxu1 }
 0x16f   :  { %v3776_v44 = vpack.c.bf16 %v2872_v19, %v2872_v19  ;;  %v2590_v48 = vadd.f32 %v5192_v52, %v4190_v22  ;;  %v1844_v47 = vadd.f32 %v5192_v52, %v1843_v63  ;;  %v2582_v51 = vadd.f32 %v5192_v52, %v2581_v0  ;;  %v4123_v33 = vpop.f32.mrb[74].mxu0  ;;  %v4191_v39 = vpop.f32.mrb[74].mxu1 }
 0x170   :  { %3195 = vst.msk [vmem:[%s5638_s3 + $0x18] sm:$0xf] %vm3188_vm3, %v3778_v34  ;;  %v3779_v6 = vpack.c.bf16 %v2875_v20, %v2875_v20  ;;  %v2873_v53 = vmax.f32 %v2135_v40, %v2809_v49  ;;  %v2076_v41 = vmax.f32 %v1852_v4, 0.0  ;;  %v1855_v10 = vadd.f32 %v5192_v52, %v4123_v33  ;;  %v1846_v17 = vpop.f32.mrb[75].mxu0  ;;  %v2584_v57 = vpop.f32.mrb[75].mxu1 }
 0x171   :  { %3193 = vst.msk [vmem:[%s5638_s3 + $0x10] sm:$0xf] %vm3188_vm3, %v3776_v44  ;;  %v2814_v11 = vmax.f32 %v2590_v48, 0.0  ;;  %v2074_v59 = vmax.f32 %v1844_v47, 0.0  ;;  %v2812_v60 = vmax.f32 %v2582_v51, 0.0  ;;  %v2593_v43 = vadd.f32 %v5192_v52, %v4191_v39 }
 0x172   :  { %3196 = vst.msk [vmem:[%s5638_s3 + $0x1c] sm:$0xf] %vm3188_vm3, %v3779_v6  ;;  %v3777_v1 = vpack.c.bf16 %v2873_v53, %v2873_v53  ;;  %v2140_v3 = vmax.f32 %v4933_v15, %v2076_v41  ;;  %v2077_v56 = vmax.f32 %v1855_v10, 0.0  ;;  %v1847_v13 = vadd.f32 %v5192_v52, %v1846_v17 }
 0x173   :  { %v2138_v16 = vmax.f32 %v4937_v21, %v2074_v59  ;;  %v2585_v19 = vadd.f32 %v5192_v52, %v2584_v57  ;;  %v2815_v22 = vmax.f32 %v2593_v43, 0.0 }
 0x174   :  { %3194 = vst.msk [vmem:[%s5638_s3 + $0x14] sm:$0xf] %vm3188_vm3, %v3777_v1  ;;  %v2878_v49 = vmax.f32 %v2140_v3, %v2814_v11  ;;  %v2141_v45 = vmax.f32 %v4941_v24, %v2077_v56  ;;  %v2075_v34 = vmax.f32 %v1847_v13, 0.0 }
 0x175   :  { %v2876_v20 = vmax.f32 %v2138_v16, %v2812_v60  ;;  %v2813_v40 = vmax.f32 %v2585_v19, 0.0  ;;  %v4126_v15 = vpop.f32.mrb[76].mxu0  ;;  %v4194_v4 = vpop.f32.mrb[76].mxu1 }
 0x176   :  { %v3782_v63 = vpack.c.bf16 %v2878_v49, %v2878_v49  ;;  %v2879_v0 = vmax.f32 %v2141_v45, %v2815_v22  ;;  %v2139_v21 = vmax.f32 %v4943_v25, %v2075_v34  ;;  %v1868_v44 = vadd.f32 %v5192_v52, %v4126_v15  ;;  %v1859_v48 = vpop.f32.mrb[77].mxu0  ;;  %v2597_v47 = vpop.f32.mrb[77].mxu1 }
 0x177   :  { %v3780_v51 = vpack.c.bf16 %v2876_v20, %v2876_v20  ;;  %v2606_v33 = vadd.f32 %v5192_v52, %v4194_v4  ;;  %v1860_v39 = vadd.f32 %v5192_v52, %v1859_v48  ;;  %v2598_v24 = vadd.f32 %v5192_v52, %v2597_v47  ;;  %v4127_v6 = vpop.f32.mrb[78].mxu0  ;;  %v4195_v53 = vpop.f32.mrb[78].mxu1 }
 0x178   :  { %3199 = vst.msk [vmem:[%s5638_s3 + $0x28] sm:$0xf] %vm3188_vm3, %v3782_v63  ;;  %v3783_v41 = vpack.c.bf16 %v2879_v0, %v2879_v0  ;;  %v2877_v25 = vmax.f32 %v2139_v21, %v2813_v40  ;;  %v2080_v10 = vmax.f32 %v1868_v44, 0.0  ;;  %v1871_v17 = vadd.f32 %v5192_v52, %v4127_v6  ;;  %v1862_v57 = vpop.f32.mrb[79].mxu0  ;;  %v2600_v11 = vpop.f32.mrb[79].mxu1 }
 0x179   :  { %3197 = vst.msk [vmem:[%s5638_s3 + $0x20] sm:$0xf] %vm3188_vm3, %v3780_v51  ;;  %v2818_v59 = vmax.f32 %v2606_v33, 0.0  ;;  %v2078_v60 = vmax.f32 %v1860_v39, 0.0  ;;  %v2816_v43 = vmax.f32 %v2598_v24, 0.0  ;;  %v2609_v1 = vadd.f32 %v5192_v52, %v4195_v53 }
 0x17a   :  { %3200 = vst.msk [vmem:[%s5638_s3 + $0x2c] sm:$0xf] %vm3188_vm3, %v3783_v41  ;;  %v3781_v3 = vpack.c.bf16 %v2877_v25, %v2877_v25  ;;  %v2144_v56 = vmax.f32 %v4965_v55, %v2080_v10  ;;  %v2081_v13 = vmax.f32 %v1871_v17, 0.0  ;;  %v1863_v16 = vadd.f32 %v5192_v52, %v1862_v57 }
 0x17b   :  { %v2142_v19 = vmax.f32 %v4969_v58, %v2078_v60  ;;  %v2601_v49 = vadd.f32 %v5192_v52, %v2600_v11  ;;  %v2819_v34 = vmax.f32 %v2609_v1, 0.0 }
 0x17c   :  { %3198 = vst.msk [vmem:[%s5638_s3 + $0x24] sm:$0xf] %vm3188_vm3, %v3781_v3  ;;  %v2882_v45 = vmax.f32 %v2144_v56, %v2818_v59  ;;  %v2145_v22 = vmax.f32 %v4973_v61, %v2081_v13  ;;  %v2079_v20 = vmax.f32 %v1863_v16, 0.0 }
 0x17d   :  { %v2880_v40 = vmax.f32 %v2142_v19, %v2816_v43  ;;  %v2817_v15 = vmax.f32 %v2601_v49, 0.0  ;;  %v4130_v55 = vpop.f32.mrb[80].mxu0  ;;  %v4198_v4 = vpop.f32.mrb[80].mxu1 }
 0x17e   :  { %v3786_v63 = vpack.c.bf16 %v2882_v45, %v2882_v45  ;;  %v2883_v0 = vmax.f32 %v2145_v22, %v2819_v34  ;;  %v2143_v58 = vmax.f32 %v4975_v62, %v2079_v20  ;;  %v1884_v21 = vadd.f32 %v5192_v52, %v4130_v55  ;;  %v1875_v44 = vpop.f32.mrb[81].mxu0  ;;  %v2613_v48 = vpop.f32.mrb[81].mxu1 }
 0x17f   :  { %v3784_v47 = vpack.c.bf16 %v2880_v40, %v2880_v40  ;;  %v2622_v51 = vadd.f32 %v5192_v52, %v4198_v4  ;;  %v1876_v33 = vadd.f32 %v5192_v52, %v1875_v44  ;;  %v2614_v61 = vadd.f32 %v5192_v52, %v2613_v48  ;;  %v4131_v39 = vpop.f32.mrb[82].mxu0  ;;  %v4199_v24 = vpop.f32.mrb[82].mxu1 }
 0x180   :  { %3203 = vst.msk [vmem:[%s5638_s3 + $0x38] sm:$0xf] %vm3188_vm3, %v3786_v63  ;;  %v3787_v6 = vpack.c.bf16 %v2883_v0, %v2883_v0  ;;  %v2881_v62 = vmax.f32 %v2143_v58, %v2817_v15  ;;  %v2084_v53 = vmax.f32 %v1884_v21, 0.0  ;;  %v1887_v41 = vadd.f32 %v5192_v52, %v4131_v39  ;;  %v1878_v25 = vpop.f32.mrb[83].mxu0  ;;  %v2616_v10 = vpop.f32.mrb[83].mxu1 }
 0x181   :  { %3201 = vst.msk [vmem:[%s5638_s3 + $0x30] sm:$0xf] %vm3188_vm3, %v3784_v47  ;;  %v2822_v17 = vmax.f32 %v2622_v51, 0.0  ;;  %v2082_v57 = vmax.f32 %v1876_v33, 0.0  ;;  %v2820_v11 = vmax.f32 %v2614_v61, 0.0  ;;  %v2625_v59 = vadd.f32 %v5192_v52, %v4199_v24 }
 0x182   :  { %3204 = vst.msk [vmem:[%s5638_s3 + $0x3c] sm:$0xf] %vm3188_vm3, %v3787_v6  ;;  %v3785_v60 = vpack.c.bf16 %v2881_v62, %v2881_v62  ;;  %v2148_v43 = vmax.f32 %v4991_v29, %v2084_v53  ;;  %v2085_v1 = vmax.f32 %v1887_v41, 0.0  ;;  %v1879_v3 = vadd.f32 %v5192_v52, %v1878_v25 }
 0x183   :  { %v2146_v56 = vmax.f32 %v4995_v32, %v2082_v57  ;;  %v2617_v13 = vadd.f32 %v5192_v52, %v2616_v10  ;;  %v2823_v49 = vmax.f32 %v2625_v59, 0.0 }
 0x184   :  { %3202 = vst.msk [vmem:[%s5638_s3 + $0x34] sm:$0xf] %vm3188_vm3, %v3785_v60  ;;  %v2886_v16 = vmax.f32 %v2148_v43, %v2822_v17  ;;  %v2149_v19 = vmax.f32 %v4997_v35, %v2085_v1  ;;  %v2083_v45 = vmax.f32 %v1879_v3, 0.0 }
 0x185   :  { %v2884_v22 = vmax.f32 %v2146_v56, %v2820_v11  ;;  %v2821_v34 = vmax.f32 %v2617_v13, 0.0  ;;  %v4134_v29 = vpop.f32.mrb[84].mxu0  ;;  %v4202_v20 = vpop.f32.mrb[84].mxu1 }
 0x186   :  { %v3790_v40 = vpack.c.bf16 %v2886_v16, %v2886_v16  ;;  %v2887_v15 = vmax.f32 %v2149_v19, %v2823_v49  ;;  %v2147_v32 = vmax.f32 %v4999_v36, %v2083_v45  ;;  %v1900_v55 = vadd.f32 %v5192_v52, %v4134_v29  ;;  %v1891_v4 = vpop.f32.mrb[85].mxu0  ;;  %v2629_v63 = vpop.f32.mrb[85].mxu1 }
 0x187   :  { %v3788_v0 = vpack.c.bf16 %v2884_v22, %v2884_v22  ;;  %v2638_v58 = vadd.f32 %v5192_v52, %v4202_v20  ;;  %v1892_v21 = vadd.f32 %v5192_v52, %v1891_v4  ;;  %v2630_v35 = vadd.f32 %v5192_v52, %v2629_v63  ;;  %v4135_v44 = vpop.f32.mrb[86].mxu0  ;;  %v4203_v48 = vpop.f32.mrb[86].mxu1 }
 0x188   :  { %3207 = vst.msk [vmem:[%s5638_s3 + $0x48] sm:$0xf] %vm3188_vm3, %v3790_v40  ;;  %v3791_v47 = vpack.c.bf16 %v2887_v15, %v2887_v15  ;;  %v2885_v36 = vmax.f32 %v2147_v32, %v2821_v34  ;;  %v2088_v51 = vmax.f32 %v1900_v55, 0.0  ;;  %v1903_v33 = vadd.f32 %v5192_v52, %v4135_v44  ;;  %v1894_v61 = vpop.f32.mrb[87].mxu0  ;;  %v2632_v39 = vpop.f32.mrb[87].mxu1 }
 0x189   :  { %3205 = vst.msk [vmem:[%s5638_s3 + $0x40] sm:$0xf] %vm3188_vm3, %v3788_v0  ;;  %v2826_v24 = vmax.f32 %v2638_v58, 0.0  ;;  %v2086_v6 = vmax.f32 %v1892_v21, 0.0  ;;  %v2824_v62 = vmax.f32 %v2630_v35, 0.0  ;;  %v2641_v53 = vadd.f32 %v5192_v52, %v4203_v48 }
 0x18a   :  { %3208 = vst.msk [vmem:[%s5638_s3 + $0x4c] sm:$0xf] %vm3188_vm3, %v3791_v47  ;;  %v3789_v41 = vpack.c.bf16 %v2885_v36, %v2885_v36  ;;  %v2152_v25 = vmax.f32 %v5009_v2, %v2088_v51  ;;  %v2089_v10 = vmax.f32 %v1903_v33, 0.0  ;;  %v1895_v17 = vadd.f32 %v5192_v52, %v1894_v61 }
 0x18b   :  { %v2150_v57 = vmax.f32 %v5011_v5, %v2086_v6  ;;  %v2633_v11 = vadd.f32 %v5192_v52, %v2632_v39  ;;  %v2827_v43 = vmax.f32 %v2641_v53, 0.0 }
 0x18c   :  { %3206 = vst.msk [vmem:[%s5638_s3 + $0x44] sm:$0xf] %vm3188_vm3, %v3789_v41  ;;  %v2890_v59 = vmax.f32 %v2152_v25, %v2826_v24  ;;  %v2153_v60 = vmax.f32 %v5013_v8, %v2089_v10  ;;  %v2087_v1 = vmax.f32 %v1895_v17, 0.0 }
 0x18d   :  { %v2888_v3 = vmax.f32 %v2150_v57, %v2824_v62  ;;  %v2825_v56 = vmax.f32 %v2633_v11, 0.0  ;;  %v4138_v2 = vpop.f32.mrb[88].mxu0  ;;  %v4206_v13 = vpop.f32.mrb[88].mxu1 }
 0x18e   :  { %v3794_v16 = vpack.c.bf16 %v2890_v59, %v2890_v59  ;;  %v2891_v19 = vmax.f32 %v2153_v60, %v2827_v43  ;;  %v2151_v5 = vmax.f32 %v5015_v9, %v2087_v1  ;;  %v1916_v49 = vadd.f32 %v5192_v52, %v4138_v2  ;;  %v1907_v45 = vpop.f32.mrb[89].mxu0  ;;  %v2645_v22 = vpop.f32.mrb[89].mxu1 }
 0x18f   :  { %v3792_v34 = vpack.c.bf16 %v2888_v3, %v2888_v3  ;;  %v2654_v29 = vadd.f32 %v5192_v52, %v4206_v13  ;;  %v1908_v20 = vadd.f32 %v5192_v52, %v1907_v45  ;;  %v2646_v8 = vadd.f32 %v5192_v52, %v2645_v22  ;;  %v4139_v40 = vpop.f32.mrb[90].mxu0  ;;  %v4207_v15 = vpop.f32.mrb[90].mxu1 }
 0x190   :  { %3211 = vst.msk [vmem:[%s5638_s3 + $0x58] sm:$0xf] %vm3188_vm3, %v3794_v16  ;;  %v3795_v32 = vpack.c.bf16 %v2891_v19, %v2891_v19  ;;  %v2889_v9 = vmax.f32 %v2151_v5, %v2825_v56  ;;  %v2092_v55 = vmax.f32 %v1916_v49, 0.0  ;;  %v1919_v4 = vadd.f32 %v5192_v52, %v4139_v40  ;;  %v1910_v63 = vpop.f32.mrb[91].mxu0  ;;  %v2648_v0 = vpop.f32.mrb[91].mxu1 }
 0x191   :  { %3209 = vst.msk [vmem:[%s5638_s3 + $0x50] sm:$0xf] %vm3188_vm3, %v3792_v34  ;;  %v2830_v58 = vmax.f32 %v2654_v29, 0.0  ;;  %v2090_v21 = vmax.f32 %v1908_v20, 0.0  ;;  %v2828_v35 = vmax.f32 %v2646_v8, 0.0  ;;  %v2657_v44 = vadd.f32 %v5192_v52, %v4207_v15 }
 0x192   :  { %3212 = vst.msk [vmem:[%s5638_s3 + $0x5c] sm:$0xf] %vm3188_vm3, %v3795_v32  ;;  %v3793_v48 = vpack.c.bf16 %v2889_v9, %v2889_v9  ;;  %v2156_v47 = vmax.f32 %v5025_v42, %v2092_v55  ;;  %v2093_v36 = vmax.f32 %v1919_v4, 0.0  ;;  %v1911_v51 = vadd.f32 %v5192_v52, %v1910_v63 }
 0x193   :  { %v2154_v33 = vmax.f32 %v5027_v46, %v2090_v21  ;;  %v2649_v61 = vadd.f32 %v5192_v52, %v2648_v0  ;;  %v2831_v6 = vmax.f32 %v2657_v44, 0.0 }
 0x194   :  { %3210 = vst.msk [vmem:[%s5638_s3 + $0x54] sm:$0xf] %vm3188_vm3, %v3793_v48  ;;  %v2894_v39 = vmax.f32 %v2156_v47, %v2830_v58  ;;  %v2157_v24 = vmax.f32 %v5029_v50, %v2093_v36  ;;  %v2091_v62 = vmax.f32 %v1911_v51, 0.0 }
 0x195   :  { %v2892_v53 = vmax.f32 %v2154_v33, %v2828_v35  ;;  %v2829_v41 = vmax.f32 %v2649_v61, 0.0  ;;  %v4142_v42 = vpop.f32.mrb[92].mxu0  ;;  %v4210_v25 = vpop.f32.mrb[92].mxu1 }
 0x196   :  { %v3798_v10 = vpack.c.bf16 %v2894_v39, %v2894_v39  ;;  %v2895_v17 = vmax.f32 %v2157_v24, %v2831_v6  ;;  %v2155_v46 = vmax.f32 %v5031_v54, %v2091_v62  ;;  %v1932_v57 = vadd.f32 %v5192_v52, %v4142_v42  ;;  %v1923_v11 = vpop.f32.mrb[93].mxu0  ;;  %v2661_v59 = vpop.f32.mrb[93].mxu1 }
 0x197   :  { %v3796_v60 = vpack.c.bf16 %v2892_v53, %v2892_v53  ;;  %v2670_v43 = vadd.f32 %v5192_v52, %v4210_v25  ;;  %v1924_v1 = vadd.f32 %v5192_v52, %v1923_v11  ;;  %v2662_v50 = vadd.f32 %v5192_v52, %v2661_v59  ;;  %v4143_v3 = vpop.f32.mrb[94].mxu0  ;;  %v4211_v56 = vpop.f32.mrb[94].mxu1 }
 0x198   :  { %3215 = vst.msk [vmem:[%s5638_s3 + $0x68] sm:$0xf] %vm3188_vm3, %v3798_v10  ;;  %v3799_v2 = vpack.c.bf16 %v2895_v17, %v2895_v17  ;;  %v2893_v54 = vmax.f32 %v2155_v46, %v2829_v41  ;;  %v2096_v13 = vmax.f32 %v1932_v57, 0.0  ;;  %v1935_v16 = vadd.f32 %v5192_v52, %v4143_v3  ;;  %v1926_v19 = vpop.f32.mrb[95].mxu0  ;;  %v2664_v5 = vpop.f32.mrb[95].mxu1 }
 0x199   :  { %3213 = vst.msk [vmem:[%s5638_s3 + $0x60] sm:$0xf] %vm3188_vm3, %v3796_v60  ;;  %v2834_v49 = vmax.f32 %v2670_v43, 0.0  ;;  %v2094_v45 = vmax.f32 %v1924_v1, 0.0  ;;  %v2832_v22 = vmax.f32 %v2662_v50, 0.0  ;;  %v2673_v34 = vadd.f32 %v5192_v52, %v4211_v56 }
 0x19a   :  { %3216 = vst.msk [vmem:[%s5638_s3 + $0x6c] sm:$0xf] %vm3188_vm3, %v3799_v2  ;;  %v3797_v29 = vpack.c.bf16 %v2893_v54, %v2893_v54  ;;  %v2160_v20 = vmax.f32 %v5041_v27, %v2096_v13  ;;  %v2097_v8 = vmax.f32 %v1935_v16, 0.0  ;;  %v1927_v40 = vadd.f32 %v5192_v52, %v1926_v19 }
 0x19b   :  { %v2158_v15 = vmax.f32 %v5043_v31, %v2094_v45  ;;  %v2665_v32 = vadd.f32 %v5192_v52, %v2664_v5  ;;  %v2835_v4 = vmax.f32 %v2673_v34, 0.0 }
 0x19c   :  { %3214 = vst.msk [vmem:[%s5638_s3 + $0x64] sm:$0xf] %vm3188_vm3, %v3797_v29  ;;  %v2898_v9 = vmax.f32 %v2160_v20, %v2834_v49  ;;  %v2161_v55 = vmax.f32 %v5045_v37, %v2097_v8  ;;  %v2095_v63 = vmax.f32 %v1927_v40, 0.0 }
 0x19d   :  { %v2896_v0 = vmax.f32 %v2158_v15, %v2832_v22  ;;  %v2833_v58 = vmax.f32 %v2665_v32, 0.0  ;;  %v4146_v27 = vpop.f32.mrb[96].mxu0  ;;  %v4214_v21 = vpop.f32.mrb[96].mxu1 }
 0x19e   :  { %v3802_v35 = vpack.c.bf16 %v2898_v9, %v2898_v9  ;;  %v2899_v44 = vmax.f32 %v2161_v55, %v2835_v4  ;;  %v2159_v31 = vmax.f32 %v5047_v38, %v2095_v63  ;;  %v1948_v48 = vadd.f32 %v5192_v52, %v4146_v27  ;;  %v1939_v47 = vpop.f32.mrb[97].mxu0  ;;  %v2677_v36 = vpop.f32.mrb[97].mxu1 }
 0x19f   :  { %v3800_v51 = vpack.c.bf16 %v2896_v0, %v2896_v0  ;;  %v2686_v33 = vadd.f32 %v5192_v52, %v4214_v21  ;;  %v1940_v61 = vadd.f32 %v5192_v52, %v1939_v47  ;;  %v2678_v37 = vadd.f32 %v5192_v52, %v2677_v36  ;;  %v4147_v39 = vpop.f32.mrb[98].mxu0  ;;  %v4215_v24 = vpop.f32.mrb[98].mxu1 }
 0x1a0   :  { %3219 = vst.msk [vmem:[%s5638_s3 + $0x78] sm:$0xf] %vm3188_vm3, %v3802_v35  ;;  %v3803_v6 = vpack.c.bf16 %v2899_v44, %v2899_v44  ;;  %v2897_v38 = vmax.f32 %v2159_v31, %v2833_v58  ;;  %v2100_v62 = vmax.f32 %v1948_v48, 0.0  ;;  %v1951_v53 = vadd.f32 %v5192_v52, %v4147_v39  ;;  %v1942_v41 = vpop.f32.mrb[99].mxu0  ;;  %v2680_v42 = vpop.f32.mrb[99].mxu1 }
 0x1a1   :  { %3217 = vst.msk [vmem:[%s5638_s3 + $0x70] sm:$0xf] %vm3188_vm3, %v3800_v51  ;;  %v2838_v25 = vmax.f32 %v2686_v33, 0.0  ;;  %v2098_v10 = vmax.f32 %v1940_v61, 0.0  ;;  %v2836_v17 = vmax.f32 %v2678_v37, 0.0  ;;  %v2689_v46 = vadd.f32 %v5192_v52, %v4215_v24 }
 0x1a2   :  { %3220 = vst.msk [vmem:[%s5638_s3 + $0x7c] sm:$0xf] %vm3188_vm3, %v3803_v6  ;;  %v3801_v57 = vpack.c.bf16 %v2897_v38, %v2897_v38  ;;  %v2164_v11 = vmax.f32 %v5057_v12, %v2100_v62  ;;  %v2101_v59 = vmax.f32 %v1951_v53, 0.0  ;;  %v1943_v60 = vadd.f32 %v5192_v52, %v1942_v41 }
 0x1a3   :  { %v2162_v43 = vmax.f32 %v5059_v18, %v2098_v10  ;;  %v2681_v1 = vadd.f32 %v5192_v52, %v2680_v42  ;;  %v2839_v56 = vmax.f32 %v2689_v46, 0.0 }
 0x1a4   :  { %3218 = vst.msk [vmem:[%s5638_s3 + $0x74] sm:$0xf] %vm3188_vm3, %v3801_v57  ;;  %v2902_v50 = vmax.f32 %v2164_v11, %v2838_v25  ;;  %v2165_v3 = vmax.f32 %v5061_v26, %v2101_v59  ;;  %v2099_v2 = vmax.f32 %v1943_v60, 0.0 }
 0x1a5   :  { %v2900_v54 = vmax.f32 %v2162_v43, %v2836_v17  ;;  %v2837_v13 = vmax.f32 %v2681_v1, 0.0  ;;  %v4150_v12 = vpop.f32.mrb[100].mxu0  ;;  %v4218_v16 = vpop.f32.mrb[100].mxu1 }
 0x1a6   :  { %v3806_v19 = vpack.c.bf16 %v2902_v50, %v2902_v50  ;;  %v2903_v5 = vmax.f32 %v2165_v3, %v2839_v56  ;;  %v2163_v18 = vmax.f32 %v5063_v28, %v2099_v2  ;;  %v1964_v49 = vadd.f32 %v5192_v52, %v4150_v12  ;;  %v1955_v45 = vpop.f32.mrb[101].mxu0  ;;  %v2693_v22 = vpop.f32.mrb[101].mxu1 }
 0x1a7   :  { %v3804_v34 = vpack.c.bf16 %v2900_v54, %v2900_v54  ;;  %v2702_v29 = vadd.f32 %v5192_v52, %v4218_v16  ;;  %v1956_v20 = vadd.f32 %v5192_v52, %v1955_v45  ;;  %v2694_v26 = vadd.f32 %v5192_v52, %v2693_v22  ;;  %v4151_v8 = vpop.f32.mrb[102].mxu0  ;;  %v4219_v40 = vpop.f32.mrb[102].mxu1  ;;  %v5663_v54 = vld [vmem:[#allocation2_spill] sm:$0xff]  ;;  %v5665_v45 = vld [vmem:[#allocation4_spill] sm:$0xff] }
 0x1a8   :  { %3223 = vst.msk [vmem:[%s5638_s3 + $0x88] sm:$0xf] %vm3188_vm3, %v3806_v19  ;;  %v3807_v15 = vpack.c.bf16 %v2903_v5, %v2903_v5  ;;  %v2901_v28 = vmax.f32 %v2163_v18, %v2837_v13  ;;  %v2104_v32 = vmax.f32 %v1964_v49, 0.0  ;;  %v1967_v9 = vadd.f32 %v5192_v52, %v4151_v8  ;;  %v1958_v55 = vpop.f32.mrb[103].mxu0  ;;  %v2696_v4 = vpop.f32.mrb[103].mxu1  ;;  %v5664_v19 = vld [vmem:[#allocation3_spill] sm:$0xff] }
 0x1a9   :  { %3221 = vst.msk [vmem:[%s5638_s3 + $0x80] sm:$0xf] %vm3188_vm3, %v3804_v34  ;;  %v2842_v63 = vmax.f32 %v2702_v29, 0.0  ;;  %v2102_v0 = vmax.f32 %v1956_v20, 0.0  ;;  %v2840_v58 = vmax.f32 %v2694_v26, 0.0  ;;  %v2705_v27 = vadd.f32 %v5192_v52, %v4219_v40 }
 0x1aa   :  { %3224 = vst.msk [vmem:[%s5638_s3 + $0x8c] sm:$0xf] %vm3188_vm3, %v3807_v15  ;;  %v3805_v21 = vpack.c.bf16 %v2901_v28, %v2901_v28  ;;  %v2168_v35 = vmax.f32 %v5073_v7, %v2104_v32  ;;  %v2105_v44 = vmax.f32 %v1967_v9, 0.0  ;;  %v1959_v31 = vadd.f32 %v5192_v52, %v1958_v55  ;;  %v5666_v32 = vld [vmem:[#allocation5_spill] sm:$0xff] }
 0x1ab   :  { %v2166_v48 = vmax.f32 %v5075_v14, %v2102_v0  ;;  %v2697_v47 = vadd.f32 %v5192_v52, %v2696_v4  ;;  %v2843_v33 = vmax.f32 %v2705_v27, 0.0 }
 0x1ac   :  { %3222 = vst.msk [vmem:[%s5638_s3 + $0x84] sm:$0xf] %vm3188_vm3, %v3805_v21  ;;  %v2906_v36 = vmax.f32 %v2168_v35, %v2842_v63  ;;  %v2169_v51 = vmax.f32 %v5077_v23, %v2105_v44  ;;  %v2103_v61 = vmax.f32 %v1959_v31, 0.0 }
 0x1ad   :  { %v2904_v37 = vmax.f32 %v2166_v48, %v2840_v58  ;;  %v2841_v39 = vmax.f32 %v2697_v47, 0.0  ;;  %v4154_v7 = vpop.f32.mrb[104].mxu0  ;;  %v4222_v24 = vpop.f32.mrb[104].mxu1 }
 0x1ae   :  { %v3810_v6 = vpack.c.bf16 %v2906_v36, %v2906_v36  ;;  %v2907_v38 = vmax.f32 %v2169_v51, %v2843_v33  ;;  %v2167_v14 = vmax.f32 %v5079_v30, %v2103_v61  ;;  %v1980_v62 = vadd.f32 %v5192_v52, %v4154_v7  ;;  %v1971_v53 = vpop.f32.mrb[105].mxu0  ;;  %v2709_v41 = vpop.f32.mrb[105].mxu1 }
 0x1af   :  { %v3808_v42 = vpack.c.bf16 %v2904_v37, %v2904_v37  ;;  %v2718_v25 = vadd.f32 %v5192_v52, %v4222_v24  ;;  %v1972_v10 = vadd.f32 %v5192_v52, %v1971_v53  ;;  %v2710_v23 = vadd.f32 %v5192_v52, %v2709_v41  ;;  %v4155_v17 = vpop.f32.mrb[106].mxu0  ;;  %v4223_v46 = vpop.f32.mrb[106].mxu1  ;;  %v5668_v53 = vld [vmem:[#allocation7_spill] sm:$0xff] }
 0x1b0   :  { %3227 = vst.msk [vmem:[%s5638_s3 + $0x98] sm:$0xf] %vm3188_vm3, %v3810_v6  ;;  %v3811_v57 = vpack.c.bf16 %v2907_v38, %v2907_v38  ;;  %v2905_v30 = vmax.f32 %v2167_v14, %v2841_v39  ;;  %v2108_v11 = vmax.f32 %v1980_v62, 0.0  ;;  %v1983_v59 = vadd.f32 %v5192_v52, %v4155_v17  ;;  %v1974_v60 = vpop.f32.mrb[107].mxu0  ;;  %v2712_v43 = vpop.f32.mrb[107].mxu1  ;;  %v5667_v6 = vld [vmem:[#allocation6_spill] sm:$0xff] }
 0x1b1   :  { %3225 = vst.msk [vmem:[%s5638_s3 + $0x90] sm:$0xf] %vm3188_vm3, %v3808_v42  ;;  %v2846_v1 = vmax.f32 %v2718_v25, 0.0  ;;  %v2106_v50 = vmax.f32 %v1972_v10, 0.0  ;;  %v2844_v3 = vmax.f32 %v2710_v23, 0.0  ;;  %v2721_v56 = vadd.f32 %v5192_v52, %v4223_v46  ;;  %v5669_v10 = vld [vmem:[#allocation8_spill] sm:$0xff] }
 0x1b2   :  { %3228 = vst.msk [vmem:[%s5638_s3 + $0x9c] sm:$0xf] %vm3188_vm3, %v3811_v57  ;;  %v3809_v2 = vpack.c.bf16 %v2905_v30, %v2905_v30  ;;  %v2172_v13 = vmax.f32 %v5663_v54, %v2108_v11  ;;  %v2109_v12 = vmax.f32 %v1983_v59, 0.0  ;;  %v1975_v16 = vadd.f32 %v5192_v52, %v1974_v60 }
 0x1b3   :  { %v2170_v5 = vmax.f32 %v5664_v19, %v2106_v50  ;;  %v2713_v18 = vadd.f32 %v5192_v52, %v2712_v43  ;;  %v2847_v34 = vmax.f32 %v2721_v56, 0.0 }
 0x1b4   :  { %3226 = vst.msk [vmem:[%s5638_s3 + $0x94] sm:$0xf] %vm3188_vm3, %v3809_v2  ;;  %v2910_v49 = vmax.f32 %v2172_v13, %v2846_v1  ;;  %v2173_v22 = vmax.f32 %v5665_v45, %v2109_v12  ;;  %v2107_v29 = vmax.f32 %v1975_v16, 0.0  ;;  %v5670_v1 = vld [vmem:[#allocation9_spill] sm:$0xff] }
 0x1b5   :  { %v2908_v20 = vmax.f32 %v2170_v5, %v2844_v3  ;;  %v2845_v26 = vmax.f32 %v2713_v18, 0.0  ;;  %v4158_v8 = vpop.f32.mrb[108].mxu0  ;;  %v4226_v40 = vpop.f32.mrb[108].mxu1 }
 0x1b6   :  { %v3814_v15 = vpack.c.bf16 %v2910_v49, %v2910_v49  ;;  %v2911_v28 = vmax.f32 %v2173_v22, %v2847_v34  ;;  %v2171_v9 = vmax.f32 %v5666_v32, %v2107_v29  ;;  %v1996_v55 = vadd.f32 %v5192_v52, %v4158_v8  ;;  %v1987_v4 = vpop.f32.mrb[109].mxu0  ;;  %v2725_v63 = vpop.f32.mrb[109].mxu1 }
 0x1b7   :  { %v3812_v0 = vpack.c.bf16 %v2908_v20, %v2908_v20  ;;  %v2734_v58 = vadd.f32 %v5192_v52, %v4226_v40  ;;  %v1988_v27 = vadd.f32 %v5192_v52, %v1987_v4  ;;  %v2726_v21 = vadd.f32 %v5192_v52, %v2725_v63  ;;  %v4159_v35 = vpop.f32.mrb[110].mxu0  ;;  %v4227_v44 = vpop.f32.mrb[110].mxu1  ;;  %v5672_v4 = vld [vmem:[#allocation11_spill] sm:$0xff] }
 0x1b8   :  { %3231 = vst.msk [vmem:[%s5638_s3 + $0xa8] sm:$0xf] %vm3188_vm3, %v3814_v15  ;;  %v3815_v31 = vpack.c.bf16 %v2911_v28, %v2911_v28  ;;  %v2909_v48 = vmax.f32 %v2171_v9, %v2845_v26  ;;  %v2112_v47 = vmax.f32 %v1996_v55, 0.0  ;;  %v1999_v36 = vadd.f32 %v5192_v52, %v4159_v35  ;;  %v1990_v51 = vpop.f32.mrb[111].mxu0  ;;  %v2728_v33 = vpop.f32.mrb[111].mxu1  ;;  %v5671_v28 = vld [vmem:[#allocation10_spill] sm:$0xff] }
 0x1b9   :  { %3229 = vst.msk [vmem:[%s5638_s3 + $0xa0] sm:$0xf] %vm3188_vm3, %v3812_v0  ;;  %v2850_v61 = vmax.f32 %v2734_v58, 0.0  ;;  %v2110_v37 = vmax.f32 %v1988_v27, 0.0  ;;  %v2848_v39 = vmax.f32 %v2726_v21, 0.0  ;;  %v2737_v7 = vadd.f32 %v5192_v52, %v4227_v44  ;;  %v5673_v27 = vld [vmem:[#allocation12_spill] sm:$0xff] }
 0x1ba   :  { %3232 = vst.msk [vmem:[%s5638_s3 + $0xac] sm:$0xf] %vm3188_vm3, %v3815_v31  ;;  %v3813_v24 = vpack.c.bf16 %v2909_v48, %v2909_v48  ;;  %v2176_v38 = vmax.f32 %v5667_v6, %v2112_v47  ;;  %v2113_v14 = vmax.f32 %v1999_v36, 0.0  ;;  %v1991_v62 = vadd.f32 %v5192_v52, %v1990_v51 }
 0x1bb   :  { %v2174_v41 = vmax.f32 %v5668_v53, %v2110_v37  ;;  %v2729_v42 = vadd.f32 %v5192_v52, %v2728_v33  ;;  %v2851_v17 = vmax.f32 %v2737_v7, 0.0 }
 0x1bc   :  { %3230 = vst.msk [vmem:[%s5638_s3 + $0xa4] sm:$0xf] %vm3188_vm3, %v3813_v24  ;;  %v2914_v25 = vmax.f32 %v2176_v38, %v2850_v61  ;;  %v2177_v23 = vmax.f32 %v5669_v10, %v2113_v14  ;;  %v2111_v46 = vmax.f32 %v1991_v62, 0.0  ;;  %v5674_v61 = vld [vmem:[#allocation13_spill] sm:$0xff] }
 0x1bd   :  { %v2912_v57 = vmax.f32 %v2174_v41, %v2848_v39  ;;  %v2849_v30 = vmax.f32 %v2729_v42, 0.0  ;;  %v4162_v11 = vpop.f32.mrb[112].mxu0  ;;  %v4230_v59 = vpop.f32.mrb[112].mxu1 }
 0x1be   :  { %v3818_v60 = vpack.c.bf16 %v2914_v25, %v2914_v25  ;;  %v2915_v43 = vmax.f32 %v2177_v23, %v2851_v17  ;;  %v2175_v50 = vmax.f32 %v5670_v1, %v2111_v46  ;;  %v2012_v3 = vadd.f32 %v5192_v52, %v4162_v11  ;;  %v2003_v56 = vpop.f32.mrb[113].mxu0  ;;  %v2741_v2 = vpop.f32.mrb[113].mxu1 }
 0x1bf   :  { %v3816_v54 = vpack.c.bf16 %v2912_v57, %v2912_v57  ;;  %v2750_v13 = vadd.f32 %v5192_v52, %v4230_v59  ;;  %v2004_v12 = vadd.f32 %v5192_v52, %v2003_v56  ;;  %v2742_v16 = vadd.f32 %v5192_v52, %v2741_v2  ;;  %v4163_v19 = vpop.f32.mrb[114].mxu0  ;;  %v4231_v5 = vpop.f32.mrb[114].mxu1  ;;  %v5676_v56 = vld [vmem:[#allocation15_spill] sm:$0xff] }
 0x1c0   :  { %3235 = vst.msk [vmem:[%s5638_s3 + $0xb8] sm:$0xf] %vm3188_vm3, %v3818_v60  ;;  %v3819_v18 = vpack.c.bf16 %v2915_v43, %v2915_v43  ;;  %v2913_v49 = vmax.f32 %v2175_v50, %v2849_v30  ;;  %v2116_v45 = vmax.f32 %v2012_v3, 0.0  ;;  %v2015_v22 = vadd.f32 %v5192_v52, %v4163_v19  ;;  %v2006_v34 = vpop.f32.mrb[115].mxu0  ;;  %v2744_v29 = vpop.f32.mrb[115].mxu1  ;;  %v5675_v43 = vld [vmem:[#allocation14_spill] sm:$0xff] }
 0x1c1   :  { %3233 = vst.msk [vmem:[%s5638_s3 + $0xb0] sm:$0xf] %vm3188_vm3, %v3816_v54  ;;  %v2854_v20 = vmax.f32 %v2750_v13, 0.0  ;;  %v2114_v26 = vmax.f32 %v2004_v12, 0.0  ;;  %v2852_v8 = vmax.f32 %v2742_v16, 0.0  ;;  %v2753_v40 = vadd.f32 %v5192_v52, %v4231_v5  ;;  %v5677_v12 = vld [vmem:[#allocation16_spill] sm:$0xff] }
 0x1c2   :  { %3236 = vst.msk [vmem:[%s5638_s3 + $0xbc] sm:$0xf] %vm3188_vm3, %v3819_v18  ;;  %v3817_v15 = vpack.c.bf16 %v2913_v49, %v2913_v49  ;;  %v2180_v32 = vmax.f32 %v5671_v28, %v2116_v45  ;;  %v2117_v9 = vmax.f32 %v2015_v22, 0.0  ;;  %v2007_v55 = vadd.f32 %v5192_v52, %v2006_v34 }
 0x1c3   :  { %v2178_v63 = vmax.f32 %v5672_v4, %v2114_v26  ;;  %v2745_v0 = vadd.f32 %v5192_v52, %v2744_v29  ;;  %v2855_v35 = vmax.f32 %v2753_v40, 0.0 }
 0x1c4   :  { %3234 = vst.msk [vmem:[%s5638_s3 + $0xb4] sm:$0xf] %vm3188_vm3, %v3817_v15  ;;  %v2918_v58 = vmax.f32 %v2180_v32, %v2854_v20  ;;  %v2181_v21 = vmax.f32 %v5673_v27, %v2117_v9  ;;  %v2115_v44 = vmax.f32 %v2007_v55, 0.0  ;;  %v5678_v20 = vld [vmem:[#allocation17_spill] sm:$0xff] }
 0x1c5   :  { %v2916_v31 = vmax.f32 %v2178_v63, %v2852_v8  ;;  %v2853_v48 = vmax.f32 %v2745_v0, 0.0  ;;  %v4166_v47 = vpop.f32.mrb[116].mxu0  ;;  %v4234_v36 = vpop.f32.mrb[116].mxu1 }
 0x1c6   :  { %v3822_v51 = vpack.c.bf16 %v2918_v58, %v2918_v58  ;;  %v2919_v33 = vmax.f32 %v2181_v21, %v2855_v35  ;;  %v2179_v37 = vmax.f32 %v5674_v61, %v2115_v44  ;;  %v2028_v39 = vadd.f32 %v5192_v52, %v4166_v47  ;;  %v2019_v7 = vpop.f32.mrb[117].mxu0  ;;  %v2757_v24 = vpop.f32.mrb[117].mxu1 }
 0x1c7   :  { %v3820_v6 = vpack.c.bf16 %v2916_v31, %v2916_v31  ;;  %v2766_v38 = vadd.f32 %v5192_v52, %v4234_v36  ;;  %v2020_v14 = vadd.f32 %v5192_v52, %v2019_v7  ;;  %v2758_v62 = vadd.f32 %v5192_v52, %v2757_v24  ;;  %v4167_v53 = vpop.f32.mrb[118].mxu0  ;;  %v4235_v41 = vpop.f32.mrb[118].mxu1  ;;  %v5680_v7 = vld [vmem:[#allocation19_spill] sm:$0xff] }
 0x1c8   :  { %3239 = vst.msk [vmem:[%s5638_s3 + $0xc8] sm:$0xf] %vm3188_vm3, %v3822_v51  ;;  %v3823_v42 = vpack.c.bf16 %v2919_v33, %v2919_v33  ;;  %v2917_v25 = vmax.f32 %v2179_v37, %v2853_v48  ;;  %v2120_v10 = vmax.f32 %v2028_v39, 0.0  ;;  %v2031_v23 = vadd.f32 %v5192_v52, %v4167_v53  ;;  %v2022_v17 = vpop.f32.mrb[119].mxu0  ;;  %v2760_v46 = vpop.f32.mrb[119].mxu1  ;;  %v5679_v33 = vld [vmem:[#allocation18_spill] sm:$0xff] }
 0x1c9   :  { %3237 = vst.msk [vmem:[%s5638_s3 + $0xc0] sm:$0xf] %vm3188_vm3, %v3820_v6  ;;  %v2858_v57 = vmax.f32 %v2766_v38, 0.0  ;;  %v2118_v30 = vmax.f32 %v2020_v14, 0.0  ;;  %v2856_v11 = vmax.f32 %v2758_v62, 0.0  ;;  %v2769_v59 = vadd.f32 %v5192_v52, %v4235_v41  ;;  %v5681_v14 = vld [vmem:[#allocation20_spill] sm:$0xff] }
 0x1ca   :  { %3240 = vst.msk [vmem:[%s5638_s3 + $0xcc] sm:$0xf] %vm3188_vm3, %v3823_v42  ;;  %v3821_v60 = vpack.c.bf16 %v2917_v25, %v2917_v25  ;;  %v2184_v1 = vmax.f32 %v5675_v43, %v2120_v10  ;;  %v2121_v50 = vmax.f32 %v2031_v23, 0.0  ;;  %v2023_v3 = vadd.f32 %v5192_v52, %v2022_v17 }
 0x1cb   :  { %v2182_v2 = vmax.f32 %v5676_v56, %v2118_v30  ;;  %v2761_v54 = vadd.f32 %v5192_v52, %v2760_v46  ;;  %v2859_v19 = vmax.f32 %v2769_v59, 0.0  ;;  %v5561_v52 = vld [vmem:[%s5637_s2] ss:$0 sm:$0xff] }
 0x1cc   :  { %3238 = vst.msk [vmem:[%s5638_s3 + $0xc4] sm:$0xf] %vm3188_vm3, %v3821_v60  ;;  %v2922_v13 = vmax.f32 %v2184_v1, %v2858_v57  ;;  %v2185_v16 = vmax.f32 %v5677_v12, %v2121_v50  ;;  %v2119_v5 = vmax.f32 %v2023_v3, 0.0  ;;  %v5682_v57 = vld [vmem:[#allocation21_spill] sm:$0xff] }
 0x1cd   :  { %v2920_v18 = vmax.f32 %v2182_v2, %v2856_v11  ;;  %v2857_v49 = vmax.f32 %v2761_v54, 0.0  ;;  %v4170_v45 = vpop.f32.mrb[120].mxu0  ;;  %v4238_v22 = vpop.f32.mrb[120].mxu1 }
 0x1ce   :  { %v3826_v34 = vpack.c.bf16 %v2922_v13, %v2922_v13  ;;  %v2923_v29 = vmax.f32 %v2185_v16, %v2859_v19  ;;  %v2183_v26 = vmax.f32 %v5678_v20, %v2119_v5  ;;  %v2044_v8 = vadd.f32 %v5561_v52, %v4170_v45  ;;  %v2035_v40 = vpop.f32.mrb[121].mxu0  ;;  %v2773_v15 = vpop.f32.mrb[121].mxu1 }
 0x1cf   :  { %v3824_v28 = vpack.c.bf16 %v2920_v18, %v2920_v18  ;;  %v2782_v32 = vadd.f32 %v5561_v52, %v4238_v22  ;;  %v2036_v9 = vadd.f32 %v5561_v52, %v2035_v40  ;;  %v2774_v55 = vadd.f32 %v5561_v52, %v2773_v15  ;;  %v4171_v4 = vpop.f32.mrb[122].mxu0  ;;  %v4239_v63 = vpop.f32.mrb[122].mxu1  ;;  %v5684_v40 = vld [vmem:[#allocation23_spill] sm:$0xff] }
 0x1d0   :  { %3243 = vst.msk [vmem:[%s5638_s3 + $0xd8] sm:$0xf] %vm3188_vm3, %v3826_v34  ;;  %v3827_v0 = vpack.c.bf16 %v2923_v29, %v2923_v29  ;;  %v2921_v58 = vmax.f32 %v2183_v26, %v2857_v49  ;;  %v2124_v27 = vmax.f32 %v2044_v8, 0.0  ;;  %v2047_v21 = vadd.f32 %v5561_v52, %v4171_v4  ;;  %v2038_v35 = vpop.f32.mrb[123].mxu0  ;;  %v2776_v44 = vpop.f32.mrb[123].mxu1  ;;  %v5683_v29 = vld [vmem:[#allocation22_spill] sm:$0xff] }
 0x1d1   :  { %3241 = vst.msk [vmem:[%s5638_s3 + $0xd0] sm:$0xf] %vm3188_vm3, %v3824_v28  ;;  %v2862_v31 = vmax.f32 %v2782_v32, 0.0  ;;  %v2122_v48 = vmax.f32 %v2036_v9, 0.0  ;;  %v2860_v47 = vmax.f32 %v2774_v55, 0.0  ;;  %v2785_v36 = vadd.f32 %v5561_v52, %v4239_v63  ;;  %v5685_v9 = vld [vmem:[#allocation24_spill] sm:$0xff] }
 0x1d2   :  { %3244 = vst.msk [vmem:[%s5638_s3 + $0xdc] sm:$0xf] %vm3188_vm3, %v3827_v0  ;;  %v3825_v51 = vpack.c.bf16 %v2921_v58, %v2921_v58  ;;  %v2188_v61 = vmax.f32 %v5679_v33, %v2124_v27  ;;  %v2125_v37 = vmax.f32 %v2047_v21, 0.0  ;;  %v2039_v39 = vadd.f32 %v5561_v52, %v2038_v35  ;;  %v5686_v21 = vld [vmem:[#allocation25_spill] sm:$0xff] }
 0x1d3   :  { %v2186_v24 = vmax.f32 %v5680_v7, %v2122_v48  ;;  %v2777_v6 = vadd.f32 %v5561_v52, %v2776_v44  ;;  %v2863_v53 = vmax.f32 %v2785_v36, 0.0 }
 0x1d4   :  { %3242 = vst.msk [vmem:[%s5638_s3 + $0xd4] sm:$0xf] %vm3188_vm3, %v3825_v51  ;;  %v2926_v38 = vmax.f32 %v2188_v61, %v2862_v31  ;;  %v2189_v62 = vmax.f32 %v5681_v14, %v2125_v37  ;;  %v2123_v41 = vmax.f32 %v2039_v39, 0.0 }
 0x1d5   :  { %v2924_v42 = vmax.f32 %v2186_v24, %v2860_v47  ;;  %v2861_v25 = vmax.f32 %v2777_v6, 0.0  ;;  %v4174_v10 = vpop.f32.mrb[124].mxu0  ;;  %v4242_v23 = vpop.f32.mrb[124].mxu1 }
 0x1d6   :  { %v3830_v17 = vpack.c.bf16 %v2926_v38, %v2926_v38  ;;  %v2927_v46 = vmax.f32 %v2189_v62, %v2863_v53  ;;  %v2187_v30 = vmax.f32 %v5682_v57, %v2123_v41  ;;  %v2060_v11 = vadd.f32 %v5561_v52, %v4174_v10  ;;  %v2051_v59 = vpop.f32.mrb[125].mxu0  ;;  %v2789_v60 = vpop.f32.mrb[125].mxu1 }
 0x1d7   :  { %v3828_v43 = vpack.c.bf16 %v2924_v42, %v2924_v42  ;;  %v2798_v1 = vadd.f32 %v5561_v52, %v4242_v23  ;;  %v2052_v50 = vadd.f32 %v5561_v52, %v2051_v59  ;;  %v2790_v3 = vadd.f32 %v5561_v52, %v2789_v60  ;;  %v4175_v56 = vpop.f32.mrb[126].mxu0  ;;  %v4243_v2 = vpop.f32.mrb[126].mxu1 }
 0x1d8   :  { %3247 = vst.msk [vmem:[%s5638_s3 + $0xe8] sm:$0xf] %vm3188_vm3, %v3830_v17  ;;  %v3831_v54 = vpack.c.bf16 %v2927_v46, %v2927_v46  ;;  %v2925_v13 = vmax.f32 %v2187_v30, %v2861_v25  ;;  %v2128_v12 = vmax.f32 %v2060_v11, 0.0  ;;  %v2063_v16 = vadd.f32 %v5561_v52, %v4175_v56  ;;  %v2054_v19 = vpop.f32.mrb[127].mxu0  ;;  %v2792_v5 = vpop.f32.mrb[127].mxu1 }
 0x1d9   :  { %3245 = vst.msk [vmem:[%s5638_s3 + $0xe0] sm:$0xf] %vm3188_vm3, %v3828_v43  ;;  %v2866_v18 = vmax.f32 %v2798_v1, 0.0  ;;  %v2126_v49 = vmax.f32 %v2052_v50, 0.0  ;;  %v2864_v45 = vmax.f32 %v2790_v3, 0.0  ;;  %v2801_v22 = vadd.f32 %v5561_v52, %v4243_v2 }
 0x1da   :  { %3248 = vst.msk [vmem:[%s5638_s3 + $0xec] sm:$0xf] %vm3188_vm3, %v3831_v54  ;;  %v3829_v34 = vpack.c.bf16 %v2925_v13, %v2925_v13  ;;  %v2192_v20 = vmax.f32 %v5683_v29, %v2128_v12  ;;  %v2129_v26 = vmax.f32 %v2063_v16, 0.0  ;;  %v2055_v8 = vadd.f32 %v5561_v52, %v2054_v19 }
 0x1db   :  { %v2190_v15 = vmax.f32 %v5684_v40, %v2126_v49  ;;  %v2793_v28 = vadd.f32 %v5561_v52, %v2792_v5  ;;  %v2867_v4 = vmax.f32 %v2801_v22, 0.0 }
 0x1dc   :  { %3246 = vst.msk [vmem:[%s5638_s3 + $0xe4] sm:$0xf] %vm3188_vm3, %v3829_v34  ;;  %v2930_v32 = vmax.f32 %v2192_v20, %v2866_v18  ;;  %v2193_v55 = vmax.f32 %v5685_v9, %v2129_v26  ;;  %v2127_v63 = vmax.f32 %v2055_v8, 0.0 }
 0x1dd   :  { %v2928_v0 = vmax.f32 %v2190_v15, %v2864_v45  ;;  %v2865_v44 = vmax.f32 %v2793_v28, 0.0 }
 0x1de   :  { %v3834_v58 = vpack.c.bf16 %v2930_v32, %v2930_v32  ;;  %v2931_v27 = vmax.f32 %v2193_v55, %v2867_v4  ;;  %v2191_v35 = vmax.f32 %v5686_v21, %v2127_v63 }
 0x1df   :  { %v3832_v31 = vpack.c.bf16 %v2928_v0, %v2928_v0 }
 0x1e0   :  { %3251 = vst.msk [vmem:[%s5638_s3 + $0xf8] sm:$0xf] %vm3188_vm3, %v3834_v58  ;;  %v3835_v52 = vpack.c.bf16 %v2931_v27, %v2931_v27  ;;  %v2929_v48 = vmax.f32 %v2191_v35, %v2865_v44 }
 0x1e1   :  { %3249 = vst.msk [vmem:[%s5638_s3 + $0xf0] sm:$0xf] %vm3188_vm3, %v3832_v31 }
 0x1e2   :  { %3252 = vst.msk [vmem:[%s5638_s3 + $0xfc] sm:$0xf] %vm3188_vm3, %v3835_v52  ;;  %v3833_v47 = vpack.c.bf16 %v2929_v48, %v2929_v48 }
 0x1e4   :  { %3250 = vst.msk [vmem:[%s5638_s3 + $0xf4] sm:$0xf] %vm3188_vm3, %v3833_v47 }

// kernel: net_forward.5
= control target key start
LH: loop header
LB: loop body
LE: loop exit
PB: predicated region body
PF: predicated region fallthrough
CT: control target
= control target key end

     0   :  { %vm318_vm0 = vcmask 261120   ;;  %vm1826_vm1 = vcmask 519168   ;;  %s3553_s1 = inlined_call_operand.vmem [shape: bf16[288,64], index: 1, kind: input, shape index: {}]   ;;  %s3554_s0 = inlined_call_operand.vmem [shape: bf16[4,128,288], index: 0, kind: input, shape index: {}]   ;;  %s3555_s2 = inlined_call_operand.vmem [shape: f32[1,64], index: 2, kind: input, shape index: {}]   ;;  %s3556_s3 = inlined_call_operand.vmem [shape: bf16[128,64], index: 3, kind: output, shape index: {}]  }
   0x1   :  { %v2683_v0 = vld [vmem:[%s3553_s1 + $0x40] sm:$0xff]   ;;  %v2700_v3 = vld [vmem:[%s3553_s1 + $0x48] sm:$0xff]   ;;  %v2722_v7 = vld [vmem:[%s3553_s1 + $0x50] sm:$0xff]  }
   0x2   :  { %v2688_v1 = vld [vmem:[%s3553_s1 + $0x80] sm:$0xff]   ;;  %2122 = vmatprep.subr.bf16.mxu0 %v2683_v0  ;;  %v2707_v4 = vld [vmem:[%s3553_s1 + $0x88] sm:$0xff]   ;;  %v2734_v9 = vld [vmem:[%s3553_s1 + $0x10] sm:$0xff]  }
   0x3   :  { %v2694_v2 = vld [vmem:[%s3553_s1] sm:$0xff]   ;;  %2418 = vmatprep.subr.bf16.mxu1 %v2688_v1  ;;  %v2713_v5 = vld [vmem:[%s3553_s1 + $0x8] sm:$0xff]   ;;  %v2740_v10 = vld [vmem:[%s3553_s1 + $0x58] sm:$0xff]  }
   0x4   :  { %2123 = vmatpush3.bf16.msra.mxu0 %v2694_v2  ;;  %2419 = vmatpush3.bf16.msra.mxu1 %v2688_v1  ;;  %v2520_v6 = vld [vmem:[%s3554_s0 + $0x8] ss:$12 sps:$4 sm:$0xff]   ;;  %v2522_v8 = vld [vmem:[%s3554_s0 + $0x20] ss:$12 sps:$4 sm:$0xff]   ;;  %v2746_v11 = vld [vmem:[%s3553_s1 + $0x18] sm:$0xff]  }
   0x5   :  { %2124 = vmatprep.subr.bf16.mxu0 %v2700_v3  ;;  %2420 = vmatprep.subr.bf16.mxu1 %v2707_v4  ;;  %v2526_v12 = vld [vmem:[%s3554_s0 + $0x38] ss:$12 sps:$4 sm:$0xff]   ;;  %v2528_v14 = vld [vmem:[%s3554_s0 + $0x50] ss:$12 sps:$4 sm:$0xff]   ;;  %v2776_v16 = vld [vmem:[%s3553_s1 + $0x68] sm:$0xff]  }
   0x6   :  { %2422 = vmatprep.mubr.msk.bf16.mxu1 %vm318_vm0, %v2520_v6  ;;  %v2758_v13 = vld [vmem:[%s3553_s1 + $0x60] sm:$0xff]   ;;  %v2532_v17 = vld [vmem:[%s3554_s0 + $0x68] ss:$12 sps:$4 sm:$0xff]   ;;  %v2810_v22 = vld [vmem:[%s3553_s1 + $0x78] sm:$0xff]  }
   0x7   :  { %v2769_v15 = vld [vmem:[%s3553_s1 + $0x20] sm:$0xff]   ;;  %v2787_v18 = vld [vmem:[%s3553_s1 + $0x28] sm:$0xff]   ;;  %v2794_v19 = vld [vmem:[%s3553_s1 + $0x70] sm:$0xff]  }
   0x8   :  { %2125 = vmatpush3.bf16.msra.mxu0 %v2713_v5  ;;  %2421 = vmatpush3.bf16.msra.mxu1 %v2707_v4  ;;  %v2534_v20 = vld [vmem:[%s3554_s0 + $0x80] ss:$12 sps:$4 sm:$0xff]   ;;  %v2803_v21 = vld [vmem:[%s3553_s1 + $0x30] sm:$0xff]   ;;  %v2541_v24 = vld [vmem:[%s3554_s0 + $0x98] ss:$12 sps:$4 sm:$0xff]  }
   0x9   :  { %2126 = vmatprep.subr.bf16.mxu0 %v2722_v7  ;;  %2196 = vmatprep.subr.bf16.mxu1 %v2683_v0  ;;  %v2540_v23 = vld [vmem:[%s3554_s0 + $0x4] ss:$12 sps:$4 sm:$0xff]   ;;  %v2826_v25 = vld [vmem:[%s3553_s1 + $0x38] sm:$0xff]   ;;  %v2538_v26 = vld [vmem:[%s3554_s0] ss:$12 sps:$4 sm:$0xff]  }
   0xa   :  { %375 = vmatprep.mubr.bf16.mxu0 %v2540_v23  ;;  %v2542_v27 = vld [vmem:[%s3554_s0 + $0xb0] ss:$12 sps:$4 sm:$0xff]   ;;  %v2545_v30 = vld [vmem:[%s3554_s0 + $0xc0] ss:$12 sps:$4 sm:$0xff]   ;;  %v2548_v31 = vld [vmem:[%s3554_s0 + $0x18] ss:$12 sps:$4 sm:$0xff]  }
   0xb   :  { %2423 = vmatmul.mubr.msk.bf16.vlgmr.msra.gmra.mrb[0].mxu1 %vm318_vm0, %v2522_v8  ;;  %v2543_v28 = vld [vmem:[%s3554_s0 + $0x1c] ss:$12 sps:$4 sm:$0xff]   ;;  %v2547_v29 = vld [vmem:[%s3554_s0 + $0xc4] ss:$12 sps:$4 sm:$0xff]   ;;  %v2549_v32 = vld [vmem:[%s3554_s0 + $0x34] ss:$12 sps:$4 sm:$0xff]  }
   0xc   :  { %2127 = vmatpush3.bf16.msra.mxu0 %v2734_v9  ;;  %2197 = vmatpush3.bf16.msra.mxu1 %v2694_v2  ;;  %v2551_v33 = vld [vmem:[%s3554_s0 + $0xdc] ss:$12 sps:$4 sm:$0xff]   ;;  %v2554_v35 = vld [vmem:[%s3554_s0 + $0xd8] ss:$12 sps:$4 sm:$0xff]   ;;  %v2557_v37 = vld [vmem:[%s3554_s0 + $0xf4] ss:$12 sps:$4 sm:$0xff]  }
   0xd   :  { %2128 = vmatprep.subr.bf16.mxu0 %v2740_v10  ;;  %2198 = vmatprep.subr.bf16.mxu1 %v2700_v3  ;;  %v2553_v34 = vld [vmem:[%s3554_s0 + $0x30] ss:$12 sps:$4 sm:$0xff]   ;;  %v2555_v36 = vld [vmem:[%s3554_s0 + $0x4c] ss:$12 sps:$4 sm:$0xff]   ;;  %v2559_v38 = vld [vmem:[%s3554_s0 + $0x48] ss:$12 sps:$4 sm:$0xff]  }
   0xe   :  { %2426 = vmatprep.mubr.msk.bf16.mxu1 %vm318_vm0, %v2526_v12  ;;  %v2560_v39 = vld [vmem:[%s3554_s0 + $0xf0] ss:$12 sps:$4 sm:$0xff]   ;;  %v2563_v41 = vld [vmem:[%s3554_s0 + $0x10c] ss:$12 sps:$4 sm:$0xff]   ;;  %v2566_v43 = vld [vmem:[%s3554_s0 + $0x108] ss:$12 sps:$4 sm:$0xff]  }
   0xf   :  { %v2561_v40 = vld [vmem:[%s3554_s0 + $0x64] ss:$12 sps:$4 sm:$0xff]   ;;  %v2565_v42 = vld [vmem:[%s3554_s0 + $0x60] ss:$12 sps:$4 sm:$0xff]   ;;  %v2567_v44 = vld [vmem:[%s3554_s0 + $0x7c] ss:$12 sps:$4 sm:$0xff]  }
  0x10   :  { %2129 = vmatpush3.bf16.msra.mxu0 %v2746_v11  ;;  %2199 = vmatpush3.bf16.msra.mxu1 %v2713_v5  ;;  %v2569_v45 = vld [vmem:[%s3554_s0 + $0x124] ss:$12 sps:$4 sm:$0xff]   ;;  %v2572_v47 = vld [vmem:[%s3554_s0 + $0x120] ss:$12 sps:$4 sm:$0xff]   ;;  %v2575_v49 = vld [vmem:[%s3554_s0 + $0x13c] ss:$12 sps:$4 sm:$0xff]  }
  0x11   :  { %2130 = vmatprep.subr.bf16.mxu0 %v2758_v13  ;;  %2200 = vmatprep.subr.bf16.mxu1 %v2722_v7  ;;  %v2571_v46 = vld [vmem:[%s3554_s0 + $0x78] ss:$12 sps:$4 sm:$0xff]   ;;  %v2573_v48 = vld [vmem:[%s3554_s0 + $0x94] ss:$12 sps:$4 sm:$0xff]   ;;  %v2577_v50 = vld [vmem:[%s3554_s0 + $0x90] ss:$12 sps:$4 sm:$0xff]  }
  0x12   :  { %v2578_v51 = vld [vmem:[%s3554_s0 + $0x138] ss:$12 sps:$4 sm:$0xff]   ;;  %v2581_v53 = vld [vmem:[%s3554_s0 + $0x154] ss:$12 sps:$4 sm:$0xff]   ;;  %v2584_v55 = vld [vmem:[%s3554_s0 + $0x150] ss:$12 sps:$4 sm:$0xff]  }
  0x13   :  { %2427 = vmatmul.mubr.msk.bf16.gmra.mrb[4].mxu1 %vm318_vm0, %v2528_v14  ;;  %v2579_v52 = vld [vmem:[%s3554_s0 + $0xac] ss:$12 sps:$4 sm:$0xff]   ;;  %v2583_v54 = vld [vmem:[%s3554_s0 + $0xa8] ss:$12 sps:$4 sm:$0xff]   ;;  %v2593_v61 = vld [vmem:[%s3554_s0 + $0x184] ss:$12 sps:$4 sm:$0xff]  }
  0x14   :  { %2131 = vmatpush3.bf16.msra.mxu0 %v2769_v15  ;;  %2201 = vmatpush3.bf16.msra.mxu1 %v2734_v9  ;;  %v2585_v56 = vld [vmem:[%s3554_s0 + $0x16c] ss:$12 sps:$4 sm:$0xff]   ;;  %v2587_v57 = vld [vmem:[%s3554_s0 + $0xc8] ss:$12 sps:$4 sm:$0xff]   ;;  %v2594_v63 = vld [vmem:[%s3554_s0 + $0x110] ss:$12 sps:$4 sm:$0xff]  }
  0x15   :  { %2132 = vmatprep.subr.bf16.mxu0 %v2776_v16  ;;  %2202 = vmatprep.subr.bf16.mxu1 %v2740_v10  ;;  %v2588_v58 = vld [vmem:[%s3554_s0 + $0x168] ss:$12 sps:$4 sm:$0xff]   ;;  %v2589_v59 = vld [vmem:[%s3554_s0 + $0xe0] ss:$12 sps:$4 sm:$0xff]   ;;  %v2590_v60 = vld [vmem:[%s3554_s0 + $0xf8] ss:$12 sps:$4 sm:$0xff]  }
  0x16   :  { %2430 = vmatprep.mubr.msk.bf16.mxu1 %vm318_vm0, %v2532_v17  ;;  %v2591_v62 = vld [vmem:[%s3554_s0 + $0x180] ss:$12 sps:$4 sm:$0xff]   ;;  %v2595_v6 = vld [vmem:[%s3554_s0 + $0x128] ss:$12 sps:$4 sm:$0xff]   ;;  %v2599_v14 = vld [vmem:[%s3554_s0 + $0x198] ss:$12 sps:$4 sm:$0xff]  }
  0x17   :  { %v2596_v8 = vld [vmem:[%s3554_s0 + $0x19c] ss:$12 sps:$4 sm:$0xff]   ;;  %v2598_v12 = vld [vmem:[%s3554_s0 + $0x140] ss:$12 sps:$4 sm:$0xff]  }
  0x18   :  { %2133 = vmatpush3.bf16.msra.mxu0 %v2787_v18  ;;  %2203 = vmatpush3.bf16.msra.mxu1 %v2746_v11  ;;  %v2601_v17 = vld [vmem:[%s3554_s0 + $0x1b4] ss:$12 sps:$4 sm:$0xff]   ;;  %v2604_v23 = vld [vmem:[%s3554_s0 + $0x1b0] ss:$12 sps:$4 sm:$0xff]  }
  0x19   :  { %2134 = vmatprep.subr.bf16.mxu0 %v2794_v19  ;;  %2204 = vmatprep.subr.bf16.mxu1 %v2758_v13 }
  0x1b   :  { %2431 = vmatmul.mubr.msk.bf16.gmra.mrb[8].mxu1 %vm318_vm0, %v2534_v20  ;;  %v2603_v20 = vld [vmem:[%s3554_s0 + $0x170] ss:$12 sps:$4 sm:$0xff]  }
  0x1c   :  { %2135 = vmatpush3.bf16.msra.mxu0 %v2803_v21  ;;  %2205 = vmatpush3.bf16.msra.mxu1 %v2769_v15 }
  0x1d   :  { %2136 = vmatprep.subr.bf16.mxu0 %v2810_v22  ;;  %2206 = vmatprep.subr.bf16.mxu1 %v2776_v16 }
  0x1e   :  { %2434 = vmatprep.mubr.msk.bf16.mxu1 %vm318_vm0, %v2541_v24  ;;  %v2605_v24 = vld [vmem:[%s3554_s0 + $0x1cc] ss:$12 sps:$4 sm:$0xff]  }
  0x20   :  { %2137 = vmatpush3.bf16.msra.mxu0 %v2826_v25  ;;  %2207 = vmatpush3.bf16.msra.mxu1 %v2787_v18 }
  0x21   :  { %2208 = vmatprep.subr.bf16.mxu1 %v2794_v19  ;;  %2438 = vmatprep.subr.bf16.mxu0 %v2688_v1 }
  0x23   :  { %376 = vmatmul.mubr.bf16.vlgmr.msra.gmra.mrb[0].mxu0 %v2538_v26  ;;  %2435 = vmatmul.mubr.msk.bf16.gmra.mrb[12].mxu1 %vm318_vm0, %v2542_v27  ;;  %v2607_v26 = vld [vmem:[%s3554_s0 + $0x188] ss:$12 sps:$4 sm:$0xff]  }
  0x24   :  { %2209 = vmatpush3.bf16.msra.mxu1 %v2803_v21  ;;  %2439 = vmatpush3.bf16.msra.mxu0 %v2688_v1  ;;  %v2608_v27 = vld [vmem:[%s3554_s0 + $0x1c8] ss:$12 sps:$4 sm:$0xff]  }
  0x25   :  { %2210 = vmatprep.subr.bf16.mxu1 %v2810_v22  ;;  %383 = vmatprep.mubr.bf16.mxu0 %v2543_v28  ;;  %v2609_v28 = vld [vmem:[%s3554_s0 + $0x1a0] ss:$12 sps:$4 sm:$0xff]  }
  0x26   :  { %762 = vmatprep.mubr.bf16.mxu1 %v2547_v29  ;;  %2440 = vmatprep.subr.bf16.mxu0 %v2707_v4  ;;  %v2610_v29 = vld [vmem:[%s3554_s0 + $0x1e4] ss:$12 sps:$4 sm:$0xff]  }
  0x28   :  { %2211 = vmatpush3.bf16.msra.mxu1 %v2826_v25  ;;  %2441 = vmatpush3.bf16.msra.mxu0 %v2707_v4 }
  0x29   :  { %2270 = vmatprep.subr.bf16.mxu1 %v2683_v0  ;;  %2458 = vmatprep.subr.bf16.mxu0 %v2688_v1 }
  0x2b   :  { %384 = vmatmul.mubr.bf16.gmra.mrb[4].mxu0 %v2548_v31  ;;  %763 = vmatmul.mubr.bf16.vlgmr.msra.gmra.mrb[16].mxu1 %v2545_v30  ;;  %v2612_v30 = vld [vmem:[%s3554_s0 + $0x1b8] ss:$12 sps:$4 sm:$0xff]   ;;  %v2613_v31 = vld [vmem:[%s3554_s0 + $0x1e0] ss:$12 sps:$4 sm:$0xff]  }
  0x2c   :  { %391 = vmatprep.mubr.bf16.mxu0 %v2549_v32  ;;  %770 = vmatprep.mubr.bf16.mxu1 %v2551_v33  ;;  %v2614_v32 = vld [vmem:[%s3554_s0 + $0x1d0] ss:$12 sps:$4 sm:$0xff]   ;;  %v2625_v33 = vld [vmem:[%s3554_s0 + $0x22c] ss:$12 sps:$4 sm:$0xff]  }
  0x2d   :  { %2271 = vmatpush3.bf16.msra.mxu1 %v2694_v2 }
  0x2e   :  { %2272 = vmatprep.subr.bf16.mxu1 %v2700_v3 }
  0x31   :  { %2273 = vmatpush3.bf16.msra.mxu1 %v2713_v5 }
  0x32   :  { %2274 = vmatprep.subr.bf16.mxu1 %v2722_v7 }
  0x33   :  { %392 = vmatmul.mubr.bf16.gmra.mrb[8].mxu0 %v2553_v34  ;;  %771 = vmatmul.mubr.bf16.gmra.mrb[20].mxu1 %v2554_v35  ;;  %v2637_v34 = vld [vmem:[%s3554_s0 + $0x274] ss:$12 sps:$4 sm:$0xff]  }
  0x34   :  { %399 = vmatprep.mubr.bf16.mxu0 %v2555_v36  ;;  %778 = vmatprep.mubr.bf16.mxu1 %v2557_v37  ;;  %v2639_v35 = vld [vmem:[%s3554_s0 + $0x248] ss:$12 sps:$4 sm:$0xff]   ;;  %v2640_v36 = vld [vmem:[%s3554_s0 + $0x270] ss:$12 sps:$4 sm:$0xff]   ;;  %v2641_v37 = vld [vmem:[%s3554_s0 + $0x260] ss:$12 sps:$4 sm:$0xff]  }
  0x35   :  { %2275 = vmatpush3.bf16.msra.mxu1 %v2734_v9 }
  0x36   :  { %2276 = vmatprep.subr.bf16.mxu1 %v2740_v10 }
  0x39   :  { %2277 = vmatpush3.bf16.msra.mxu1 %v2746_v11 }
  0x3a   :  { %2278 = vmatprep.subr.bf16.mxu1 %v2758_v13 }
  0x3b   :  { %400 = vmatmul.mubr.bf16.gmra.mrb[12].mxu0 %v2559_v38  ;;  %779 = vmatmul.mubr.bf16.gmra.mrb[24].mxu1 %v2560_v39  ;;  %v2642_v38 = vld [vmem:[%s3554_s0 + $0x28c] ss:$12 sps:$4 sm:$0xff]   ;;  %v2645_v39 = vld [vmem:[%s3554_s0 + $0x288] ss:$12 sps:$4 sm:$0xff]  }
  0x3c   :  { %407 = vmatprep.mubr.bf16.mxu0 %v2561_v40  ;;  %786 = vmatprep.mubr.bf16.mxu1 %v2563_v41  ;;  %v2647_v40 = vld [vmem:[%s3554_s0 + $0x2a4] ss:$12 sps:$4 sm:$0xff]   ;;  %v2649_v41 = vld [vmem:[%s3554_s0 + $0x2a8] ss:$12 sps:$4 sm:$0xff]  }
  0x3d   :  { %2279 = vmatpush3.bf16.msra.mxu1 %v2769_v15 }
  0x3e   :  { %2280 = vmatprep.subr.bf16.mxu1 %v2776_v16 }
  0x41   :  { %2281 = vmatpush3.bf16.msra.mxu1 %v2787_v18 }
  0x42   :  { %2282 = vmatprep.subr.bf16.mxu1 %v2794_v19 }
  0x43   :  { %408 = vmatmul.mubr.bf16.gmra.mrb[16].mxu0 %v2565_v42  ;;  %787 = vmatmul.mubr.bf16.gmra.mrb[28].mxu1 %v2566_v43  ;;  %v2650_v42 = vld [vmem:[%s3554_s0 + $0x2a0] ss:$12 sps:$4 sm:$0xff]  }
  0x44   :  { %415 = vmatprep.mubr.bf16.mxu0 %v2567_v44  ;;  %794 = vmatprep.mubr.bf16.mxu1 %v2569_v45  ;;  %v2651_v43 = vld [vmem:[%s3554_s0 + $0x2c0] ss:$12 sps:$4 sm:$0xff]   ;;  %v2652_v44 = vld [vmem:[%s3554_s0 + $0x2bc] ss:$12 sps:$4 sm:$0xff]   ;;  %v2654_v45 = vld [vmem:[%s3554_s0 + $0x2d8] ss:$12 sps:$4 sm:$0xff]  }
  0x45   :  { %2283 = vmatpush3.bf16.msra.mxu1 %v2803_v21 }
  0x46   :  { %2284 = vmatprep.subr.bf16.mxu1 %v2810_v22 }
  0x49   :  { %2285 = vmatpush3.bf16.msra.mxu1 %v2826_v25 }
  0x4a   :  { %2498 = vmatprep.subr.bf16.mxu1 %v2683_v0 }
  0x4b   :  { %416 = vmatmul.mubr.bf16.gmra.mrb[20].mxu0 %v2571_v46  ;;  %795 = vmatmul.mubr.bf16.gmra.mrb[32].mxu1 %v2572_v47  ;;  %v2655_v46 = vld [vmem:[%s3554_s0 + $0x2b8] ss:$12 sps:$4 sm:$0xff]   ;;  %v2656_v47 = vld [vmem:[%s3554_s0 + $0x2f0] ss:$12 sps:$4 sm:$0xff]  }
  0x4c   :  { %423 = vmatprep.mubr.bf16.mxu0 %v2573_v48  ;;  %802 = vmatprep.mubr.bf16.mxu1 %v2575_v49  ;;  %v2657_v48 = vld [vmem:[%s3554_s0 + $0x2d4] ss:$12 sps:$4 sm:$0xff]   ;;  %v2659_v49 = vld [vmem:[%s3554_s0 + $0x2d0] ss:$12 sps:$4 sm:$0xff]  }
  0x53   :  { %424 = vmatmul.mubr.bf16.gmra.mrb[24].mxu0 %v2577_v50  ;;  %803 = vmatmul.mubr.bf16.gmra.mrb[36].mxu1 %v2578_v51 }
  0x54   :  { %431 = vmatprep.mubr.bf16.mxu0 %v2579_v52  ;;  %810 = vmatprep.mubr.bf16.mxu1 %v2581_v53 }
  0x5b   :  { %432 = vmatmul.mubr.bf16.gmra.mrb[28].mxu0 %v2583_v54  ;;  %811 = vmatmul.mubr.bf16.gmra.mrb[40].mxu1 %v2584_v55 }
  0x5c   :  { %818 = vmatprep.mubr.bf16.mxu1 %v2585_v56  ;;  %2442 = vmatprep.mubr.msk.bf16.mxu0 %vm318_vm0, %v2587_v57 }
  0x63   :  { %819 = vmatmul.mubr.bf16.gmra.mrb[44].mxu1 %v2588_v58  ;;  %2443 = vmatmul.mubr.msk.bf16.vlgmr.msra.gmra.mrb[32].mxu0 %vm318_vm0, %v2589_v59 }
  0x64   :  { %2459 = vmatpush3.bf16.msra.mxu0 %v2688_v1  ;;  %2446 = vmatprep.mubr.msk.bf16.mxu0 %vm318_vm0, %v2590_v60 }
  0x65   :  { %1165 = vmatprep.mubr.bf16.mxu1 %v2593_v61  ;;  %2460 = vmatprep.subr.bf16.mxu0 %v2707_v4 }
  0x68   :  { %2461 = vmatpush3.bf16.msra.mxu0 %v2707_v4 }
  0x69   :  { %2344 = vmatprep.subr.bf16.mxu0 %v2683_v0  ;;  %v2600_v0 = vld [vmem:[%s3554_s0 + $0x158] ss:$12 sps:$4 sm:$0xff]  }
  0x6b   :  { %2447 = vmatmul.mubr.msk.bf16.gmra.mrb[36].mxu0 %vm318_vm0, %v2594_v63  ;;  %1166 = vmatmul.mubr.bf16.vlgmr.msra.gmra.mrb[48].mxu1 %v2591_v62 }
  0x6c   :  { %2450 = vmatprep.mubr.msk.bf16.mxu0 %vm318_vm0, %v2595_v6  ;;  %1173 = vmatprep.mubr.bf16.mxu1 %v2596_v8  ;;  %v3203_v6 = vld [vmem:[%s3555_s2] ss:$0 sm:$0xff] }
  0x6d   :  { %2506 = vmatpush3.bf16.msra.mxu1 %v2694_v2 }
  0x6e   :  { %2499 = vmatprep.subr.bf16.mxu1 %v2700_v3 }
  0x71   :  { %2507 = vmatpush3.bf16.msra.mxu1 %v2713_v5 }
  0x72   :  { %2500 = vmatprep.subr.bf16.mxu1 %v2722_v7 }
  0x73   :  { %2451 = vmatmul.mubr.msk.bf16.gmra.mrb[40].mxu0 %vm318_vm0, %v2598_v12  ;;  %1174 = vmatmul.mubr.bf16.gmra.mrb[52].mxu1 %v2599_v14 }
  0x74   :  { %2454 = vmatprep.mubr.msk.bf16.mxu0 %vm318_vm0, %v2600_v0  ;;  %1181 = vmatprep.mubr.bf16.mxu1 %v2601_v17 }
  0x75   :  { %2508 = vmatpush3.bf16.msra.mxu1 %v2734_v9 }
  0x76   :  { %2501 = vmatprep.subr.bf16.mxu1 %v2740_v10 }
  0x79   :  { %2509 = vmatpush3.bf16.msra.mxu1 %v2746_v11 }
  0x7a   :  { %2502 = vmatprep.subr.bf16.mxu1 %v2758_v13 }
  0x7b   :  { %2455 = vmatmul.mubr.msk.bf16.gmra.mrb[44].mxu0 %vm318_vm0, %v2603_v20  ;;  %1182 = vmatmul.mubr.bf16.gmra.mrb[56].mxu1 %v2604_v23 }
  0x7c   :  { %1189 = vmatprep.mubr.bf16.mxu1 %v2605_v24  ;;  %2462 = vmatprep.mubr.msk.bf16.mxu0 %vm318_vm0, %v2607_v26 }
  0x7d   :  { %2510 = vmatpush3.bf16.msra.mxu1 %v2769_v15 }
  0x7e   :  { %2503 = vmatprep.subr.bf16.mxu1 %v2776_v16 }
  0x81   :  { %2511 = vmatpush3.bf16.msra.mxu1 %v2787_v18 }
  0x82   :  { %2504 = vmatprep.subr.bf16.mxu1 %v2794_v19 }
  0x83   :  { %1190 = vmatmul.mubr.bf16.gmra.mrb[60].mxu1 %v2608_v27  ;;  %2463 = vmatmul.mubr.msk.bf16.vlgmr.msra.gmra.mrb[48].mxu0 %vm318_vm0, %v2609_v28 }
  0x84   :  { %2345 = vmatpush3.bf16.msra.mxu0 %v2694_v2  ;;  %1197 = vmatprep.mubr.bf16.mxu1 %v2610_v29  ;;  %v2615_v2 = vld [vmem:[%s3554_s0 + $0x1fc] ss:$12 sps:$4 sm:$0xff]  }
  0x85   :  { %2346 = vmatprep.subr.bf16.mxu0 %v2700_v3  ;;  %2466 = vmatprep.mubr.msk.bf16.mxu0 %vm318_vm0, %v2612_v30  ;;  %v2617_v3 = vld [vmem:[%s3554_s0 + $0x1e8] ss:$12 sps:$4 sm:$0xff]  }
  0x86   :  { %2512 = vmatpush3.bf16.msra.mxu1 %v2803_v21 }
  0x87   :  { %2505 = vmatprep.subr.bf16.mxu1 %v2810_v22 }
  0x88   :  { %2347 = vmatpush3.bf16.msra.mxu0 %v2713_v5  ;;  %v2618_v5 = vld [vmem:[%s3554_s0 + $0x1f8] ss:$12 sps:$4 sm:$0xff]  }
  0x89   :  { %2348 = vmatprep.subr.bf16.mxu0 %v2722_v7  ;;  %v2619_v7 = vld [vmem:[%s3554_s0 + $0x200] ss:$12 sps:$4 sm:$0xff]  }
  0x8a   :  { %2513 = vmatpush3.bf16.msra.mxu1 %v2826_v25 }
  0x8b   :  { %1198 = vmatmul.mubr.bf16.gmra.mrb[64].mxu1 %v2613_v31  ;;  %2467 = vmatmul.mubr.msk.bf16.gmra.mrb[52].mxu0 %vm318_vm0, %v2614_v32 }
  0x8c   :  { %2349 = vmatpush3.bf16.msra.mxu0 %v2734_v9  ;;  %1205 = vmatprep.mubr.bf16.mxu1 %v2615_v2  ;;  %v2620_v9 = vld [vmem:[%s3554_s0 + $0x214] ss:$12 sps:$4 sm:$0xff]  }
  0x8d   :  { %2350 = vmatprep.subr.bf16.mxu0 %v2740_v10  ;;  %2470 = vmatprep.mubr.msk.bf16.mxu0 %vm318_vm0, %v2617_v3  ;;  %v2622_v10 = vld [vmem:[%s3554_s0 + $0x218] ss:$12 sps:$4 sm:$0xff]  }
  0x8e   :  { %2478 = vmatprep.subr.bf16.mxu1 %v2688_v1 }
  0x90   :  { %2351 = vmatpush3.bf16.msra.mxu0 %v2746_v11  ;;  %v2623_v11 = vld [vmem:[%s3554_s0 + $0x210] ss:$12 sps:$4 sm:$0xff]  }
  0x91   :  { %2352 = vmatprep.subr.bf16.mxu0 %v2758_v13  ;;  %v2624_v13 = vld [vmem:[%s3554_s0 + $0x230] ss:$12 sps:$4 sm:$0xff]  }
  0x93   :  { %1206 = vmatmul.mubr.bf16.gmra.mrb[68].mxu1 %v2618_v5  ;;  %2471 = vmatmul.mubr.msk.bf16.gmra.mrb[56].mxu0 %vm318_vm0, %v2619_v7 }
  0x94   :  { %2353 = vmatpush3.bf16.msra.mxu0 %v2769_v15  ;;  %1213 = vmatprep.mubr.bf16.mxu1 %v2620_v9  ;;  %v2629_v15 = vld [vmem:[%s3554_s0 + $0x244] ss:$12 sps:$4 sm:$0xff]  }
  0x95   :  { %2354 = vmatprep.subr.bf16.mxu0 %v2776_v16  ;;  %2474 = vmatprep.mubr.msk.bf16.mxu0 %vm318_vm0, %v2622_v10  ;;  %v2627_v16 = vld [vmem:[%s3554_s0 + $0x240] ss:$12 sps:$4 sm:$0xff]  }
  0x98   :  { %2355 = vmatpush3.bf16.msra.mxu0 %v2787_v18  ;;  %v2630_v18 = vld [vmem:[%s3554_s0 + $0x228] ss:$12 sps:$4 sm:$0xff]  }
  0x99   :  { %2356 = vmatprep.subr.bf16.mxu0 %v2794_v19  ;;  %v2631_v19 = vld [vmem:[%s3554_s0 + $0x25c] ss:$12 sps:$4 sm:$0xff]  }
  0x9b   :  { %1214 = vmatmul.mubr.bf16.gmra.mrb[72].mxu1 %v2623_v11  ;;  %2475 = vmatmul.mubr.msk.bf16.gmra.mrb[60].mxu0 %vm318_vm0, %v2624_v13 }
  0x9c   :  { %2357 = vmatpush3.bf16.msra.mxu0 %v2803_v21  ;;  %1221 = vmatprep.mubr.bf16.mxu1 %v2625_v33  ;;  %v2635_v21 = vld [vmem:[%s3554_s0 + $0x2ec] ss:$12 sps:$4 sm:$0xff]  }
  0x9d   :  { %2358 = vmatprep.subr.bf16.mxu0 %v2810_v22  ;;  %1568 = vmatprep.mubr.bf16.mxu0 %v2629_v15  ;;  %v2633_v22 = vld [vmem:[%s3554_s0 + $0x2e8] ss:$12 sps:$4 sm:$0xff]  }
  0xa0   :  { %2359 = vmatpush3.bf16.msra.mxu0 %v2826_v25  ;;  %v2636_v25 = vld [vmem:[%s3554_s0 + $0x258] ss:$12 sps:$4 sm:$0xff]  }
  0xa3   :  { %1222 = vmatmul.mubr.bf16.gmra.mrb[76].mxu1 %v2630_v18  ;;  %1569 = vmatmul.mubr.bf16.vlgmr.msra.gmra.mrb[64].mxu0 %v2627_v16 }
  0xa4   :  { %1576 = vmatprep.mubr.bf16.mxu0 %v2631_v19  ;;  %1624 = vmatprep.mubr.bf16.mxu1 %v2635_v21 }
  0xab   :  { %1577 = vmatmul.mubr.bf16.gmra.mrb[68].mxu0 %v2636_v25  ;;  %1625 = vmatmul.mubr.bf16.vlgmr.msra.gmra.mrb[80].mxu1 %v2633_v22 }
  0xac   :  { %2479 = vmatpush3.bf16.msra.mxu1 %v2688_v1  ;;  %1584 = vmatprep.mubr.bf16.mxu0 %v2637_v34  ;;  %v2644_v1 = vld [vmem:[%s3554_s0 + $0x278] ss:$12 sps:$4 sm:$0xff]  }
  0xad   :  { %2480 = vmatprep.subr.bf16.mxu1 %v2707_v4  ;;  %2482 = vmatprep.mubr.msk.bf16.mxu1 %vm318_vm0, %v2639_v35 }
  0xb0   :  { %2481 = vmatpush3.bf16.msra.mxu1 %v2707_v4  ;;  %v2646_v4 = vld [vmem:[%s3554_s0 + $0x290] ss:$12 sps:$4 sm:$0xff]  }
  0xb3   :  { %1585 = vmatmul.mubr.bf16.gmra.mrb[72].mxu0 %v2640_v36  ;;  %2483 = vmatmul.mubr.msk.bf16.vlgmr.msra.gmra.mrb[84].mxu1 %vm318_vm0, %v2641_v37 }
  0xb4   :  { %1592 = vmatprep.mubr.bf16.mxu0 %v2642_v38  ;;  %2486 = vmatprep.mubr.msk.bf16.mxu1 %vm318_vm0, %v2644_v1 }
  0xbb   :  { %1593 = vmatmul.mubr.bf16.gmra.mrb[76].mxu0 %v2645_v39  ;;  %2487 = vmatmul.mubr.msk.bf16.gmra.mrb[88].mxu1 %vm318_vm0, %v2646_v4 }
  0xbc   :  { %1600 = vmatprep.mubr.bf16.mxu0 %v2647_v40  ;;  %2490 = vmatprep.mubr.msk.bf16.mxu1 %vm318_vm0, %v2649_v41 }
  0xc3   :  { %1601 = vmatmul.mubr.bf16.gmra.mrb[80].mxu0 %v2650_v42  ;;  %2491 = vmatmul.mubr.msk.bf16.gmra.mrb[92].mxu1 %vm318_vm0, %v2651_v43 }
  0xc4   :  { %1608 = vmatprep.mubr.bf16.mxu0 %v2652_v44  ;;  %2494 = vmatprep.mubr.msk.bf16.mxu1 %vm318_vm0, %v2654_v45 }
  0xcb   :  { %1609 = vmatmul.mubr.bf16.gmra.mrb[84].mxu0 %v2655_v46  ;;  %2495 = vmatmul.mubr.msk.bf16.gmra.mrb[96].mxu1 %vm318_vm0, %v2656_v47 }
  0xcc   :  { %1616 = vmatprep.mubr.bf16.mxu0 %v2657_v48 }
  0xd3   :  { %1617 = vmatmul.mubr.bf16.gmra.mrb[88].mxu0 %v2659_v49 }
  0xde   :  { %v2424_v50 = vpop.f32.mrb[0].mxu1 }
  0xdf   :  { %v474_v51 = vpop.f32.mrb[1].mxu1 }
  0xe0   :  { %v2425_v52 = vpop.f32.mrb[2].mxu1 }
  0xe1   :  { %v477_v53 = vpop.f32.mrb[3].mxu1 }
  0xe6   :  { %v3186_v54 = vpop.f32.mrb[4].mxu1 }
  0xe7   :  { %v490_v55 = vpop.f32.mrb[5].mxu1 }
  0xe8   :  { %v3188_v56 = vpop.f32.mrb[6].mxu1 }
  0xe9   :  { %v493_v57 = vpop.f32.mrb[7].mxu1 }
  0xee   :  { %v3190_v58 = vpop.f32.mrb[8].mxu1 }
  0xef   :  { %v3192_v59 = vpop.f32.mrb[9].mxu1 }
  0xf0   :  { %v3194_v60 = vpop.f32.mrb[10].mxu1 }
  0xf1   :  { %v3196_v61 = vpop.f32.mrb[11].mxu1 }
  0xf6   :  { %v2138_v62 = vpop.f32.mrb[0].mxu0  ;;  %v3198_v63 = vpop.f32.mrb[12].mxu1 }
  0xf7   :  { %v2139_v8 = vpop.f32.mrb[1].mxu0  ;;  %v3205_v12 = vpop.f32.mrb[13].mxu1 }
  0xf8   :  { %v2140_v14 = vadd.f32 %v2139_v8, %v2138_v62  ;;  %v2141_v0 = vpop.f32.mrb[2].mxu0  ;;  %v3207_v17 = vpop.f32.mrb[14].mxu1 }
  0xf9   :  { %v2142_v20 = vpop.f32.mrb[3].mxu0  ;;  %v3209_v23 = vpop.f32.mrb[15].mxu1 }
  0xfa   :  { %v378_v24 = vadd.f32 %v2140_v14, %v3203_v6  ;;  %v2143_v26 = vadd.f32 %v2142_v20, %v2141_v0 }
  0xfc   :  { %v3212_v27 = vadd.f32 %v474_v51, %v378_v24  ;;  %v381_v28 = vadd.f32 %v2143_v26, %v3203_v6 }
  0xfe   :  { %v3215_v29 = vadd.f32 %v477_v53, %v381_v28  ;;  %v2144_v30 = vpop.f32.mrb[4].mxu0  ;;  %v2212_v31 = vpop.f32.mrb[16].mxu1 }
  0xff   :  { %v2145_v32 = vpop.f32.mrb[5].mxu0  ;;  %v2213_v2 = vpop.f32.mrb[17].mxu1 }
 0x100   :  { %v2146_v3 = vadd.f32 %v2145_v32, %v2144_v30  ;;  %v2147_v5 = vpop.f32.mrb[6].mxu0  ;;  %v3217_v7 = vadd.f32 %v2213_v2, %v2212_v31  ;;  %v2215_v9 = vpop.f32.mrb[18].mxu1 }
 0x101   :  { %v2148_v10 = vpop.f32.mrb[7].mxu0  ;;  %v2216_v11 = vpop.f32.mrb[19].mxu1 }
 0x102   :  { %v386_v13 = vadd.f32 %v2146_v3, %v3203_v6  ;;  %v2149_v33 = vadd.f32 %v2148_v10, %v2147_v5  ;;  %v3220_v15 = vadd.f32 %v2216_v11, %v2215_v9 }
 0x104   :  { %v3222_v16 = vadd.f32 %v2424_v50, %v386_v13  ;;  %v389_v18 = vadd.f32 %v2149_v33, %v3203_v6 }
 0x106   :  { %v3225_v19 = vadd.f32 %v2425_v52, %v389_v18  ;;  %v2150_v21 = vpop.f32.mrb[8].mxu0  ;;  %v2218_v22 = vpop.f32.mrb[20].mxu1 }
 0x107   :  { %v2151_v25 = vpop.f32.mrb[9].mxu0  ;;  %v2219_v34 = vpop.f32.mrb[21].mxu1 }
 0x108   :  { %v2152_v35 = vadd.f32 %v2151_v25, %v2150_v21  ;;  %v2153_v36 = vpop.f32.mrb[10].mxu0  ;;  %v3227_v37 = vadd.f32 %v2219_v34, %v2218_v22  ;;  %v2221_v38 = vpop.f32.mrb[22].mxu1 }
 0x109   :  { %v2154_v1 = vpop.f32.mrb[11].mxu0  ;;  %v2222_v39 = vpop.f32.mrb[23].mxu1 }
 0x10a   :  { %v394_v4 = vadd.f32 %v2152_v35, %v3203_v6  ;;  %v2155_v40 = vadd.f32 %v2154_v1, %v2153_v36  ;;  %v3230_v41 = vadd.f32 %v2222_v39, %v2221_v38 }
 0x10c   :  { %v3232_v42 = vadd.f32 %v490_v55, %v394_v4  ;;  %v397_v43 = vadd.f32 %v2155_v40, %v3203_v6 }
 0x10e   :  { %v3235_v44 = vadd.f32 %v493_v57, %v397_v43  ;;  %v2156_v45 = vpop.f32.mrb[12].mxu0  ;;  %v2224_v46 = vpop.f32.mrb[24].mxu1 }
 0x10f   :  { %v2157_v47 = vpop.f32.mrb[13].mxu0  ;;  %v2225_v48 = vpop.f32.mrb[25].mxu1 }
 0x110   :  { %v2158_v49 = vadd.f32 %v2157_v47, %v2156_v45  ;;  %v2159_v50 = vpop.f32.mrb[14].mxu0  ;;  %v3237_v51 = vadd.f32 %v2225_v48, %v2224_v46  ;;  %v2227_v52 = vpop.f32.mrb[26].mxu1 }
 0x111   :  { %v2160_v53 = vpop.f32.mrb[15].mxu0  ;;  %v2228_v62 = vpop.f32.mrb[27].mxu1 }
 0x112   :  { %v402_v8 = vadd.f32 %v2158_v49, %v3203_v6  ;;  %v2161_v14 = vadd.f32 %v2160_v53, %v2159_v50  ;;  %v3240_v55 = vadd.f32 %v2228_v62, %v2227_v52 }
 0x114   :  { %v3243_v0 = vadd.f32 %v3186_v54, %v402_v8  ;;  %v405_v57 = vadd.f32 %v2161_v14, %v3203_v6 }
 0x116   :  { %v3247_v20 = vadd.f32 %v3188_v56, %v405_v57  ;;  %v2162_v24 = vpop.f32.mrb[16].mxu0  ;;  %v2230_v26 = vpop.f32.mrb[28].mxu1 }
 0x117   :  { %v2163_v28 = vpop.f32.mrb[17].mxu0  ;;  %v2231_v30 = vpop.f32.mrb[29].mxu1 }
 0x118   :  { %v2164_v31 = vadd.f32 %v2163_v28, %v2162_v24  ;;  %v2165_v32 = vpop.f32.mrb[18].mxu0  ;;  %v3249_v2 = vadd.f32 %v2231_v30, %v2230_v26  ;;  %v2233_v3 = vpop.f32.mrb[30].mxu1 }
 0x119   :  { %v2166_v5 = vpop.f32.mrb[19].mxu0  ;;  %v2234_v9 = vpop.f32.mrb[31].mxu1 }
 0x11a   :  { %v410_v10 = vadd.f32 %v2164_v31, %v3203_v6  ;;  %v2167_v54 = vadd.f32 %v2166_v5, %v2165_v32  ;;  %v3252_v11 = vadd.f32 %v2234_v9, %v2233_v3 }
 0x11c   :  { %v3255_v13 = vadd.f32 %v3192_v59, %v410_v10  ;;  %v413_v56 = vadd.f32 %v2167_v54, %v3203_v6 }
 0x11e   :  { %v3259_v33 = vadd.f32 %v3196_v61, %v413_v56  ;;  %v2168_v18 = vpop.f32.mrb[20].mxu0  ;;  %v2236_v21 = vpop.f32.mrb[32].mxu1 }
 0x11f   :  { %v2169_v22 = vpop.f32.mrb[21].mxu0  ;;  %v2237_v25 = vpop.f32.mrb[33].mxu1 }
 0x120   :  { %v2170_v34 = vadd.f32 %v2169_v22, %v2168_v18  ;;  %v2171_v35 = vpop.f32.mrb[22].mxu0  ;;  %v3261_v36 = vadd.f32 %v2237_v25, %v2236_v21  ;;  %v2239_v38 = vpop.f32.mrb[34].mxu1 }
 0x121   :  { %v2172_v1 = vpop.f32.mrb[23].mxu0  ;;  %v2240_v39 = vpop.f32.mrb[35].mxu1 }
 0x122   :  { %v418_v4 = vadd.f32 %v2170_v34, %v3203_v6  ;;  %v2173_v59 = vadd.f32 %v2172_v1, %v2171_v35  ;;  %v3264_v40 = vadd.f32 %v2240_v39, %v2239_v38  ;;  %v773_v34 = vadd.f32 %v3227_v37, %v3203_v6 }
 0x123   :  { %v765_v1 = vadd.f32 %v3217_v7, %v3203_v6 }
 0x124   :  { %v3267_v43 = vadd.f32 %v3190_v58, %v418_v4  ;;  %v421_v61 = vadd.f32 %v2173_v59, %v3203_v6 }
 0x126   :  { %v3271_v45 = vadd.f32 %v3194_v60, %v421_v61  ;;  %v2174_v46 = vpop.f32.mrb[24].mxu0  ;;  %v2242_v47 = vpop.f32.mrb[36].mxu1  ;;  %v776_v61 = vadd.f32 %v3230_v41, %v3203_v6 }
 0x127   :  { %v2175_v48 = vpop.f32.mrb[25].mxu0  ;;  %v2243_v49 = vpop.f32.mrb[37].mxu1 }
 0x128   :  { %v2176_v50 = vadd.f32 %v2175_v48, %v2174_v46  ;;  %v2177_v52 = vpop.f32.mrb[26].mxu0  ;;  %v3273_v53 = vadd.f32 %v2243_v49, %v2242_v47  ;;  %v2245_v62 = vpop.f32.mrb[38].mxu1  ;;  %v768_v48 = vadd.f32 %v3220_v15, %v3203_v6  ;;  %v539_v49 = vmax.f32 %v3222_v16, 0.0 }
 0x129   :  { %v2178_v8 = vpop.f32.mrb[27].mxu0  ;;  %v2246_v14 = vpop.f32.mrb[39].mxu1 }
 0x12a   :  { %v426_v57 = vadd.f32 %v2176_v50, %v3203_v6  ;;  %v2179_v58 = vadd.f32 %v2178_v8, %v2177_v52  ;;  %v3276_v24 = vadd.f32 %v2246_v14, %v2245_v62  ;;  %v537_v8 = vmax.f32 %v3212_v27, 0.0 }
 0x12c   :  { %v3279_v26 = vadd.f32 %v3205_v12, %v426_v57  ;;  %v429_v60 = vadd.f32 %v2179_v58, %v3203_v6 }
 0x12e   :  { %v3283_v28 = vadd.f32 %v3209_v23, %v429_v60  ;;  %v2180_v30 = vpop.f32.mrb[28].mxu0  ;;  %v2248_v31 = vpop.f32.mrb[40].mxu1  ;;  %v540_v60 = vmax.f32 %v3225_v19, 0.0 }
 0x12f   :  { %v2181_v32 = vpop.f32.mrb[29].mxu0  ;;  %v2249_v3 = vpop.f32.mrb[41].mxu1 }
 0x130   :  { %v2182_v5 = vadd.f32 %v2181_v32, %v2180_v30  ;;  %v2183_v9 = vpop.f32.mrb[30].mxu0  ;;  %v3285_v10 = vadd.f32 %v2249_v3, %v2248_v31  ;;  %v2251_v54 = vpop.f32.mrb[42].mxu1  ;;  %v538_v31 = vmax.f32 %v3215_v29, 0.0  ;;  %v789_v3 = vadd.f32 %v3249_v2, %v3203_v6 }
 0x131   :  { %v2184_v56 = vpop.f32.mrb[31].mxu0  ;;  %v2252_v18 = vpop.f32.mrb[43].mxu1 }
 0x132   :  { %v434_v21 = vadd.f32 %v2182_v5, %v3203_v6  ;;  %v2185_v12 = vadd.f32 %v2184_v56, %v2183_v9  ;;  %v3288_v22 = vadd.f32 %v2252_v18, %v2251_v54  ;;  %v781_v9 = vadd.f32 %v3237_v51, %v3203_v6 }
 0x133   :  { %v792_v18 = vadd.f32 %v3252_v11, %v3203_v6 }
 0x134   :  { %v3291_v25 = vadd.f32 %v3198_v63, %v434_v21  ;;  %v437_v23 = vadd.f32 %v2185_v12, %v3203_v6 }
 0x136   :  { %v3297_v35 = vadd.f32 %v3207_v17, %v437_v23  ;;  %v2444_v38 = vpop.f32.mrb[32].mxu0  ;;  %v2254_v39 = vpop.f32.mrb[44].mxu1  ;;  %v784_v23 = vadd.f32 %v3240_v55, %v3203_v6 }
 0x137   :  { %v870_v4 = vadd.f32 %v2444_v38, %v773_v34  ;;  %v861_v59 = vpop.f32.mrb[33].mxu0  ;;  %v2255_v63 = vpop.f32.mrb[45].mxu1  ;;  %v543_v38 = vmax.f32 %v3243_v0, 0.0 }
 0x138   :  { %v862_v46 = vadd.f32 %v861_v59, %v765_v1  ;;  %v2445_v47 = vpop.f32.mrb[34].mxu0  ;;  %v3305_v37 = vadd.f32 %v2255_v63, %v2254_v39  ;;  %v2257_v17 = vpop.f32.mrb[46].mxu1  ;;  %v541_v59 = vmax.f32 %v3232_v42, 0.0 }
 0x139   :  { %v926_v50 = vmax.f32 %v870_v4, 0.0  ;;  %v873_v52 = vadd.f32 %v2445_v47, %v776_v61  ;;  %v864_v7 = vpop.f32.mrb[35].mxu0  ;;  %v2258_v62 = vpop.f32.mrb[47].mxu1  ;;  %v544_v47 = vmax.f32 %v3247_v20, 0.0 }
 0x13a   :  { %v924_v14 = vmax.f32 %v862_v46, 0.0  ;;  %v865_v57 = vadd.f32 %v864_v7, %v768_v48  ;;  %v3309_v41 = vadd.f32 %v2258_v62, %v2257_v17  ;;  %v542_v17 = vmax.f32 %v3235_v44, 0.0 }
 0x13b   :  { %v3311_v58 = vmax.f32 %v539_v49, %v926_v50  ;;  %v927_v15 = vmax.f32 %v873_v52, 0.0  ;;  %v805_v50 = vadd.f32 %v3273_v53, %v3203_v6  ;;  %v797_v7 = vadd.f32 %v3261_v36, %v3203_v6 }
 0x13c   :  { %v3314_v30 = vmax.f32 %v537_v8, %v924_v14  ;;  %v925_v16 = vmax.f32 %v865_v57, 0.0  ;;  %v808_v14 = vadd.f32 %v3276_v24, %v3203_v6 }
 0x13d   :  { %v3317_v32 = vmax.f32 %v540_v60, %v927_v15  ;;  %v800_v15 = vadd.f32 %v3264_v40, %v3203_v6  ;;  %v546_v40 = vmax.f32 %v3259_v33, 0.0 }
 0x13e   :  { %v3321_v27 = vmax.f32 %v538_v31, %v925_v16  ;;  %v2448_v5 = vpop.f32.mrb[36].mxu0  ;;  %v2286_v54 = vpop.f32.mrb[48].mxu1  ;;  %v547_v16 = vmax.f32 %v3267_v43, 0.0 }
 0x13f   :  { %v886_v56 = vadd.f32 %v2448_v5, %v789_v3  ;;  %v877_v19 = vpop.f32.mrb[37].mxu0  ;;  %v2287_v21 = vpop.f32.mrb[49].mxu1 }
 0x140   :  { %v878_v29 = vadd.f32 %v877_v19, %v781_v9  ;;  %v2449_v12 = vpop.f32.mrb[38].mxu0  ;;  %v3329_v34 = vadd.f32 %v2287_v21, %v2286_v54  ;;  %v2289_v2 = vpop.f32.mrb[50].mxu1  ;;  %v545_v54 = vmax.f32 %v3255_v13, 0.0  ;;  %v548_v21 = vmax.f32 %v3271_v45, 0.0 }
 0x141   :  { %v930_v1 = vmax.f32 %v886_v56, 0.0  ;;  %v889_v39 = vadd.f32 %v2449_v12, %v792_v18  ;;  %v880_v51 = vpop.f32.mrb[39].mxu0  ;;  %v2290_v4 = vpop.f32.mrb[51].mxu1 }
 0x142   :  { %v928_v61 = vmax.f32 %v878_v29, 0.0  ;;  %v881_v63 = vadd.f32 %v880_v51, %v784_v23  ;;  %v3333_v11 = vadd.f32 %v2290_v4, %v2289_v2  ;;  %v821_v2 = vadd.f32 %v3305_v37, %v3203_v6 }
 0x143   :  { %v3335_v46 = vmax.f32 %v543_v38, %v930_v1  ;;  %v931_v55 = vmax.f32 %v889_v39, 0.0  ;;  %v813_v1 = vadd.f32 %v3285_v10, %v3203_v6  ;;  %v824_v4 = vadd.f32 %v3309_v41, %v3203_v6 }
 0x144   :  { %v3338_v48 = vmax.f32 %v541_v59, %v928_v61  ;;  %v929_v0 = vmax.f32 %v881_v63, 0.0  ;;  %v816_v63 = vadd.f32 %v3288_v22, %v3203_v6 }
 0x145   :  { %v3341_v49 = vmax.f32 %v544_v47, %v931_v55  ;;  %v551_v55 = vmax.f32 %v3291_v25, 0.0  ;;  %v550_v25 = vmax.f32 %v3283_v28, 0.0  ;;  %v1171_v28 = vadd.f32 %v3333_v11, %v3203_v6 }
 0x146   :  { %v3345_v42 = vmax.f32 %v542_v17, %v929_v0  ;;  %v2452_v52 = vpop.f32.mrb[40].mxu0  ;;  %v2292_v62 = vpop.f32.mrb[52].mxu1 }
 0x147   :  { %v902_v8 = vadd.f32 %v2452_v52, %v805_v50  ;;  %v893_v20 = vpop.f32.mrb[41].mxu0  ;;  %v2293_v57 = vpop.f32.mrb[53].mxu1  ;;  %v549_v52 = vmax.f32 %v3279_v26, 0.0 }
 0x148   :  { %v894_v44 = vadd.f32 %v893_v20, %v797_v7  ;;  %v2453_v60 = vpop.f32.mrb[42].mxu0  ;;  %v2294_v31 = vadd.f32 %v2293_v57, %v2292_v62  ;;  %v2295_v53 = vpop.f32.mrb[54].mxu1  ;;  %v552_v20 = vmax.f32 %v3297_v35, 0.0 }
 0x149   :  { %v934_v3 = vmax.f32 %v902_v8, 0.0  ;;  %v905_v5 = vadd.f32 %v2453_v60, %v808_v14  ;;  %v896_v9 = vpop.f32.mrb[43].mxu0  ;;  %v2296_v36 = vpop.f32.mrb[55].mxu1 }
 0x14a   :  { %v932_v56 = vmax.f32 %v894_v44, 0.0  ;;  %v897_v19 = vadd.f32 %v896_v9, %v800_v15  ;;  %v2297_v18 = vadd.f32 %v2296_v36, %v2295_v53  ;;  %v1176_v22 = vadd.f32 %v2294_v31, %v3203_v6 }
 0x14b   :  { %v3355_v24 = vmax.f32 %v547_v16, %v934_v3  ;;  %v935_v29 = vmax.f32 %v905_v5, 0.0  ;;  %v1168_v53 = vadd.f32 %v3329_v34, %v3203_v6 }
 0x14c   :  { %v3358_v12 = vmax.f32 %v545_v54, %v932_v56  ;;  %v933_v23 = vmax.f32 %v897_v19, 0.0  ;;  %v1179_v35 = vadd.f32 %v2297_v18, %v3203_v6 }
 0x14d   :  { %v3361_v43 = vmax.f32 %v548_v21, %v935_v29 }
 0x14e   :  { %v3365_v38 = vmax.f32 %v546_v40, %v933_v23  ;;  %v2456_v13 = vpop.f32.mrb[44].mxu0  ;;  %v2298_v39 = vpop.f32.mrb[56].mxu1 }
 0x14f   :  { %v918_v51 = vadd.f32 %v2456_v13, %v821_v2  ;;  %v909_v45 = vpop.f32.mrb[45].mxu0  ;;  %v2299_v59 = vpop.f32.mrb[57].mxu1 }
 0x150   :  { %v910_v33 = vadd.f32 %v909_v45, %v813_v1  ;;  %v2457_v61 = vpop.f32.mrb[46].mxu0  ;;  %v2300_v47 = vadd.f32 %v2299_v59, %v2298_v39  ;;  %v2301_v37 = vpop.f32.mrb[58].mxu1 }
 0x151   :  { %v938_v17 = vmax.f32 %v918_v51, 0.0  ;;  %v921_v0 = vadd.f32 %v2457_v61, %v824_v4  ;;  %v912_v50 = vpop.f32.mrb[47].mxu0  ;;  %v2302_v10 = vpop.f32.mrb[59].mxu1 }
 0x152   :  { %v936_v7 = vmax.f32 %v910_v33, 0.0  ;;  %v913_v62 = vadd.f32 %v912_v50, %v816_v63  ;;  %v2303_v8 = vadd.f32 %v2302_v10, %v2301_v37  ;;  %v1184_v11 = vadd.f32 %v2300_v47, %v3203_v6 }
 0x153   :  { %v3375_v41 = vmax.f32 %v551_v55, %v938_v17  ;;  %v939_v14 = vmax.f32 %v921_v0, 0.0 }
 0x154   :  { %v3379_v57 = vmax.f32 %v549_v52, %v936_v7  ;;  %v937_v44 = vmax.f32 %v913_v62, 0.0 }
 0x155   :  { %v3382_v60 = vmax.f32 %v552_v20, %v939_v14 }
 0x156   :  { %v3384_v15 = vmax.f32 %v550_v25, %v937_v44  ;;  %v2464_v26 = vpop.f32.mrb[48].mxu0  ;;  %v2304_v16 = vpop.f32.mrb[60].mxu1 }
 0x157   :  { %v1273_v3 = vadd.f32 %v2464_v26, %v1176_v22  ;;  %v1264_v5 = vpop.f32.mrb[49].mxu0  ;;  %v2305_v9 = vpop.f32.mrb[61].mxu1 }
 0x158   :  { %v1265_v31 = vadd.f32 %v1264_v5, %v1168_v53  ;;  %v2465_v36 = vpop.f32.mrb[50].mxu0  ;;  %v2306_v54 = vadd.f32 %v2305_v9, %v2304_v16  ;;  %v2307_v56 = vpop.f32.mrb[62].mxu1 }
 0x159   :  { %v1329_v19 = vmax.f32 %v1273_v3, 0.0  ;;  %v1276_v21 = vadd.f32 %v2465_v36, %v1179_v35  ;;  %v1267_v29 = vpop.f32.mrb[51].mxu0  ;;  %v2308_v40 = vpop.f32.mrb[63].mxu1 }
 0x15a   :  { %v1327_v23 = vmax.f32 %v1265_v31, 0.0  ;;  %v1268_v2 = vadd.f32 %v1267_v29, %v1171_v28  ;;  %v2309_v34 = vadd.f32 %v2308_v40, %v2307_v56  ;;  %v1192_v18 = vadd.f32 %v2306_v54, %v3203_v6 }
 0x15b   :  { %v3392_v13 = vmax.f32 %v3311_v58, %v1329_v19  ;;  %v1330_v1 = vmax.f32 %v1276_v21, 0.0 }
 0x15c   :  { %v3396_v39 = vmax.f32 %v3314_v30, %v1327_v23  ;;  %v1328_v51 = vmax.f32 %v1268_v2, 0.0  ;;  %v1195_v4 = vadd.f32 %v2309_v34, %v3203_v6  ;;  %v1187_v30 = vadd.f32 %v2303_v8, %v3203_v6 }
 0x15d   :  { %v3400_v45 = vmax.f32 %v3317_v32, %v1330_v1 }
 0x15e   :  { %v3404_v59 = vmax.f32 %v3321_v27, %v1328_v51  ;;  %v2468_v33 = vpop.f32.mrb[52].mxu0  ;;  %v2310_v58 = vpop.f32.mrb[64].mxu1 }
 0x15f   :  { %v1289_v61 = vadd.f32 %v2468_v33, %v1192_v18  ;;  %v1280_v63 = vpop.f32.mrb[53].mxu0  ;;  %v2311_v37 = vpop.f32.mrb[65].mxu1 }
 0x160   :  { %v1281_v55 = vadd.f32 %v1280_v63, %v1184_v11  ;;  %v2469_v17 = vpop.f32.mrb[54].mxu0  ;;  %v2312_v0 = vadd.f32 %v2311_v37, %v2310_v58  ;;  %v2313_v50 = vpop.f32.mrb[66].mxu1 }
 0x161   :  { %v1333_v47 = vmax.f32 %v1289_v61, 0.0  ;;  %v1292_v10 = vadd.f32 %v2469_v17, %v1195_v4  ;;  %v1283_v32 = vpop.f32.mrb[55].mxu0  ;;  %v2314_v52 = vpop.f32.mrb[67].mxu1 }
 0x162   :  { %v1331_v7 = vmax.f32 %v1281_v55, 0.0  ;;  %v1284_v62 = vadd.f32 %v1283_v32, %v1187_v30  ;;  %v2315_v20 = vadd.f32 %v2314_v52, %v2313_v50  ;;  %v1200_v44 = vadd.f32 %v2312_v0, %v3203_v6 }
 0x163   :  { %v3408_v27 = vmax.f32 %v3335_v46, %v1333_v47  ;;  %v1334_v14 = vmax.f32 %v1292_v10, 0.0 }
 0x164   :  { %v3411_v22 = vmax.f32 %v3338_v48, %v1331_v7  ;;  %v1332_v25 = vmax.f32 %v1284_v62, 0.0  ;;  %v1203_v3 = vadd.f32 %v2315_v20, %v3203_v6 }
 0x165   :  { %v3415_v8 = vmax.f32 %v3341_v49, %v1334_v14 }
 0x166   :  { %v3418_v26 = vmax.f32 %v3345_v42, %v1332_v25  ;;  %v2316_v53 = vpop.f32.mrb[68].mxu1  ;;  %v2472_v16 = vpop.f32.mrb[56].mxu0 }
 0x167   :  { %v2317_v5 = vpop.f32.mrb[69].mxu1  ;;  %v1296_v46 = vpop.f32.mrb[57].mxu0 }
 0x168   :  { %v2318_v35 = vadd.f32 %v2317_v5, %v2316_v53  ;;  %v1297_v9 = vadd.f32 %v1296_v46, %v1200_v44  ;;  %v2319_v31 = vpop.f32.mrb[70].mxu1  ;;  %v2473_v48 = vpop.f32.mrb[58].mxu0 }
 0x169   :  { %v2320_v36 = vpop.f32.mrb[71].mxu1  ;;  %v1299_v28 = vpop.f32.mrb[59].mxu0 }
 0x16a   :  { %v1208_v54 = vadd.f32 %v2318_v35, %v3203_v6  ;;  %v1335_v56 = vmax.f32 %v1297_v9, 0.0  ;;  %v2321_v49 = vadd.f32 %v2320_v36, %v2319_v31  ;;  %v1300_v19 = vadd.f32 %v1299_v28, %v1203_v3 }
 0x16c   :  { %v1305_v21 = vadd.f32 %v2472_v16, %v1208_v54  ;;  %v3423_v42 = vmax.f32 %v3358_v12, %v1335_v56  ;;  %v1211_v29 = vadd.f32 %v2321_v49, %v3203_v6  ;;  %v1336_v40 = vmax.f32 %v1300_v19, 0.0 }
 0x16e   :  { %v1337_v23 = vmax.f32 %v1305_v21, 0.0  ;;  %v1308_v2 = vadd.f32 %v2473_v48, %v1211_v29  ;;  %v3427_v34 = vmax.f32 %v3365_v38, %v1336_v40  ;;  %v2322_v1 = vpop.f32.mrb[72].mxu1  ;;  %v2476_v18 = vpop.f32.mrb[60].mxu0 }
 0x16f   :  { %v2323_v51 = vpop.f32.mrb[73].mxu1  ;;  %v1312_v11 = vpop.f32.mrb[61].mxu0 }
 0x170   :  { %v3430_v4 = vmax.f32 %v3355_v24, %v1337_v23  ;;  %v1338_v33 = vmax.f32 %v1308_v2, 0.0  ;;  %v2324_v58 = vadd.f32 %v2323_v51, %v2322_v1  ;;  %v2325_v61 = vpop.f32.mrb[74].mxu1  ;;  %v2477_v12 = vpop.f32.mrb[62].mxu0 }
 0x171   :  { %v2326_v63 = vpop.f32.mrb[75].mxu1  ;;  %v1315_v37 = vpop.f32.mrb[63].mxu0 }
 0x172   :  { %v3433_v55 = vmax.f32 %v3361_v43, %v1338_v33  ;;  %v1216_v17 = vadd.f32 %v2324_v58, %v3203_v6  ;;  %v2327_v38 = vadd.f32 %v2326_v63, %v2325_v61 }
 0x174   :  { %v1313_v30 = vadd.f32 %v1312_v11, %v1216_v17  ;;  %v1219_v0 = vadd.f32 %v2327_v38, %v3203_v6 }
 0x176   :  { %v1339_v50 = vmax.f32 %v1313_v30, 0.0  ;;  %v1316_v47 = vadd.f32 %v1315_v37, %v1219_v0  ;;  %v2328_v10 = vpop.f32.mrb[76].mxu1  ;;  %v2360_v24 = vpop.f32.mrb[64].mxu0 }
 0x177   :  { %v2329_v32 = vpop.f32.mrb[77].mxu1  ;;  %v2361_v52 = vpop.f32.mrb[65].mxu0 }
 0x178   :  { %v3438_v7 = vmax.f32 %v3379_v57, %v1339_v50  ;;  %v1340_v62 = vmax.f32 %v1316_v47, 0.0  ;;  %v2330_v20 = vadd.f32 %v2329_v32, %v2328_v10  ;;  %v2362_v14 = vadd.f32 %v2361_v52, %v2360_v24  ;;  %v2331_v43 = vpop.f32.mrb[78].mxu1  ;;  %v2363_v25 = vpop.f32.mrb[66].mxu0 }
 0x179   :  { %v2332_v44 = vpop.f32.mrb[79].mxu1  ;;  %v2364_v53 = vpop.f32.mrb[67].mxu0 }
 0x17a   :  { %v3441_v16 = vmax.f32 %v3384_v15, %v1340_v62  ;;  %v1224_v3 = vadd.f32 %v2330_v20, %v3203_v6  ;;  %v2333_v5 = vadd.f32 %v2332_v44, %v2331_v43  ;;  %v2365_v46 = vadd.f32 %v2364_v53, %v2363_v25 }
 0x17b   :  { %v1571_v58 = vadd.f32 %v2362_v14, %v3203_v6 }
 0x17c   :  { %v1321_v35 = vadd.f32 %v2476_v18, %v1224_v3  ;;  %v1227_v9 = vadd.f32 %v2333_v5, %v3203_v6  ;;  %v1574_v0 = vadd.f32 %v2365_v46, %v3203_v6 }
 0x17e   :  { %v1341_v31 = vmax.f32 %v1321_v35, 0.0  ;;  %v1324_v57 = vadd.f32 %v2477_v12, %v1227_v9  ;;  %v2366_v48 = vpop.f32.mrb[68].mxu0  ;;  %v2402_v36 = vpop.f32.mrb[80].mxu1 }
 0x17f   :  { %v2367_v28 = vpop.f32.mrb[69].mxu0  ;;  %v2403_v54 = vpop.f32.mrb[81].mxu1 }
 0x180   :  { %v1342_v56 = vmax.f32 %v1324_v57, 0.0  ;;  %v2368_v49 = vadd.f32 %v2367_v28, %v2366_v48  ;;  %v2369_v19 = vpop.f32.mrb[70].mxu0  ;;  %v3445_v21 = vadd.f32 %v2403_v54, %v2402_v36  ;;  %v2405_v15 = vpop.f32.mrb[82].mxu1  ;;  %v3448_v29 = vmax.f32 %v3375_v41, %v1341_v31 }
 0x181   :  { %v2370_v40 = vpop.f32.mrb[71].mxu0  ;;  %v2406_v23 = vpop.f32.mrb[83].mxu1 }
 0x182   :  { %v2371_v2 = vadd.f32 %v2370_v40, %v2369_v19  ;;  %v3450_v1 = vadd.f32 %v2406_v23, %v2405_v15  ;;  %v3453_v18 = vmax.f32 %v3382_v60, %v1342_v56  ;;  %v1579_v51 = vadd.f32 %v2368_v49, %v3203_v6 }
 0x184   :  { %v1582_v41 = vadd.f32 %v2371_v2, %v3203_v6 }
 0x186   :  { %v2372_v11 = vpop.f32.mrb[72].mxu0  ;;  %v2484_v33 = vpop.f32.mrb[84].mxu1 }
 0x187   :  { %v1676_v61 = vadd.f32 %v2484_v33, %v1579_v51  ;;  %v2373_v12 = vpop.f32.mrb[73].mxu0  ;;  %v1667_v63 = vpop.f32.mrb[85].mxu1 }
 0x188   :  { %v2374_v37 = vadd.f32 %v2373_v12, %v2372_v11  ;;  %v1668_v17 = vadd.f32 %v1667_v63, %v1571_v58  ;;  %v2375_v38 = vpop.f32.mrb[74].mxu0  ;;  %v2485_v30 = vpop.f32.mrb[86].mxu1 }
 0x189   :  { %v1732_v50 = vmax.f32 %v1676_v61, 0.0  ;;  %v1679_v60 = vadd.f32 %v2485_v30, %v1582_v41  ;;  %v2376_v47 = vpop.f32.mrb[75].mxu0  ;;  %v1670_v10 = vpop.f32.mrb[87].mxu1 }
 0x18a   :  { %v1730_v24 = vmax.f32 %v1668_v17, 0.0  ;;  %v2377_v32 = vadd.f32 %v2376_v47, %v2375_v38  ;;  %v1671_v52 = vadd.f32 %v1670_v10, %v1574_v0  ;;  %v1587_v35 = vadd.f32 %v2374_v37, %v3203_v6 }
 0x18b   :  { %v1748_v62 = vmax.f32 %v3392_v13, %v1732_v50  ;;  %v1733_v20 = vmax.f32 %v1679_v60, 0.0 }
 0x18c   :  { %v1746_v14 = vmax.f32 %v3396_v39, %v1730_v24  ;;  %v1731_v43 = vmax.f32 %v1671_v52, 0.0  ;;  %v1590_v36 = vadd.f32 %v2377_v32, %v3203_v6 }
 0x18d   :  { %v2108_v25 = vpack.c.bf16 %v1748_v62, %v1748_v62  ;;  %v1749_v44 = vmax.f32 %v3400_v45, %v1733_v20 }
 0x18e   :  { %v2106_v53 = vpack.c.bf16 %v1746_v14, %v1746_v14  ;;  %v1747_v3 = vmax.f32 %v3404_v59, %v1731_v43  ;;  %v2378_v5 = vpop.f32.mrb[76].mxu0  ;;  %v2488_v46 = vpop.f32.mrb[88].mxu1 }
 0x18f   :  { %1829 = vst.msk [vmem:[%s3556_s3 + $0x8] sm:$0xf] %vm1826_vm1, %v2108_v25  ;;  %v2109_v13 = vpack.c.bf16 %v1749_v44, %v1749_v44  ;;  %v2379_v9 = vpop.f32.mrb[77].mxu0  ;;  %v1683_v31 = vpop.f32.mrb[89].mxu1 }
 0x190   :  { %1827 = vst.msk [vmem:[%s3556_s3] sm:$0xf] %vm1826_vm1, %v2106_v53  ;;  %v2107_v39 = vpack.c.bf16 %v1747_v3, %v1747_v3  ;;  %v2380_v45 = vadd.f32 %v2379_v9, %v2378_v5  ;;  %v1684_v59 = vadd.f32 %v1683_v31, %v1587_v35  ;;  %v2381_v57 = vpop.f32.mrb[78].mxu0  ;;  %v2489_v48 = vpop.f32.mrb[90].mxu1  ;;  %v1630_v5 = vadd.f32 %v3450_v1, %v3203_v6 }
 0x191   :  { %1830 = vst.msk [vmem:[%s3556_s3 + $0xc] sm:$0xf] %vm1826_vm1, %v2109_v13  ;;  %v2382_v28 = vpop.f32.mrb[79].mxu0  ;;  %v1686_v54 = vpop.f32.mrb[91].mxu1 }
 0x192   :  { %1828 = vst.msk [vmem:[%s3556_s3 + $0x4] sm:$0xf] %vm1826_vm1, %v2107_v39  ;;  %v1595_v56 = vadd.f32 %v2380_v45, %v3203_v6  ;;  %v1734_v49 = vmax.f32 %v1684_v59, 0.0  ;;  %v2383_v19 = vadd.f32 %v2382_v28, %v2381_v57  ;;  %v1687_v15 = vadd.f32 %v1686_v54, %v1590_v36 }
 0x194   :  { %v1692_v40 = vadd.f32 %v2488_v46, %v1595_v56  ;;  %v1750_v23 = vmax.f32 %v3411_v22, %v1734_v49  ;;  %v1598_v2 = vadd.f32 %v2383_v19, %v3203_v6  ;;  %v1735_v51 = vmax.f32 %v1687_v15, 0.0 }
 0x196   :  { %v1736_v11 = vmax.f32 %v1692_v40, 0.0  ;;  %v2110_v33 = vpack.c.bf16 %v1750_v23, %v1750_v23  ;;  %v1695_v58 = vadd.f32 %v2489_v48, %v1598_v2  ;;  %v1751_v61 = vmax.f32 %v3418_v26, %v1735_v51  ;;  %v2384_v12 = vpop.f32.mrb[80].mxu0  ;;  %v2492_v63 = vpop.f32.mrb[92].mxu1 }
 0x197   :  { %v2385_v41 = vpop.f32.mrb[81].mxu0  ;;  %v1699_v37 = vpop.f32.mrb[93].mxu1 }
 0x198   :  { %v1752_v17 = vmax.f32 %v3408_v27, %v1736_v11  ;;  %1831 = vst.msk [vmem:[%s3556_s3 + $0x10] sm:$0xf] %vm1826_vm1, %v2110_v33  ;;  %v1737_v22 = vmax.f32 %v1695_v58, 0.0  ;;  %v2111_v38 = vpack.c.bf16 %v1751_v61, %v1751_v61  ;;  %v2386_v30 = vadd.f32 %v2385_v41, %v2384_v12  ;;  %v2387_v0 = vpop.f32.mrb[82].mxu0  ;;  %v2493_v50 = vpop.f32.mrb[94].mxu1 }
 0x199   :  { %v2388_v60 = vpop.f32.mrb[83].mxu0  ;;  %v1702_v47 = vpop.f32.mrb[95].mxu1 }
 0x19a   :  { %v2112_v10 = vpack.c.bf16 %v1752_v17, %v1752_v17  ;;  %v1753_v26 = vmax.f32 %v3415_v8, %v1737_v22  ;;  %1832 = vst.msk [vmem:[%s3556_s3 + $0x14] sm:$0xf] %vm1826_vm1, %v2111_v38  ;;  %v2389_v27 = vadd.f32 %v2388_v60, %v2387_v0  ;;  %v1603_v24 = vadd.f32 %v2386_v30, %v3203_v6 }
 0x19b   :  { %v1627_v8 = vadd.f32 %v3445_v21, %v3203_v6 }
 0x19c   :  { %1833 = vst.msk [vmem:[%s3556_s3 + $0x18] sm:$0xf] %vm1826_vm1, %v2112_v10  ;;  %v2113_v32 = vpack.c.bf16 %v1753_v26, %v1753_v26  ;;  %v1700_v52 = vadd.f32 %v1699_v37, %v1603_v24  ;;  %v1606_v62 = vadd.f32 %v2389_v27, %v3203_v6 }
 0x19e   :  { %1834 = vst.msk [vmem:[%s3556_s3 + $0x1c] sm:$0xf] %vm1826_vm1, %v2113_v32  ;;  %v1738_v20 = vmax.f32 %v1700_v52, 0.0  ;;  %v1703_v14 = vadd.f32 %v1702_v47, %v1606_v62  ;;  %v2390_v43 = vpop.f32.mrb[84].mxu0  ;;  %v2496_v25 = vpop.f32.mrb[96].mxu1 }
 0x19f   :  { %v1724_v44 = vadd.f32 %v2496_v25, %v1627_v8  ;;  %v2391_v53 = vpop.f32.mrb[85].mxu0  ;;  %v1715_v3 = vpop.f32.mrb[97].mxu1 }
 0x1a0   :  { %v1754_v46 = vmax.f32 %v3423_v42, %v1738_v20  ;;  %v1739_v35 = vmax.f32 %v1703_v14, 0.0  ;;  %v2392_v13 = vadd.f32 %v2391_v53, %v2390_v43  ;;  %v2393_v21 = vpop.f32.mrb[86].mxu0  ;;  %v2497_v9 = vpop.f32.mrb[98].mxu1 }
 0x1a1   :  { %v1744_v31 = vmax.f32 %v1724_v44, 0.0  ;;  %v1727_v39 = vadd.f32 %v2497_v9, %v1630_v5  ;;  %v2394_v45 = vpop.f32.mrb[87].mxu0  ;;  %v1718_v59 = vpop.f32.mrb[99].mxu1 }
 0x1a2   :  { %v2114_v57 = vpack.c.bf16 %v1754_v46, %v1754_v46  ;;  %v1755_v48 = vmax.f32 %v3427_v34, %v1739_v35  ;;  %v1611_v36 = vadd.f32 %v2392_v13, %v3203_v6  ;;  %v2395_v28 = vadd.f32 %v2394_v45, %v2393_v21 }
 0x1a3   :  { %v1760_v54 = vmax.f32 %v3448_v29, %v1744_v31  ;;  %v1745_v56 = vmax.f32 %v1727_v39, 0.0 }
 0x1a4   :  { %1835 = vst.msk [vmem:[%s3556_s3 + $0x20] sm:$0xf] %vm1826_vm1, %v2114_v57  ;;  %v2115_v42 = vpack.c.bf16 %v1755_v48, %v1755_v48  ;;  %v1708_v1 = vadd.f32 %v2492_v63, %v1611_v36  ;;  %v1614_v49 = vadd.f32 %v2395_v28, %v3203_v6 }
 0x1a5   :  { %v2120_v19 = vpack.c.bf16 %v1760_v54, %v1760_v54  ;;  %v1761_v15 = vmax.f32 %v3453_v18, %v1745_v56 }
 0x1a6   :  { %1836 = vst.msk [vmem:[%s3556_s3 + $0x24] sm:$0xf] %vm1826_vm1, %v2115_v42  ;;  %v1740_v34 = vmax.f32 %v1708_v1, 0.0  ;;  %v1711_v29 = vadd.f32 %v2493_v50, %v1614_v49  ;;  %v2396_v40 = vpop.f32.mrb[88].mxu0 }
 0x1a7   :  { %1841 = vst.msk [vmem:[%s3556_s3 + $0x38] sm:$0xf] %vm1826_vm1, %v2120_v19  ;;  %v2121_v23 = vpack.c.bf16 %v1761_v15, %v1761_v15  ;;  %v2397_v2 = vpop.f32.mrb[89].mxu0 }
 0x1a8   :  { %v1756_v51 = vmax.f32 %v3430_v4, %v1740_v34  ;;  %v1741_v11 = vmax.f32 %v1711_v29, 0.0  ;;  %v2398_v33 = vadd.f32 %v2397_v2, %v2396_v40  ;;  %v2399_v18 = vpop.f32.mrb[90].mxu0 }
 0x1a9   :  { %1842 = vst.msk [vmem:[%s3556_s3 + $0x3c] sm:$0xf] %vm1826_vm1, %v2121_v23  ;;  %v2400_v58 = vpop.f32.mrb[91].mxu0 }
 0x1aa   :  { %v2116_v61 = vpack.c.bf16 %v1756_v51, %v1756_v51  ;;  %v1757_v12 = vmax.f32 %v3433_v55, %v1741_v11  ;;  %v1619_v63 = vadd.f32 %v2398_v33, %v3203_v6  ;;  %v2401_v41 = vadd.f32 %v2400_v58, %v2399_v18 }
 0x1ac   :  { %1837 = vst.msk [vmem:[%s3556_s3 + $0x28] sm:$0xf] %vm1826_vm1, %v2116_v61  ;;  %v2117_v4 = vpack.c.bf16 %v1757_v12, %v1757_v12  ;;  %v1716_v37 = vadd.f32 %v1715_v3, %v1619_v63  ;;  %v1622_v17 = vadd.f32 %v2401_v41, %v3203_v6 }
 0x1ae   :  { %1838 = vst.msk [vmem:[%s3556_s3 + $0x2c] sm:$0xf] %vm1826_vm1, %v2117_v4  ;;  %v1742_v22 = vmax.f32 %v1716_v37, 0.0  ;;  %v1719_v38 = vadd.f32 %v1718_v59, %v1622_v17 }
 0x1b0   :  { %v1758_v55 = vmax.f32 %v3438_v7, %v1742_v22  ;;  %v1743_v30 = vmax.f32 %v1719_v38, 0.0 }
 0x1b2   :  { %v2118_v0 = vpack.c.bf16 %v1758_v55, %v1758_v55  ;;  %v1759_v50 = vmax.f32 %v3441_v16, %v1743_v30 }
 0x1b4   :  { %1839 = vst.msk [vmem:[%s3556_s3 + $0x30] sm:$0xf] %vm1826_vm1, %v2118_v0  ;;  %v2119_v60 = vpack.c.bf16 %v1759_v50, %v1759_v50 }
 0x1b6   :  { %1840 = vst.msk [vmem:[%s3556_s3 + $0x34] sm:$0xf] %vm1826_vm1, %v2119_v60 }

// kernel: net_forward.6
= control target key start
LH: loop header
LB: loop body
LE: loop exit
PB: predicated region body
PF: predicated region fallthrough
CT: control target
= control target key end

     0   :  { %vm372_vm0 = vcmask 523264   ;;  %s2269_s1 = inlined_call_operand.vmem [shape: bf16[576,128], index: 1, kind: input, shape index: {}]   ;;  %s2270_s0 = inlined_call_operand.vmem [shape: bf16[4,32,576], index: 0, kind: input, shape index: {}]   ;;  %s2271_s2 = inlined_call_operand.vmem [shape: f32[1,128], index: 2, kind: input, shape index: {}]   ;;  %s2272_s3 = inlined_call_operand.vmem [shape: bf16[32,128], index: 3, kind: output, shape index: {}]  }
   0x1   :  { %v1777_v0 = vld [vmem:[%s2269_s1 + $0x40] sm:$0xff]   ;;  %v1800_v4 = vld [vmem:[%s2269_s1 + $0x48] sm:$0xff]   ;;  %v1824_v8 = vld [vmem:[%s2269_s1 + $0x50] sm:$0xff]  }
   0x2   :  { %v1782_v1 = vld [vmem:[%s2269_s1] sm:$0xff]   ;;  %1366 = vmatprep.subr.bf16.mxu0 %v1777_v0  ;;  %v1806_v5 = vld [vmem:[%s2269_s1 + $0x8] sm:$0xff]   ;;  %v1830_v9 = vld [vmem:[%s2269_s1 + $0x10] sm:$0xff]  }
   0x3   :  { %v1788_v2 = vld [vmem:[%s2269_s1 + $0xc0] sm:$0xff]   ;;  %1367 = vmatpush3.bf16.msra.mxu0 %v1782_v1  ;;  %v1812_v6 = vld [vmem:[%s2269_s1 + $0xc8] sm:$0xff]   ;;  %v1836_v10 = vld [vmem:[%s2269_s1 + $0xd0] sm:$0xff]  }
   0x4   :  { %v1794_v3 = vld [vmem:[%s2269_s1 + $0x80] sm:$0xff]   ;;  %1394 = vmatprep.subr.bf16.mxu1 %v1788_v2  ;;  %1368 = vmatprep.subr.bf16.mxu0 %v1800_v4  ;;  %v1818_v7 = vld [vmem:[%s2269_s1 + $0x88] sm:$0xff]   ;;  %v1842_v11 = vld [vmem:[%s2269_s1 + $0x90] sm:$0xff]  }
   0x5   :  { %1395 = vmatpush3.bf16.msra.mxu1 %v1794_v3  ;;  %v1848_v12 = vld [vmem:[%s2269_s1 + $0x58] sm:$0xff]   ;;  %v1872_v16 = vld [vmem:[%s2269_s1 + $0x60] sm:$0xff]   ;;  %v1896_v20 = vld [vmem:[%s2269_s1 + $0x68] sm:$0xff]  }
   0x6   :  { %1396 = vmatprep.subr.bf16.mxu1 %v1812_v6  ;;  %v1854_v13 = vld [vmem:[%s2269_s1 + $0x18] sm:$0xff]   ;;  %v1878_v17 = vld [vmem:[%s2269_s1 + $0x20] sm:$0xff]   ;;  %v1902_v21 = vld [vmem:[%s2269_s1 + $0x28] sm:$0xff]  }
   0x7   :  { %1369 = vmatpush3.bf16.msra.mxu0 %v1806_v5  ;;  %v1860_v14 = vld [vmem:[%s2269_s1 + $0xd8] sm:$0xff]   ;;  %v1884_v18 = vld [vmem:[%s2269_s1 + $0xe0] sm:$0xff]   ;;  %v1908_v22 = vld [vmem:[%s2269_s1 + $0xe8] sm:$0xff]  }
   0x8   :  { %1370 = vmatprep.subr.bf16.mxu0 %v1824_v8  ;;  %v1866_v15 = vld [vmem:[%s2269_s1 + $0x98] sm:$0xff]   ;;  %v1890_v19 = vld [vmem:[%s2269_s1 + $0xa0] sm:$0xff]   ;;  %v1914_v23 = vld [vmem:[%s2269_s1 + $0xa8] sm:$0xff]  }
   0x9   :  { %1397 = vmatpush3.bf16.msra.mxu1 %v1818_v7  ;;  %v1920_v24 = vld [vmem:[%s2269_s1 + $0x70] sm:$0xff]   ;;  %v1944_v28 = vld [vmem:[%s2269_s1 + $0x78] sm:$0xff]   ;;  %v1974_v34 = vld [vmem:[%s2269_s1 + $0x100] sm:$0xff]  }
   0xa   :  { %1398 = vmatprep.subr.bf16.mxu1 %v1836_v10  ;;  %v1926_v25 = vld [vmem:[%s2269_s1 + $0x30] sm:$0xff]   ;;  %v1950_v29 = vld [vmem:[%s2269_s1 + $0x38] sm:$0xff]   ;;  %v1700_v36 = vld [vmem:[%s2270_s0 + $0xc] ss:$20 sps:$4 sm:$0xff]  }
   0xb   :  { %1371 = vmatpush3.bf16.msra.mxu0 %v1830_v9  ;;  %v1932_v26 = vld [vmem:[%s2269_s1 + $0xf0] sm:$0xff]   ;;  %v1956_v30 = vld [vmem:[%s2269_s1 + $0xf8] sm:$0xff]   ;;  %v1988_v37 = vld [vmem:[%s2269_s1 + $0x108] sm:$0xff]   ;;  %460 = vmatprep.mubr.bf16.mxu1 %v1700_v36 }
   0xc   :  { %1372 = vmatprep.subr.bf16.mxu0 %v1848_v12  ;;  %v1938_v27 = vld [vmem:[%s2269_s1 + $0xb0] sm:$0xff]   ;;  %v1695_v32 = vld [vmem:[%s2270_s0 + $0x4] ss:$20 sps:$4 sm:$0xff]   ;;  %v1698_v35 = vld [vmem:[%s2270_s0 + $0x8] ss:$20 sps:$4 sm:$0xff]  }
   0xd   :  { %1399 = vmatpush3.bf16.msra.mxu1 %v1842_v11  ;;  %v1693_v31 = vld [vmem:[%s2270_s0] ss:$20 sps:$4 sm:$0xff]   ;;  %v1969_v33 = vld [vmem:[%s2269_s1 + $0xb8] sm:$0xff]   ;;  %411 = vmatprep.mubr.bf16.mxu0 %v1695_v32  ;;  %v1708_v42 = vld [vmem:[%s2270_s0 + $0x30] ss:$20 sps:$4 sm:$0xff]  }
   0xe   :  { %1400 = vmatprep.subr.bf16.mxu1 %v1860_v14  ;;  %v1702_v38 = vld [vmem:[%s2270_s0 + $0x2c] ss:$20 sps:$4 sm:$0xff]   ;;  %v1704_v39 = vld [vmem:[%s2270_s0 + $0x28] ss:$20 sps:$4 sm:$0xff]   ;;  %v2001_v40 = vld [vmem:[%s2269_s1 + $0x110] sm:$0xff]  }
   0xf   :  { %1373 = vmatpush3.bf16.msra.mxu0 %v1854_v13  ;;  %v1706_v41 = vld [vmem:[%s2270_s0 + $0x34] ss:$20 sps:$4 sm:$0xff]   ;;  %v2015_v43 = vld [vmem:[%s2269_s1 + $0x118] sm:$0xff]   ;;  %v1710_v44 = vld [vmem:[%s2270_s0 + $0x10] ss:$20 sps:$4 sm:$0xff]  }
  0x10   :  { %1374 = vmatprep.subr.bf16.mxu0 %v1872_v16  ;;  %v1714_v45 = vld [vmem:[%s2270_s0 + $0x54] ss:$20 sps:$4 sm:$0xff]   ;;  %v1711_v46 = vld [vmem:[%s2270_s0 + $0x38] ss:$20 sps:$4 sm:$0xff]   ;;  %v1720_v47 = vld [vmem:[%s2270_s0 + $0x5c] ss:$20 sps:$4 sm:$0xff]  }
  0x11   :  { %1401 = vmatpush3.bf16.msra.mxu1 %v1866_v15  ;;  %v1712_v48 = vld [vmem:[%s2270_s0 + $0x50] ss:$20 sps:$4 sm:$0xff]   ;;  %v1717_v50 = vld [vmem:[%s2270_s0 + $0x78] ss:$20 sps:$4 sm:$0xff]   ;;  %v1721_v51 = vld [vmem:[%s2270_s0 + $0x60] ss:$20 sps:$4 sm:$0xff]  }
  0x12   :  { %1402 = vmatprep.subr.bf16.mxu1 %v1884_v18  ;;  %v1715_v49 = vld [vmem:[%s2270_s0 + $0x7c] ss:$20 sps:$4 sm:$0xff]   ;;  %v1718_v52 = vld [vmem:[%s2270_s0 + $0x58] ss:$20 sps:$4 sm:$0xff]   ;;  %v1725_v56 = vld [vmem:[%s2270_s0 + $0x80] ss:$20 sps:$4 sm:$0xff]  }
  0x13   :  { %1375 = vmatpush3.bf16.msra.mxu0 %v1878_v17  ;;  %v1723_v53 = vld [vmem:[%s2270_s0 + $0x84] ss:$20 sps:$4 sm:$0xff]   ;;  %v1722_v54 = vld [vmem:[%s2270_s0 + $0x88] ss:$20 sps:$4 sm:$0xff]   ;;  %v1731_v55 = vld [vmem:[%s2270_s0 + $0xac] ss:$20 sps:$4 sm:$0xff]  }
  0x14   :  { %1376 = vmatprep.subr.bf16.mxu0 %v1896_v20  ;;  %v1728_v57 = vld [vmem:[%s2270_s0 + $0xa4] ss:$20 sps:$4 sm:$0xff]   ;;  %v1726_v58 = vld [vmem:[%s2270_s0 + $0xa0] ss:$20 sps:$4 sm:$0xff]   ;;  %v1729_v60 = vld [vmem:[%s2270_s0 + $0xa8] ss:$20 sps:$4 sm:$0xff]  }
  0x15   :  { %1403 = vmatpush3.bf16.msra.mxu1 %v1890_v19  ;;  %v1732_v59 = vld [vmem:[%s2270_s0 + $0xcc] ss:$20 sps:$4 sm:$0xff]   ;;  %v1735_v61 = vld [vmem:[%s2270_s0 + $0xd4] ss:$20 sps:$4 sm:$0xff]   ;;  %v1738_v63 = vld [vmem:[%s2270_s0 + $0xb0] ss:$20 sps:$4 sm:$0xff]  }
  0x16   :  { %1404 = vmatprep.subr.bf16.mxu1 %v1908_v22  ;;  %v1734_v62 = vld [vmem:[%s2270_s0 + $0xc8] ss:$20 sps:$4 sm:$0xff]  }
  0x17   :  { %1377 = vmatpush3.bf16.msra.mxu0 %v1902_v21 }
  0x18   :  { %1378 = vmatprep.subr.bf16.mxu0 %v1920_v24 }
  0x19   :  { %1405 = vmatpush3.bf16.msra.mxu1 %v1914_v23 }
  0x1a   :  { %1406 = vmatprep.subr.bf16.mxu1 %v1932_v26 }
  0x1b   :  { %1379 = vmatpush3.bf16.msra.mxu0 %v1926_v25 }
  0x1c   :  { %1380 = vmatprep.subr.bf16.mxu0 %v1944_v28 }
  0x1d   :  { %1407 = vmatpush3.bf16.msra.mxu1 %v1938_v27 }
  0x1e   :  { %1408 = vmatprep.subr.bf16.mxu1 %v1956_v30 }
  0x1f   :  { %1381 = vmatpush3.bf16.msra.mxu0 %v1950_v29 }
  0x20   :  { %1614 = vmatprep.subr.bf16.mxu0 %v1974_v34 }
  0x21   :  { %1409 = vmatpush3.bf16.msra.mxu1 %v1969_v33 }
  0x22   :  { %412 = vmatmul.mubr.bf16.vlgmr.msra.gmra.mrb[0].mxu0 %v1693_v31  ;;  %1428 = vmatprep.subr.bf16.mxu1 %v1777_v0 }
  0x23   :  { %1615 = vmatpush3.bf16.msra.mxu0 %v1974_v34  ;;  %419 = vmatprep.mubr.bf16.mxu0 %v1702_v38 }
  0x24   :  { %461 = vmatmul.mubr.bf16.vlgmr.msra.gmra.mrb[0].mxu1 %v1698_v35  ;;  %1616 = vmatprep.subr.bf16.mxu0 %v1988_v37 }
  0x25   :  { %1429 = vmatpush3.bf16.msra.mxu1 %v1782_v1  ;;  %468 = vmatprep.mubr.bf16.mxu1 %v1706_v41 }
  0x26   :  { %1430 = vmatprep.subr.bf16.mxu1 %v1800_v4 }
  0x27   :  { %1617 = vmatpush3.bf16.msra.mxu0 %v1988_v37 }
  0x28   :  { %1618 = vmatprep.subr.bf16.mxu0 %v2001_v40 }
  0x29   :  { %1431 = vmatpush3.bf16.msra.mxu1 %v1806_v5 }
  0x2a   :  { %420 = vmatmul.mubr.bf16.gmra.mrb[4].mxu0 %v1704_v39  ;;  %1432 = vmatprep.subr.bf16.mxu1 %v1824_v8 }
  0x2b   :  { %1622 = vmatprep.mubr.msk.bf16.mxu0 %vm372_vm0, %v1710_v44  ;;  %1619 = vmatpush3.bf16.msra.mxu0 %v2001_v40 }
  0x2c   :  { %469 = vmatmul.mubr.bf16.gmra.mrb[4].mxu1 %v1708_v42  ;;  %1620 = vmatprep.subr.bf16.mxu0 %v2015_v43 }
  0x2d   :  { %1433 = vmatpush3.bf16.msra.mxu1 %v1830_v9  ;;  %631 = vmatprep.mubr.bf16.mxu1 %v1714_v45 }
  0x2e   :  { %1434 = vmatprep.subr.bf16.mxu1 %v1848_v12 }
  0x2f   :  { %1621 = vmatpush3.bf16.msra.mxu0 %v2015_v43 }
  0x30   :  { %1456 = vmatprep.subr.bf16.mxu0 %v1788_v2 }
  0x31   :  { %1435 = vmatpush3.bf16.msra.mxu1 %v1854_v13 }
  0x32   :  { %1623 = vmatmul.mubr.msk.bf16.vlgmr.msra.gmra.mrb[8].mxu0 %vm372_vm0, %v1711_v46  ;;  %1436 = vmatprep.subr.bf16.mxu1 %v1872_v16 }
  0x33   :  { %1457 = vmatpush3.bf16.msra.mxu0 %v1794_v3  ;;  %680 = vmatprep.mubr.bf16.mxu0 %v1720_v47 }
  0x34   :  { %1458 = vmatprep.subr.bf16.mxu0 %v1812_v6 }
  0x35   :  { %1437 = vmatpush3.bf16.msra.mxu1 %v1878_v17 }
  0x36   :  { %1438 = vmatprep.subr.bf16.mxu1 %v1896_v20 }
  0x37   :  { %1459 = vmatpush3.bf16.msra.mxu0 %v1818_v7 }
  0x38   :  { %1460 = vmatprep.subr.bf16.mxu0 %v1836_v10 }
  0x39   :  { %1439 = vmatpush3.bf16.msra.mxu1 %v1902_v21 }
  0x3a   :  { %1440 = vmatprep.subr.bf16.mxu1 %v1920_v24 }
  0x3b   :  { %1461 = vmatpush3.bf16.msra.mxu0 %v1842_v11 }
  0x3c   :  { %1462 = vmatprep.subr.bf16.mxu0 %v1860_v14 }
  0x3d   :  { %1441 = vmatpush3.bf16.msra.mxu1 %v1926_v25 }
  0x3e   :  { %1442 = vmatprep.subr.bf16.mxu1 %v1944_v28 }
  0x3f   :  { %1463 = vmatpush3.bf16.msra.mxu0 %v1866_v15 }
  0x40   :  { %1464 = vmatprep.subr.bf16.mxu0 %v1884_v18 }
  0x41   :  { %1443 = vmatpush3.bf16.msra.mxu1 %v1950_v29 }
  0x42   :  { %1626 = vmatprep.subr.bf16.mxu1 %v1974_v34 }
  0x43   :  { %1465 = vmatpush3.bf16.msra.mxu0 %v1890_v19 }
  0x44   :  { %632 = vmatmul.mubr.bf16.vlgmr.msra.gmra.mrb[8].mxu1 %v1712_v48  ;;  %1466 = vmatprep.subr.bf16.mxu0 %v1908_v22 }
  0x45   :  { %1627 = vmatpush3.bf16.msra.mxu1 %v1974_v34  ;;  %639 = vmatprep.mubr.bf16.mxu1 %v1715_v49 }
  0x46   :  { %1628 = vmatprep.subr.bf16.mxu1 %v1988_v37 }
  0x47   :  { %1467 = vmatpush3.bf16.msra.mxu0 %v1914_v23 }
  0x48   :  { %1468 = vmatprep.subr.bf16.mxu0 %v1932_v26 }
  0x49   :  { %1629 = vmatpush3.bf16.msra.mxu1 %v1988_v37 }
  0x4a   :  { %1630 = vmatprep.subr.bf16.mxu1 %v2001_v40 }
  0x4b   :  { %1469 = vmatpush3.bf16.msra.mxu0 %v1938_v27 }
  0x4c   :  { %640 = vmatmul.mubr.bf16.gmra.mrb[12].mxu1 %v1717_v50  ;;  %1470 = vmatprep.subr.bf16.mxu0 %v1956_v30 }
  0x4d   :  { %1631 = vmatpush3.bf16.msra.mxu1 %v2001_v40  ;;  %1634 = vmatprep.mubr.msk.bf16.mxu1 %vm372_vm0, %v1721_v51 }
  0x4e   :  { %1632 = vmatprep.subr.bf16.mxu1 %v2015_v43 }
  0x4f   :  { %1471 = vmatpush3.bf16.msra.mxu0 %v1969_v33 }
  0x50   :  { %1490 = vmatprep.subr.bf16.mxu0 %v1777_v0 }
  0x51   :  { %1633 = vmatpush3.bf16.msra.mxu1 %v2015_v43 }
  0x52   :  { %681 = vmatmul.mubr.bf16.vlgmr.msra.gmra.mrb[12].mxu0 %v1718_v52  ;;  %1518 = vmatprep.subr.bf16.mxu1 %v1788_v2 }
  0x53   :  { %1491 = vmatpush3.bf16.msra.mxu0 %v1782_v1  ;;  %688 = vmatprep.mubr.bf16.mxu0 %v1723_v53 }
  0x54   :  { %1635 = vmatmul.mubr.msk.bf16.vlgmr.msra.gmra.mrb[16].mxu1 %vm372_vm0, %v1722_v54  ;;  %1492 = vmatprep.subr.bf16.mxu0 %v1800_v4 }
  0x55   :  { %1519 = vmatpush3.bf16.msra.mxu1 %v1794_v3  ;;  %904 = vmatprep.mubr.bf16.mxu1 %v1731_v55 }
  0x56   :  { %1520 = vmatprep.subr.bf16.mxu1 %v1812_v6 }
  0x57   :  { %1493 = vmatpush3.bf16.msra.mxu0 %v1806_v5 }
  0x58   :  { %1494 = vmatprep.subr.bf16.mxu0 %v1824_v8 }
  0x59   :  { %1521 = vmatpush3.bf16.msra.mxu1 %v1818_v7 }
  0x5a   :  { %689 = vmatmul.mubr.bf16.gmra.mrb[16].mxu0 %v1725_v56  ;;  %1522 = vmatprep.subr.bf16.mxu1 %v1836_v10 }
  0x5b   :  { %1495 = vmatpush3.bf16.msra.mxu0 %v1830_v9  ;;  %855 = vmatprep.mubr.bf16.mxu0 %v1728_v57 }
  0x5c   :  { %1496 = vmatprep.subr.bf16.mxu0 %v1848_v12 }
  0x5d   :  { %1523 = vmatpush3.bf16.msra.mxu1 %v1842_v11 }
  0x5e   :  { %1524 = vmatprep.subr.bf16.mxu1 %v1860_v14 }
  0x5f   :  { %1497 = vmatpush3.bf16.msra.mxu0 %v1854_v13 }
  0x60   :  { %1498 = vmatprep.subr.bf16.mxu0 %v1872_v16 }
  0x61   :  { %1525 = vmatpush3.bf16.msra.mxu1 %v1866_v15 }
  0x62   :  { %1526 = vmatprep.subr.bf16.mxu1 %v1884_v18 }
  0x63   :  { %1499 = vmatpush3.bf16.msra.mxu0 %v1878_v17 }
  0x64   :  { %1500 = vmatprep.subr.bf16.mxu0 %v1896_v20 }
  0x65   :  { %1527 = vmatpush3.bf16.msra.mxu1 %v1890_v19 }
  0x66   :  { %1528 = vmatprep.subr.bf16.mxu1 %v1908_v22 }
  0x67   :  { %1501 = vmatpush3.bf16.msra.mxu0 %v1902_v21 }
  0x68   :  { %1502 = vmatprep.subr.bf16.mxu0 %v1920_v24 }
  0x69   :  { %1529 = vmatpush3.bf16.msra.mxu1 %v1914_v23 }
  0x6a   :  { %1530 = vmatprep.subr.bf16.mxu1 %v1932_v26 }
  0x6b   :  { %1503 = vmatpush3.bf16.msra.mxu0 %v1926_v25 }
  0x6c   :  { %1504 = vmatprep.subr.bf16.mxu0 %v1944_v28 }
  0x6d   :  { %1531 = vmatpush3.bf16.msra.mxu1 %v1938_v27 }
  0x6e   :  { %1532 = vmatprep.subr.bf16.mxu1 %v1956_v30 }
  0x6f   :  { %1505 = vmatpush3.bf16.msra.mxu0 %v1950_v29 }
  0x70   :  { %1638 = vmatprep.subr.bf16.mxu0 %v1974_v34 }
  0x71   :  { %1533 = vmatpush3.bf16.msra.mxu1 %v1969_v33 }
  0x72   :  { %856 = vmatmul.mubr.bf16.vlgmr.msra.gmra.mrb[20].mxu0 %v1726_v58  ;;  %1552 = vmatprep.subr.bf16.mxu1 %v1777_v0  ;;  %v1737_v0 = vld [vmem:[%s2270_s0 + $0xd0] ss:$20 sps:$4 sm:$0xff]  }
  0x73   :  { %1639 = vmatpush3.bf16.msra.mxu0 %v1974_v34  ;;  %863 = vmatprep.mubr.bf16.mxu0 %v1732_v59 }
  0x74   :  { %905 = vmatmul.mubr.bf16.vlgmr.msra.gmra.mrb[20].mxu1 %v1729_v60  ;;  %1640 = vmatprep.subr.bf16.mxu0 %v1988_v37 }
  0x75   :  { %1553 = vmatpush3.bf16.msra.mxu1 %v1782_v1  ;;  %912 = vmatprep.mubr.bf16.mxu1 %v1735_v61  ;;  %v1742_v1 = vld [vmem:[%s2270_s0 + $0xf4] ss:$20 sps:$4 sm:$0xff]  }
  0x76   :  { %1554 = vmatprep.subr.bf16.mxu1 %v1800_v4  ;;  %v1739_v4 = vld [vmem:[%s2270_s0 + $0xd8] ss:$20 sps:$4 sm:$0xff]  }
  0x77   :  { %1641 = vmatpush3.bf16.msra.mxu0 %v1988_v37 }
  0x78   :  { %1642 = vmatprep.subr.bf16.mxu0 %v2001_v40 }
  0x79   :  { %1555 = vmatpush3.bf16.msra.mxu1 %v1806_v5  ;;  %v1748_v5 = vld [vmem:[%s2270_s0 + $0xfc] ss:$20 sps:$4 sm:$0xff]  }
  0x7a   :  { %864 = vmatmul.mubr.bf16.gmra.mrb[24].mxu0 %v1734_v62  ;;  %1556 = vmatprep.subr.bf16.mxu1 %v1824_v8  ;;  %v1746_v8 = vld [vmem:[%s2270_s0 + $0xf8] ss:$20 sps:$4 sm:$0xff]  }
  0x7b   :  { %1643 = vmatpush3.bf16.msra.mxu0 %v2001_v40  ;;  %1646 = vmatprep.mubr.msk.bf16.mxu0 %vm372_vm0, %v1738_v63 }
  0x7c   :  { %913 = vmatmul.mubr.bf16.gmra.mrb[24].mxu1 %v1737_v0  ;;  %1644 = vmatprep.subr.bf16.mxu0 %v2015_v43 }
  0x7d   :  { %1557 = vmatpush3.bf16.msra.mxu1 %v1830_v9  ;;  %1079 = vmatprep.mubr.bf16.mxu1 %v1742_v1  ;;  %v1751_v9 = vld [vmem:[%s2270_s0 + $0x124] ss:$20 sps:$4 sm:$0xff]  }
  0x7e   :  { %1558 = vmatprep.subr.bf16.mxu1 %v1848_v12 }
  0x7f   :  { %1645 = vmatpush3.bf16.msra.mxu0 %v2015_v43 }
  0x80   :  { %1580 = vmatprep.subr.bf16.mxu0 %v1788_v2  ;;  %v1740_v2 = vld [vmem:[%s2270_s0 + $0xf0] ss:$20 sps:$4 sm:$0xff]  }
  0x81   :  { %1559 = vmatpush3.bf16.msra.mxu1 %v1854_v13  ;;  %v2245_v13 = vld [vmem:[%s2271_s2] ss:$0 sm:$0xff] }
  0x82   :  { %1647 = vmatmul.mubr.msk.bf16.vlgmr.msra.gmra.mrb[28].mxu0 %vm372_vm0, %v1739_v4  ;;  %1560 = vmatprep.subr.bf16.mxu1 %v1872_v16 }
  0x83   :  { %1581 = vmatpush3.bf16.msra.mxu0 %v1794_v3  ;;  %1128 = vmatprep.mubr.bf16.mxu0 %v1748_v5  ;;  %v1743_v3 = vld [vmem:[%s2270_s0 + $0x11c] ss:$20 sps:$4 sm:$0xff]  }
  0x84   :  { %1582 = vmatprep.subr.bf16.mxu0 %v1812_v6  ;;  %v1745_v6 = vld [vmem:[%s2270_s0 + $0x118] ss:$20 sps:$4 sm:$0xff]  }
  0x85   :  { %1561 = vmatpush3.bf16.msra.mxu1 %v1878_v17 }
  0x86   :  { %1562 = vmatprep.subr.bf16.mxu1 %v1896_v20 }
  0x87   :  { %1583 = vmatpush3.bf16.msra.mxu0 %v1818_v7  ;;  %v1749_v7 = vld [vmem:[%s2270_s0 + $0x100] ss:$20 sps:$4 sm:$0xff]  }
  0x88   :  { %1584 = vmatprep.subr.bf16.mxu0 %v1836_v10  ;;  %v1750_v10 = vld [vmem:[%s2270_s0 + $0x128] ss:$20 sps:$4 sm:$0xff]  }
  0x89   :  { %1563 = vmatpush3.bf16.msra.mxu1 %v1902_v21 }
  0x8a   :  { %1564 = vmatprep.subr.bf16.mxu1 %v1920_v24 }
  0x8b   :  { %1585 = vmatpush3.bf16.msra.mxu0 %v1842_v11  ;;  %v1753_v11 = vld [vmem:[%s2270_s0 + $0x120] ss:$20 sps:$4 sm:$0xff]  }
  0x8c   :  { %1586 = vmatprep.subr.bf16.mxu0 %v1860_v14 }
  0x8d   :  { %1565 = vmatpush3.bf16.msra.mxu1 %v1926_v25 }
  0x8e   :  { %1566 = vmatprep.subr.bf16.mxu1 %v1944_v28 }
  0x8f   :  { %1587 = vmatpush3.bf16.msra.mxu0 %v1866_v15 }
  0x90   :  { %1588 = vmatprep.subr.bf16.mxu0 %v1884_v18 }
  0x91   :  { %1567 = vmatpush3.bf16.msra.mxu1 %v1950_v29 }
  0x92   :  { %1650 = vmatprep.subr.bf16.mxu1 %v1974_v34 }
  0x93   :  { %1589 = vmatpush3.bf16.msra.mxu0 %v1890_v19 }
  0x94   :  { %1080 = vmatmul.mubr.bf16.vlgmr.msra.gmra.mrb[28].mxu1 %v1740_v2  ;;  %1590 = vmatprep.subr.bf16.mxu0 %v1908_v22 }
  0x95   :  { %1651 = vmatpush3.bf16.msra.mxu1 %v1974_v34  ;;  %1087 = vmatprep.mubr.bf16.mxu1 %v1743_v3 }
  0x96   :  { %1652 = vmatprep.subr.bf16.mxu1 %v1988_v37 }
  0x97   :  { %1591 = vmatpush3.bf16.msra.mxu0 %v1914_v23 }
  0x98   :  { %1592 = vmatprep.subr.bf16.mxu0 %v1932_v26 }
  0x99   :  { %1653 = vmatpush3.bf16.msra.mxu1 %v1988_v37 }
  0x9a   :  { %1654 = vmatprep.subr.bf16.mxu1 %v2001_v40 }
  0x9b   :  { %1593 = vmatpush3.bf16.msra.mxu0 %v1938_v27 }
  0x9c   :  { %1088 = vmatmul.mubr.bf16.gmra.mrb[32].mxu1 %v1745_v6  ;;  %1594 = vmatprep.subr.bf16.mxu0 %v1956_v30 }
  0x9d   :  { %1655 = vmatpush3.bf16.msra.mxu1 %v2001_v40  ;;  %1658 = vmatprep.mubr.msk.bf16.mxu1 %vm372_vm0, %v1749_v7 }
  0x9e   :  { %1656 = vmatprep.subr.bf16.mxu1 %v2015_v43 }
  0x9f   :  { %1595 = vmatpush3.bf16.msra.mxu0 %v1969_v33 }
  0xa1   :  { %1657 = vmatpush3.bf16.msra.mxu1 %v2015_v43 }
  0xa2   :  { %1129 = vmatmul.mubr.bf16.vlgmr.msra.gmra.mrb[32].mxu0 %v1746_v8 }
  0xa3   :  { %1136 = vmatprep.mubr.bf16.mxu0 %v1751_v9 }
  0xa4   :  { %1659 = vmatmul.mubr.msk.bf16.vlgmr.msra.gmra.mrb[36].mxu1 %vm372_vm0, %v1750_v10 }
  0xaa   :  { %1137 = vmatmul.mubr.bf16.gmra.mrb[36].mxu0 %v1753_v11 }
  0xf5   :  { %v1382_v12 = vpop.f32.mrb[0].mxu0 }
  0xf6   :  { %v1383_v14 = vpop.f32.mrb[1].mxu0 }
  0xf7   :  { %v1384_v15 = vadd.f32 %v1383_v14, %v1382_v12  ;;  %v1385_v16 = vpop.f32.mrb[2].mxu0  ;;  %v1410_v17 = vpop.f32.mrb[0].mxu1 }
  0xf8   :  { %v1386_v18 = vpop.f32.mrb[3].mxu0  ;;  %v1411_v21 = vpop.f32.mrb[1].mxu1 }
  0xf9   :  { %v414_v19 = vadd.f32 %v1384_v15, %v2245_v13  ;;  %v1387_v20 = vadd.f32 %v1386_v18, %v1385_v16  ;;  %v1412_v22 = vadd.f32 %v1411_v21, %v1410_v17  ;;  %v1413_v23 = vpop.f32.mrb[2].mxu1 }
  0xfa   :  { %v1414_v25 = vpop.f32.mrb[3].mxu1 }
  0xfb   :  { %v417_v24 = vadd.f32 %v1387_v20, %v2245_v13  ;;  %v1415_v26 = vadd.f32 %v1414_v25, %v1413_v23  ;;  %v463_v27 = vadd.f32 %v1412_v22, %v414_v19 }
  0xfd   :  { %v1388_v28 = vpop.f32.mrb[4].mxu0  ;;  %v466_v30 = vadd.f32 %v1415_v26, %v417_v24 }
  0xfe   :  { %v1389_v29 = vpop.f32.mrb[5].mxu0 }
  0xff   :  { %v1390_v31 = vadd.f32 %v1389_v29, %v1388_v28  ;;  %v1391_v32 = vpop.f32.mrb[6].mxu0  ;;  %v1416_v33 = vpop.f32.mrb[4].mxu1 }
 0x100   :  { %v1392_v34 = vpop.f32.mrb[7].mxu0  ;;  %v1417_v37 = vpop.f32.mrb[5].mxu1 }
 0x101   :  { %v422_v35 = vadd.f32 %v1390_v31, %v2245_v13  ;;  %v1393_v36 = vadd.f32 %v1392_v34, %v1391_v32  ;;  %v1418_v38 = vadd.f32 %v1417_v37, %v1416_v33  ;;  %v1419_v39 = vpop.f32.mrb[6].mxu1 }
 0x102   :  { %v1420_v41 = vpop.f32.mrb[7].mxu1 }
 0x103   :  { %v425_v40 = vadd.f32 %v1393_v36, %v2245_v13  ;;  %v1421_v42 = vadd.f32 %v1420_v41, %v1419_v39  ;;  %v471_v43 = vadd.f32 %v1418_v38, %v422_v35 }
 0x105   :  { %v1624_v44 = vpop.f32.mrb[8].mxu0  ;;  %v474_v45 = vadd.f32 %v1421_v42, %v425_v40 }
 0x106   :  { %v520_v46 = vadd.f32 %v1624_v44, %v471_v43  ;;  %v511_v47 = vpop.f32.mrb[9].mxu0 }
 0x107   :  { %v512_v48 = vadd.f32 %v511_v47, %v463_v27  ;;  %v1625_v49 = vpop.f32.mrb[10].mxu0 }
 0x108   :  { %v523_v50 = vadd.f32 %v1625_v49, %v474_v45  ;;  %v514_v51 = vpop.f32.mrb[11].mxu0  ;;  %v528_v35 = vmax.f32 %v520_v46, 0.0 }
 0x109   :  { %v515_v52 = vadd.f32 %v514_v51, %v466_v30  ;;  %v526_v17 = vmax.f32 %v512_v48, 0.0 }
 0x10a   :  { %v529_v38 = vmax.f32 %v523_v50, 0.0 }
 0x10b   :  { %v527_v21 = vmax.f32 %v515_v52, 0.0 }
 0x117   :  { %v1444_v53 = vpop.f32.mrb[8].mxu1 }
 0x118   :  { %v1445_v54 = vpop.f32.mrb[9].mxu1 }
 0x119   :  { %v1446_v55 = vadd.f32 %v1445_v54, %v1444_v53  ;;  %v1447_v56 = vpop.f32.mrb[10].mxu1 }
 0x11a   :  { %v1448_v57 = vpop.f32.mrb[11].mxu1 }
 0x11b   :  { %v1449_v58 = vadd.f32 %v1448_v57, %v1447_v56  ;;  %v634_v5 = vadd.f32 %v1446_v55, %v2245_v13 }
 0x11d   :  { %v637_v9 = vadd.f32 %v1449_v58, %v2245_v13 }
 0x11f   :  { %v1450_v59 = vpop.f32.mrb[12].mxu1 }
 0x120   :  { %v1451_v60 = vpop.f32.mrb[13].mxu1 }
 0x121   :  { %v1452_v61 = vadd.f32 %v1451_v60, %v1450_v59  ;;  %v1453_v62 = vpop.f32.mrb[14].mxu1 }
 0x122   :  { %v1454_v63 = vpop.f32.mrb[15].mxu1 }
 0x123   :  { %v1455_v0 = vadd.f32 %v1454_v63, %v1453_v62  ;;  %v642_v23 = vadd.f32 %v1452_v61, %v2245_v13 }
 0x125   :  { %v1472_v1 = vpop.f32.mrb[12].mxu0  ;;  %v645_v29 = vadd.f32 %v1455_v0, %v2245_v13 }
 0x126   :  { %v1473_v4 = vpop.f32.mrb[13].mxu0 }
 0x127   :  { %v1474_v2 = vadd.f32 %v1473_v4, %v1472_v1  ;;  %v1475_v3 = vpop.f32.mrb[14].mxu0  ;;  %v1636_v6 = vpop.f32.mrb[16].mxu1 }
 0x128   :  { %v1476_v7 = vpop.f32.mrb[15].mxu0  ;;  %v731_v8 = vpop.f32.mrb[17].mxu1 }
 0x129   :  { %v1477_v10 = vadd.f32 %v1476_v7, %v1475_v3  ;;  %v683_v11 = vadd.f32 %v1474_v2, %v634_v5  ;;  %v1637_v12 = vpop.f32.mrb[18].mxu1 }
 0x12a   :  { %v734_v14 = vpop.f32.mrb[19].mxu1 }
 0x12b   :  { %v732_v15 = vadd.f32 %v731_v8, %v683_v11  ;;  %v686_v16 = vadd.f32 %v1477_v10, %v637_v9 }
 0x12d   :  { %v746_v18 = vmax.f32 %v732_v15, 0.0  ;;  %v735_v19 = vadd.f32 %v734_v14, %v686_v16  ;;  %v1478_v20 = vpop.f32.mrb[16].mxu0 }
 0x12e   :  { %v1479_v22 = vpop.f32.mrb[17].mxu0 }
 0x12f   :  { %v750_v24 = vmax.f32 %v526_v17, %v746_v18  ;;  %v747_v25 = vmax.f32 %v735_v19, 0.0  ;;  %v1480_v26 = vadd.f32 %v1479_v22, %v1478_v20  ;;  %v1481_v27 = vpop.f32.mrb[18].mxu0 }
 0x130   :  { %v1482_v28 = vpop.f32.mrb[19].mxu0 }
 0x131   :  { %v751_v30 = vmax.f32 %v527_v21, %v747_v25  ;;  %v691_v31 = vadd.f32 %v1480_v26, %v642_v23  ;;  %v1483_v32 = vadd.f32 %v1482_v28, %v1481_v27 }
 0x133   :  { %v740_v33 = vadd.f32 %v1636_v6, %v691_v31  ;;  %v694_v34 = vadd.f32 %v1483_v32, %v645_v29 }
 0x135   :  { %v748_v36 = vmax.f32 %v740_v33, 0.0  ;;  %v743_v37 = vadd.f32 %v1637_v12, %v694_v34 }
 0x137   :  { %v749_v39 = vmax.f32 %v743_v37, 0.0  ;;  %v752_v40 = vmax.f32 %v528_v35, %v748_v36 }
 0x139   :  { %v753_v41 = vmax.f32 %v529_v38, %v749_v39 }
 0x145   :  { %v1506_v42 = vpop.f32.mrb[20].mxu0 }
 0x146   :  { %v1507_v43 = vpop.f32.mrb[21].mxu0 }
 0x147   :  { %v1508_v44 = vadd.f32 %v1507_v43, %v1506_v42  ;;  %v1509_v45 = vpop.f32.mrb[22].mxu0  ;;  %v1534_v47 = vpop.f32.mrb[20].mxu1 }
 0x148   :  { %v1510_v48 = vpop.f32.mrb[23].mxu0  ;;  %v1535_v49 = vpop.f32.mrb[21].mxu1 }
 0x149   :  { %v858_v51 = vadd.f32 %v1508_v44, %v2245_v13  ;;  %v1511_v52 = vadd.f32 %v1510_v48, %v1509_v45  ;;  %v1536_v53 = vadd.f32 %v1535_v49, %v1534_v47  ;;  %v1537_v54 = vpop.f32.mrb[22].mxu1 }
 0x14a   :  { %v1538_v55 = vpop.f32.mrb[23].mxu1 }
 0x14b   :  { %v861_v46 = vadd.f32 %v1511_v52, %v2245_v13  ;;  %v1539_v56 = vadd.f32 %v1538_v55, %v1537_v54  ;;  %v907_v50 = vadd.f32 %v1536_v53, %v858_v51 }
 0x14d   :  { %v1512_v57 = vpop.f32.mrb[24].mxu0  ;;  %v910_v58 = vadd.f32 %v1539_v56, %v861_v46 }
 0x14e   :  { %v1513_v59 = vpop.f32.mrb[25].mxu0 }
 0x14f   :  { %v1514_v60 = vadd.f32 %v1513_v59, %v1512_v57  ;;  %v1515_v61 = vpop.f32.mrb[26].mxu0  ;;  %v1540_v62 = vpop.f32.mrb[24].mxu1 }
 0x150   :  { %v1516_v63 = vpop.f32.mrb[27].mxu0  ;;  %v1541_v0 = vpop.f32.mrb[25].mxu1 }
 0x151   :  { %v866_v1 = vadd.f32 %v1514_v60, %v2245_v13  ;;  %v1517_v4 = vadd.f32 %v1516_v63, %v1515_v61  ;;  %v1542_v5 = vadd.f32 %v1541_v0, %v1540_v62  ;;  %v1543_v2 = vpop.f32.mrb[26].mxu1 }
 0x152   :  { %v1544_v3 = vpop.f32.mrb[27].mxu1 }
 0x153   :  { %v869_v6 = vadd.f32 %v1517_v4, %v2245_v13  ;;  %v1545_v7 = vadd.f32 %v1544_v3, %v1543_v2  ;;  %v915_v8 = vadd.f32 %v1542_v5, %v866_v1 }
 0x155   :  { %v1648_v9 = vpop.f32.mrb[28].mxu0  ;;  %v918_v10 = vadd.f32 %v1545_v7, %v869_v6 }
 0x156   :  { %v964_v11 = vadd.f32 %v1648_v9, %v915_v8  ;;  %v955_v12 = vpop.f32.mrb[29].mxu0 }
 0x157   :  { %v956_v14 = vadd.f32 %v955_v12, %v907_v50  ;;  %v1649_v15 = vpop.f32.mrb[30].mxu0 }
 0x158   :  { %v972_v16 = vmax.f32 %v964_v11, 0.0  ;;  %v967_v17 = vadd.f32 %v1649_v15, %v918_v10  ;;  %v958_v18 = vpop.f32.mrb[31].mxu0 }
 0x159   :  { %v970_v19 = vmax.f32 %v956_v14, 0.0  ;;  %v959_v20 = vadd.f32 %v958_v18, %v910_v58 }
 0x15a   :  { %v976_v21 = vmax.f32 %v752_v40, %v972_v16  ;;  %v973_v22 = vmax.f32 %v967_v17, 0.0 }
 0x15b   :  { %v974_v23 = vmax.f32 %v750_v24, %v970_v19  ;;  %v971_v25 = vmax.f32 %v959_v20, 0.0 }
 0x15c   :  { %v977_v26 = vmax.f32 %v753_v41, %v973_v22 }
 0x15d   :  { %v975_v27 = vmax.f32 %v751_v30, %v971_v25 }
 0x167   :  { %v1568_v28 = vpop.f32.mrb[28].mxu1 }
 0x168   :  { %v1569_v29 = vpop.f32.mrb[29].mxu1 }
 0x169   :  { %v1570_v31 = vadd.f32 %v1569_v29, %v1568_v28  ;;  %v1571_v32 = vpop.f32.mrb[30].mxu1 }
 0x16a   :  { %v1572_v33 = vpop.f32.mrb[31].mxu1 }
 0x16b   :  { %v1573_v34 = vadd.f32 %v1572_v33, %v1571_v32  ;;  %v1082_v40 = vadd.f32 %v1570_v31, %v2245_v13 }
 0x16d   :  { %v1085_v48 = vadd.f32 %v1573_v34, %v2245_v13 }
 0x16f   :  { %v1574_v35 = vpop.f32.mrb[32].mxu1 }
 0x170   :  { %v1575_v36 = vpop.f32.mrb[33].mxu1 }
 0x171   :  { %v1576_v37 = vadd.f32 %v1575_v36, %v1574_v35  ;;  %v1577_v38 = vpop.f32.mrb[34].mxu1 }
 0x172   :  { %v1578_v39 = vpop.f32.mrb[35].mxu1 }
 0x173   :  { %v1579_v42 = vadd.f32 %v1578_v39, %v1577_v38  ;;  %v1090_v58 = vadd.f32 %v1576_v37, %v2245_v13 }
 0x175   :  { %v1596_v43 = vpop.f32.mrb[32].mxu0  ;;  %v1093_v0 = vadd.f32 %v1579_v42, %v2245_v13 }
 0x176   :  { %v1597_v44 = vpop.f32.mrb[33].mxu0 }
 0x177   :  { %v1598_v24 = vadd.f32 %v1597_v44, %v1596_v43  ;;  %v1599_v45 = vpop.f32.mrb[34].mxu0  ;;  %v1660_v41 = vpop.f32.mrb[36].mxu1 }
 0x178   :  { %v1600_v30 = vpop.f32.mrb[35].mxu0  ;;  %v1179_v47 = vpop.f32.mrb[37].mxu1 }
 0x179   :  { %v1601_v49 = vadd.f32 %v1600_v30, %v1599_v45  ;;  %v1131_v51 = vadd.f32 %v1598_v24, %v1082_v40  ;;  %v1661_v52 = vpop.f32.mrb[38].mxu1 }
 0x17a   :  { %v1182_v53 = vpop.f32.mrb[39].mxu1 }
 0x17b   :  { %v1180_v54 = vadd.f32 %v1179_v47, %v1131_v51  ;;  %v1134_v55 = vadd.f32 %v1601_v49, %v1085_v48 }
 0x17d   :  { %v1194_v46 = vmax.f32 %v1180_v54, 0.0  ;;  %v1183_v56 = vadd.f32 %v1182_v53, %v1134_v55  ;;  %v1602_v50 = vpop.f32.mrb[36].mxu0 }
 0x17e   :  { %v1603_v57 = vpop.f32.mrb[37].mxu0 }
 0x17f   :  { %v1198_v59 = vmax.f32 %v974_v23, %v1194_v46  ;;  %v1195_v60 = vmax.f32 %v1183_v56, 0.0  ;;  %v1604_v61 = vadd.f32 %v1603_v57, %v1602_v50  ;;  %v1605_v62 = vpop.f32.mrb[38].mxu0 }
 0x180   :  { %v1606_v63 = vpop.f32.mrb[39].mxu0 }
 0x181   :  { %v1199_v1 = vmax.f32 %v975_v27, %v1195_v60  ;;  %v1139_v4 = vadd.f32 %v1604_v61, %v1090_v58  ;;  %v1607_v5 = vadd.f32 %v1606_v63, %v1605_v62 }
 0x183   :  { %v1358_v2 = vpack.c.bf16 %v1199_v1, %v1198_v59  ;;  %v1188_v3 = vadd.f32 %v1660_v41, %v1139_v4  ;;  %v1142_v6 = vadd.f32 %v1607_v5, %v1093_v0 }
 0x185   :  { %1359 = vst [vmem:[%s2272_s3] sm:$0xff] %v1358_v2   ;;  %v1196_v7 = vmax.f32 %v1188_v3, 0.0  ;;  %v1191_v8 = vadd.f32 %v1661_v52, %v1142_v6 }
 0x187   :  { %v1200_v9 = vmax.f32 %v976_v21, %v1196_v7  ;;  %v1197_v10 = vmax.f32 %v1191_v8, 0.0 }
 0x189   :  { %v1201_v11 = vmax.f32 %v977_v26, %v1197_v10 }
 0x18b   :  { %v1363_v12 = vpack.c.bf16 %v1201_v11, %v1200_v9 }
 0x18d   :  { %1365 = vst [vmem:[%s2272_s3 + $0x8] sm:$0xff] %v1363_v12  }

// kernel: net_forward.7
= control target key start
LH: loop header
LB: loop body
LE: loop exit
PB: predicated region body
PF: predicated region fallthrough
CT: control target
= control target key end

     0   :  { %v287_v28 = vlaneseq  ;;  %v1962_v36 = vmov 1966171168   ;;  %s2413_s0 = inlined_call_operand.vmem [shape: bf16[2,2048], index: 0, kind: input, shape index: {}]   ;;  %s2414_s1 = inlined_call_operand.vmem [shape: bf16[2048,10], index: 1, kind: input, shape index: {}]   ;;  %s2415_s2 = inlined_call_operand.vmem [shape: f32[1,10], index: 2, kind: input, shape index: {}]   ;;  %s2416_s3 = inlined_call_operand.hbm [shape: f32[2,10], index: 3, kind: output, shape index: {}]  }
   0x1   :  { %v1808_v0 = vld [vmem:[%s2414_s1 + $0x40] sm:$0xff]   ;;  %v1812_v4 = vld [vmem:[%s2414_s1 + $0x48] sm:$0xff]   ;;  %v1816_v8 = vld [vmem:[%s2414_s1 + $0x50] sm:$0xff]   ;;  %v285_v37 = vunpack.c.l.s4 %v1962_v36 }
   0x2   :  { %v1809_v1 = vld [vmem:[%s2414_s1 + $0xc0] sm:$0xff]   ;;  %1630 = vmatprep.subr.bf16.mxu0 %v1808_v0  ;;  %v1813_v5 = vld [vmem:[%s2414_s1 + $0xc8] sm:$0xff]   ;;  %v1817_v9 = vld [vmem:[%s2414_s1 + $0xd0] sm:$0xff]   ;;  %v288_v33 = vshrl.u32 %v287_v28, 7 }
   0x3   :  { %v1810_v2 = vld [vmem:[%s2414_s1] sm:$0xff]   ;;  %1652 = vmatprep.subr.bf16.mxu1 %v1809_v1  ;;  %v1814_v6 = vld [vmem:[%s2414_s1 + $0x8] sm:$0xff]   ;;  %v1818_v10 = vld [vmem:[%s2414_s1 + $0x10] sm:$0xff]   ;;  %v286_v40 = vunpack.c.0.s8 %v285_v37 }
   0x4   :  { %v1811_v3 = vld [vmem:[%s2414_s1 + $0x80] sm:$0xff]   ;;  %1631 = vmatpush3.bf16.msra.mxu0 %v1810_v2  ;;  %v1815_v7 = vld [vmem:[%s2414_s1 + $0x88] sm:$0xff]   ;;  %v1819_v11 = vld [vmem:[%s2414_s1 + $0x90] sm:$0xff]  }
   0x5   :  { %1653 = vmatpush3.bf16.msra.mxu1 %v1811_v3  ;;  %1632 = vmatprep.subr.bf16.mxu0 %v1812_v4  ;;  %v1820_v12 = vld [vmem:[%s2414_s1 + $0x58] sm:$0xff]   ;;  %v1824_v16 = vld [vmem:[%s2414_s1 + $0x60] sm:$0xff]   ;;  %v1828_v20 = vld [vmem:[%s2414_s1 + $0x68] sm:$0xff]   ;;  %v2089_v41 = vsub.s32 %v286_v40, %v288_v33 }
   0x6   :  { %1654 = vmatprep.subr.bf16.mxu1 %v1813_v5  ;;  %v1821_v13 = vld [vmem:[%s2414_s1 + $0xd8] sm:$0xff]   ;;  %v1825_v17 = vld [vmem:[%s2414_s1 + $0xe0] sm:$0xff]   ;;  %v1829_v21 = vld [vmem:[%s2414_s1 + $0xe8] sm:$0xff]  }
   0x7   :  { %v1822_v14 = vld [vmem:[%s2414_s1 + $0x18] sm:$0xff]   ;;  %v1826_v18 = vld [vmem:[%s2414_s1 + $0x20] sm:$0xff]   ;;  %v1830_v22 = vld [vmem:[%s2414_s1 + $0x28] sm:$0xff]  }
   0x8   :  { %1633 = vmatpush3.bf16.msra.mxu0 %v1814_v6  ;;  %v1823_v15 = vld [vmem:[%s2414_s1 + $0x98] sm:$0xff]   ;;  %v1827_v19 = vld [vmem:[%s2414_s1 + $0xa0] sm:$0xff]   ;;  %v1831_v23 = vld [vmem:[%s2414_s1 + $0xa8] sm:$0xff]  }
   0x9   :  { %1655 = vmatpush3.bf16.msra.mxu1 %v1815_v7  ;;  %1634 = vmatprep.subr.bf16.mxu0 %v1816_v8  ;;  %v1832_v24 = vld [vmem:[%s2414_s1 + $0x70] sm:$0xff]   ;;  %v1836_v29 = vld [vmem:[%s2414_s1 + $0x78] sm:$0xff]   ;;  %v16_v34 = vld [vmem:[%s2413_s0] sm:$0xff] }
   0xa   :  { %1656 = vmatprep.subr.bf16.mxu1 %v1817_v9  ;;  %v1833_v25 = vld [vmem:[%s2414_s1 + $0xf0] sm:$0xff]   ;;  %v1837_v30 = vld [vmem:[%s2414_s1 + $0xf8] sm:$0xff]   ;;  %v1841_v35 = vld [vmem:[%s2414_s1 + $0x140] sm:$0xff]   ;;  %v283_v39 = vcombine.high %v16_v34, %v16_v34  ;;  %v290_v42 = vrot.slane %v16_v34, %v2089_v41 }
   0xb   :  { %v1834_v26 = vld [vmem:[%s2414_s1 + $0x30] sm:$0xff]   ;;  %v1838_v31 = vld [vmem:[%s2414_s1 + $0x38] sm:$0xff]   ;;  %v1842_v38 = vld [vmem:[%s2414_s1 + $0x1c0] sm:$0xff]  }
   0xc   :  { %1635 = vmatpush3.bf16.msra.mxu0 %v1818_v10  ;;  %v1835_v27 = vld [vmem:[%s2414_s1 + $0xb0] sm:$0xff]   ;;  %v1839_v32 = vld [vmem:[%s2414_s1 + $0xb8] sm:$0xff]   ;;  %v2093_v43 = vrot.slane %v283_v39, %v2089_v41  ;;  %v298_v44 = vcombine.high %v290_v42, %v290_v42  ;;  %v306_v45 = vrot.slane %v290_v42, %v2089_v41  ;;  %v1843_v48 = vld [vmem:[%s2414_s1 + $0x100] sm:$0xff]  }
   0xd   :  { %1657 = vmatpush3.bf16.msra.mxu1 %v1819_v11  ;;  %1636 = vmatprep.subr.bf16.mxu0 %v1820_v12  ;;  %v1845_v51 = vld [vmem:[%s2414_s1 + $0x148] sm:$0xff]   ;;  %v1844_v53 = vld [vmem:[%s2414_s1 + $0x180] sm:$0xff]   ;;  %v1849_v57 = vld [vmem:[%s2414_s1 + $0x150] sm:$0xff]  }
   0xe   :  { %1658 = vmatprep.subr.bf16.mxu1 %v1821_v13  ;;  %v299_v46 = vcombine.high %v2093_v43, %v2093_v43  ;;  %v320_v47 = vrot.slane %v298_v44, %v2089_v41  ;;  %v328_v50 = vcombine.high %v306_v45, %v306_v45  ;;  %v1846_v54 = vld [vmem:[%s2414_s1 + $0x1c8] sm:$0xff]   ;;  %v1850_v59 = vld [vmem:[%s2414_s1 + $0x1d0] sm:$0xff]   ;;  %v1853_v61 = vld [vmem:[%s2414_s1 + $0x158] sm:$0xff]  }
   0xf   :  { %v1847_v56 = vld [vmem:[%s2414_s1 + $0x108] sm:$0xff]   ;;  %v1851_v60 = vld [vmem:[%s2414_s1 + $0x110] sm:$0xff]   ;;  %v1854_v63 = vld [vmem:[%s2414_s1 + $0x1d8] sm:$0xff]  }
  0x10   :  { %1637 = vmatpush3.bf16.msra.mxu0 %v1822_v14  ;;  %v327_v49 = vrot.slane %v299_v46, %v2089_v41  ;;  %1197 = vmatprep.mubr.bf16.mxu0 %v320_v47  ;;  %v330_v52 = vcombine.high %v320_v47, %v320_v47  ;;  %v1848_v58 = vld [vmem:[%s2414_s1 + $0x188] sm:$0xff]   ;;  %v1852_v62 = vld [vmem:[%s2414_s1 + $0x190] sm:$0xff]   ;;  %v1855_v0 = vld [vmem:[%s2414_s1 + $0x118] sm:$0xff]  }
  0x11   :  { %1659 = vmatpush3.bf16.msra.mxu1 %v1823_v15  ;;  %1638 = vmatprep.subr.bf16.mxu0 %v1824_v16  ;;  %v1857_v1 = vld [vmem:[%s2414_s1 + $0x160] sm:$0xff]   ;;  %v1856_v2 = vld [vmem:[%s2414_s1 + $0x198] sm:$0xff]   ;;  %v1861_v5 = vld [vmem:[%s2414_s1 + $0x168] sm:$0xff]  }
  0x12   :  { %1660 = vmatprep.subr.bf16.mxu1 %v1825_v17  ;;  %v331_v55 = vcombine.high %v327_v49, %v327_v49  ;;  %1237 = vmatprep.mubr.bf16.mxu1 %v330_v52  ;;  %v1858_v3 = vld [vmem:[%s2414_s1 + $0x1e0] sm:$0xff]   ;;  %v1862_v7 = vld [vmem:[%s2414_s1 + $0x1e8] sm:$0xff]   ;;  %v1865_v9 = vld [vmem:[%s2414_s1 + $0x170] sm:$0xff]   ;;  %v313_v17 = vrot.slane %v2093_v43, %v2089_v41 }
  0x13   :  { %v1859_v4 = vld [vmem:[%s2414_s1 + $0x120] sm:$0xff]   ;;  %v1863_v8 = vld [vmem:[%s2414_s1 + $0x128] sm:$0xff]   ;;  %v1866_v11 = vld [vmem:[%s2414_s1 + $0x1f0] sm:$0xff]  }
  0x14   :  { %1639 = vmatpush3.bf16.msra.mxu0 %v1826_v18  ;;  %v1860_v6 = vld [vmem:[%s2414_s1 + $0x1a0] sm:$0xff]   ;;  %v1864_v10 = vld [vmem:[%s2414_s1 + $0x1a8] sm:$0xff]   ;;  %v1867_v12 = vld [vmem:[%s2414_s1 + $0x130] sm:$0xff]  }
  0x15   :  { %1661 = vmatpush3.bf16.msra.mxu1 %v1827_v19  ;;  %1640 = vmatprep.subr.bf16.mxu0 %v1828_v20  ;;  %v1869_v13 = vld [vmem:[%s2414_s1 + $0x178] sm:$0xff]   ;;  %v1868_v14 = vld [vmem:[%s2414_s1 + $0x1b0] sm:$0xff]   ;;  %v1873_v18 = vld [vmem:[%s2414_s1 + $0x240] sm:$0xff]  }
  0x16   :  { %1662 = vmatprep.subr.bf16.mxu1 %v1829_v21  ;;  %v1870_v15 = vld [vmem:[%s2414_s1 + $0x1f8] sm:$0xff]   ;;  %v1874_v20 = vld [vmem:[%s2414_s1 + $0x2c0] sm:$0xff]   ;;  %v1880_v28 = vld [vmem:[%s2414_s1 + $0x288] sm:$0xff]  }
  0x17   :  { %v1871_v16 = vld [vmem:[%s2414_s1 + $0x138] sm:$0xff]   ;;  %v1875_v21 = vld [vmem:[%s2414_s1 + $0x200] sm:$0xff]   ;;  %v1893_v39 = vld [vmem:[%s2414_s1 + $0x268] sm:$0xff]  }
  0x18   :  { %1641 = vmatpush3.bf16.msra.mxu0 %v1830_v22  ;;  %v1872_v19 = vld [vmem:[%s2414_s1 + $0x1b8] sm:$0xff]   ;;  %v329_v22 = vcombine.high %v313_v17, %v313_v17  ;;  %v1890_v37 = vld [vmem:[%s2414_s1 + $0x2e0] sm:$0xff]   ;;  %v1894_v42 = vld [vmem:[%s2414_s1 + $0x2e8] sm:$0xff]  }
  0x19   :  { %1663 = vmatpush3.bf16.msra.mxu1 %v1831_v23  ;;  %1642 = vmatprep.subr.bf16.mxu0 %v1832_v24  ;;  %v1877_v23 = vld [vmem:[%s2414_s1 + $0x248] sm:$0xff]   ;;  %v1876_v24 = vld [vmem:[%s2414_s1 + $0x280] sm:$0xff]   ;;  %v1886_v33 = vld [vmem:[%s2414_s1 + $0x2d8] sm:$0xff]  }
  0x1a   :  { %1664 = vmatprep.subr.bf16.mxu1 %v1833_v25  ;;  %v1878_v25 = vld [vmem:[%s2414_s1 + $0x2c8] sm:$0xff]   ;;  %v1887_v34 = vld [vmem:[%s2414_s1 + $0x218] sm:$0xff]   ;;  %v1892_v40 = vld [vmem:[%s2414_s1 + $0x2a0] sm:$0xff]  }
  0x1b   :  { %v1888_v36 = vld [vmem:[%s2414_s1 + $0x298] sm:$0xff]   ;;  %v1895_v43 = vld [vmem:[%s2414_s1 + $0x228] sm:$0xff]   ;;  %v1897_v44 = vld [vmem:[%s2414_s1 + $0x270] sm:$0xff]  }
  0x1c   :  { %1643 = vmatpush3.bf16.msra.mxu0 %v1834_v26  ;;  %v1879_v26 = vld [vmem:[%s2414_s1 + $0x208] sm:$0xff]  }
  0x1d   :  { %1665 = vmatpush3.bf16.msra.mxu1 %v1835_v27  ;;  %1644 = vmatprep.subr.bf16.mxu0 %v1836_v29  ;;  %v1881_v27 = vld [vmem:[%s2414_s1 + $0x250] sm:$0xff]   ;;  %v1896_v46 = vld [vmem:[%s2414_s1 + $0x2a8] sm:$0xff]  }
  0x1e   :  { %1666 = vmatprep.subr.bf16.mxu1 %v1837_v30  ;;  %v1882_v29 = vld [vmem:[%s2414_s1 + $0x2d0] sm:$0xff]  }
  0x1f   :  { %v1883_v30 = vld [vmem:[%s2414_s1 + $0x210] sm:$0xff]  }
  0x20   :  { %1645 = vmatpush3.bf16.msra.mxu0 %v1838_v31  ;;  %v1885_v31 = vld [vmem:[%s2414_s1 + $0x258] sm:$0xff]  }
  0x21   :  { %1667 = vmatpush3.bf16.msra.mxu1 %v1839_v32  ;;  %1674 = vmatprep.subr.bf16.mxu0 %v1841_v35  ;;  %v1884_v32 = vld [vmem:[%s2414_s1 + $0x290] sm:$0xff]   ;;  %v1889_v35 = vld [vmem:[%s2414_s1 + $0x260] sm:$0xff]  }
  0x22   :  { %1696 = vmatprep.subr.bf16.mxu1 %v1842_v38  ;;  %v1891_v38 = vld [vmem:[%s2414_s1 + $0x220] sm:$0xff]  }
  0x23   :  { %1198 = vmatmul.mubr.bf16.vlgmr.msra.gmra.mrb[0].mxu0 %v306_v45  ;;  %v17_v45 = vld [vmem:[%s2413_s0 + $0x8] sm:$0xff] }
  0x24   :  { %1675 = vmatpush3.bf16.msra.mxu0 %v1843_v48  ;;  %1238 = vmatmul.mubr.bf16.vlgmr.msra.gmra.mrb[0].mxu1 %v328_v50  ;;  %v339_v47 = vrot.slane %v17_v45, %v2089_v41  ;;  %v332_v48 = vcombine.high %v17_v45, %v17_v45  ;;  %v1899_v50 = vld [vmem:[%s2414_s1 + $0x230] sm:$0xff]  }
  0x25   :  { %1676 = vmatprep.subr.bf16.mxu0 %v1845_v51  ;;  %1697 = vmatpush3.bf16.msra.mxu1 %v1844_v53  ;;  %v1901_v53 = vld [vmem:[%s2414_s1 + $0x278] sm:$0xff]  }
  0x26   :  { %1277 = vmatprep.mubr.bf16.mxu0 %v327_v49  ;;  %1698 = vmatprep.subr.bf16.mxu1 %v1846_v54  ;;  %v1898_v49 = vld [vmem:[%s2414_s1 + $0x2f0] sm:$0xff]   ;;  %v347_v51 = vcombine.high %v339_v47, %v339_v47  ;;  %v2278_v52 = vrot.slane %v332_v48, %v2089_v41 }
  0x27   :  { %1317 = vmatprep.mubr.bf16.mxu1 %v331_v55  ;;  %v1900_v54 = vld [vmem:[%s2414_s1 + $0x2b0] sm:$0xff]  }
  0x28   :  { %1677 = vmatpush3.bf16.msra.mxu0 %v1847_v56  ;;  %v369_v55 = vrot.slane %v347_v51, %v2089_v41  ;;  %v348_v56 = vcombine.high %v2278_v52, %v2278_v52 }
  0x29   :  { %1678 = vmatprep.subr.bf16.mxu0 %v1849_v57  ;;  %1699 = vmatpush3.bf16.msra.mxu1 %v1848_v58  ;;  %v1902_v57 = vld [vmem:[%s2414_s1 + $0x2f8] sm:$0xff]  }
  0x2a   :  { %1700 = vmatprep.subr.bf16.mxu1 %v1850_v59  ;;  %v1903_v58 = vld [vmem:[%s2414_s1 + $0x238] sm:$0xff]   ;;  %v379_v59 = vcombine.high %v369_v55, %v369_v55 }
  0x2c   :  { %1679 = vmatpush3.bf16.msra.mxu0 %v1851_v60  ;;  %v355_v60 = vrot.slane %v339_v47, %v2089_v41 }
  0x2d   :  { %1680 = vmatprep.subr.bf16.mxu0 %v1853_v61  ;;  %1701 = vmatpush3.bf16.msra.mxu1 %v1852_v62  ;;  %v1905_v61 = vld [vmem:[%s2414_s1 + $0x340] sm:$0xff]   ;;  %v1904_v62 = vld [vmem:[%s2414_s1 + $0x2b8] sm:$0xff]  }
  0x2e   :  { %1702 = vmatprep.subr.bf16.mxu1 %v1854_v63  ;;  %v376_v63 = vrot.slane %v348_v56, %v2089_v41 }
  0x30   :  { %1681 = vmatpush3.bf16.msra.mxu0 %v1855_v0  ;;  %v1906_v0 = vld [vmem:[%s2414_s1 + $0x3c0] sm:$0xff]  }
  0x31   :  { %1682 = vmatprep.subr.bf16.mxu0 %v1857_v1  ;;  %1703 = vmatpush3.bf16.msra.mxu1 %v1856_v2  ;;  %v1907_v1 = vld [vmem:[%s2414_s1 + $0x300] sm:$0xff]   ;;  %v377_v2 = vcombine.high %v355_v60, %v355_v60 }
  0x32   :  { %1704 = vmatprep.subr.bf16.mxu1 %v1858_v3  ;;  %v1909_v3 = vld [vmem:[%s2414_s1 + $0x348] sm:$0xff]  }
  0x34   :  { %1683 = vmatpush3.bf16.msra.mxu0 %v1859_v4  ;;  %v1908_v4 = vld [vmem:[%s2414_s1 + $0x380] sm:$0xff]  }
  0x35   :  { %1684 = vmatprep.subr.bf16.mxu0 %v1861_v5  ;;  %1705 = vmatpush3.bf16.msra.mxu1 %v1860_v6  ;;  %v380_v5 = vcombine.high %v376_v63, %v376_v63  ;;  %v1910_v6 = vld [vmem:[%s2414_s1 + $0x3c8] sm:$0xff]  }
  0x36   :  { %1706 = vmatprep.subr.bf16.mxu1 %v1862_v7  ;;  %v1911_v7 = vld [vmem:[%s2414_s1 + $0x308] sm:$0xff]  }
  0x38   :  { %1685 = vmatpush3.bf16.msra.mxu0 %v1863_v8  ;;  %v1913_v8 = vld [vmem:[%s2414_s1 + $0x350] sm:$0xff]  }
  0x39   :  { %1686 = vmatprep.subr.bf16.mxu0 %v1865_v9  ;;  %1707 = vmatpush3.bf16.msra.mxu1 %v1864_v10  ;;  %v1912_v9 = vld [vmem:[%s2414_s1 + $0x388] sm:$0xff]   ;;  %v1914_v10 = vld [vmem:[%s2414_s1 + $0x3d0] sm:$0xff]  }
  0x3a   :  { %1708 = vmatprep.subr.bf16.mxu1 %v1866_v11  ;;  %v1915_v11 = vld [vmem:[%s2414_s1 + $0x310] sm:$0xff]  }
  0x3c   :  { %1687 = vmatpush3.bf16.msra.mxu0 %v1867_v12  ;;  %v1917_v12 = vld [vmem:[%s2414_s1 + $0x358] sm:$0xff]  }
  0x3d   :  { %1688 = vmatprep.subr.bf16.mxu0 %v1869_v13  ;;  %1709 = vmatpush3.bf16.msra.mxu1 %v1868_v14  ;;  %v1916_v13 = vld [vmem:[%s2414_s1 + $0x390] sm:$0xff]   ;;  %v1918_v14 = vld [vmem:[%s2414_s1 + $0x3d8] sm:$0xff]  }
  0x3e   :  { %1710 = vmatprep.subr.bf16.mxu1 %v1870_v15  ;;  %v1919_v15 = vld [vmem:[%s2414_s1 + $0x318] sm:$0xff]  }
  0x40   :  { %1689 = vmatpush3.bf16.msra.mxu0 %v1871_v16  ;;  %v1921_v16 = vld [vmem:[%s2414_s1 + $0x360] sm:$0xff]  }
  0x41   :  { %1718 = vmatprep.subr.bf16.mxu0 %v1873_v18  ;;  %1711 = vmatpush3.bf16.msra.mxu1 %v1872_v19  ;;  %v1922_v18 = vld [vmem:[%s2414_s1 + $0x3e0] sm:$0xff]  }
  0x42   :  { %1740 = vmatprep.subr.bf16.mxu1 %v1874_v20  ;;  %v1923_v19 = vld [vmem:[%s2414_s1 + $0x320] sm:$0xff]   ;;  %v1925_v20 = vld [vmem:[%s2414_s1 + $0x368] sm:$0xff]  }
  0x43   :  { %1278 = vmatmul.mubr.bf16.vlgmr.msra.gmra.mrb[4].mxu0 %v313_v17  ;;  %v1920_v17 = vld [vmem:[%s2414_s1 + $0x398] sm:$0xff]  }
  0x44   :  { %1719 = vmatpush3.bf16.msra.mxu0 %v1875_v21  ;;  %1318 = vmatmul.mubr.bf16.vlgmr.msra.gmra.mrb[4].mxu1 %v329_v22  ;;  %v1924_v21 = vld [vmem:[%s2414_s1 + $0x3a0] sm:$0xff]   ;;  %v1926_v22 = vld [vmem:[%s2414_s1 + $0x3e8] sm:$0xff]  }
  0x45   :  { %1720 = vmatprep.subr.bf16.mxu0 %v1877_v23  ;;  %1741 = vmatpush3.bf16.msra.mxu1 %v1876_v24  ;;  %v1927_v23 = vld [vmem:[%s2414_s1 + $0x328] sm:$0xff]   ;;  %v1929_v24 = vld [vmem:[%s2414_s1 + $0x370] sm:$0xff]  }
  0x46   :  { %1742 = vmatprep.subr.bf16.mxu1 %v1878_v25  ;;  %1357 = vmatprep.mubr.bf16.mxu0 %v369_v55 }
  0x47   :  { %1397 = vmatprep.mubr.bf16.mxu1 %v379_v59 }
  0x48   :  { %1721 = vmatpush3.bf16.msra.mxu0 %v1879_v26 }
  0x49   :  { %1722 = vmatprep.subr.bf16.mxu0 %v1881_v27  ;;  %1743 = vmatpush3.bf16.msra.mxu1 %v1880_v28 }
  0x4a   :  { %1744 = vmatprep.subr.bf16.mxu1 %v1882_v29 }
  0x4c   :  { %1723 = vmatpush3.bf16.msra.mxu0 %v1883_v30 }
  0x4d   :  { %1724 = vmatprep.subr.bf16.mxu0 %v1885_v31  ;;  %1745 = vmatpush3.bf16.msra.mxu1 %v1884_v32 }
  0x4e   :  { %1746 = vmatprep.subr.bf16.mxu1 %v1886_v33 }
  0x50   :  { %1725 = vmatpush3.bf16.msra.mxu0 %v1887_v34 }
  0x51   :  { %1726 = vmatprep.subr.bf16.mxu0 %v1889_v35  ;;  %1747 = vmatpush3.bf16.msra.mxu1 %v1888_v36 }
  0x52   :  { %1748 = vmatprep.subr.bf16.mxu1 %v1890_v37 }
  0x54   :  { %1727 = vmatpush3.bf16.msra.mxu0 %v1891_v38 }
  0x55   :  { %1728 = vmatprep.subr.bf16.mxu0 %v1893_v39  ;;  %1749 = vmatpush3.bf16.msra.mxu1 %v1892_v40 }
  0x56   :  { %1750 = vmatprep.subr.bf16.mxu1 %v1894_v42 }
  0x58   :  { %1729 = vmatpush3.bf16.msra.mxu0 %v1895_v43 }
  0x59   :  { %1730 = vmatprep.subr.bf16.mxu0 %v1897_v44  ;;  %1751 = vmatpush3.bf16.msra.mxu1 %v1896_v46 }
  0x5a   :  { %1752 = vmatprep.subr.bf16.mxu1 %v1898_v49 }
  0x5c   :  { %1731 = vmatpush3.bf16.msra.mxu0 %v1899_v50 }
  0x5d   :  { %1732 = vmatprep.subr.bf16.mxu0 %v1901_v53  ;;  %1753 = vmatpush3.bf16.msra.mxu1 %v1900_v54 }
  0x5e   :  { %1754 = vmatprep.subr.bf16.mxu1 %v1902_v57 }
  0x60   :  { %1733 = vmatpush3.bf16.msra.mxu0 %v1903_v58 }
  0x61   :  { %1762 = vmatprep.subr.bf16.mxu0 %v1905_v61  ;;  %1755 = vmatpush3.bf16.msra.mxu1 %v1904_v62 }
  0x62   :  { %1784 = vmatprep.subr.bf16.mxu1 %v1906_v0 }
  0x63   :  { %1358 = vmatmul.mubr.bf16.vlgmr.msra.gmra.mrb[8].mxu0 %v355_v60 }
  0x64   :  { %1763 = vmatpush3.bf16.msra.mxu0 %v1907_v1  ;;  %1437 = vmatprep.mubr.bf16.mxu0 %v376_v63 }
  0x65   :  { %1398 = vmatmul.mubr.bf16.vlgmr.msra.gmra.mrb[8].mxu1 %v377_v2  ;;  %1764 = vmatprep.subr.bf16.mxu0 %v1909_v3 }
  0x66   :  { %1785 = vmatpush3.bf16.msra.mxu1 %v1908_v4  ;;  %1477 = vmatprep.mubr.bf16.mxu1 %v380_v5 }
  0x67   :  { %1786 = vmatprep.subr.bf16.mxu1 %v1910_v6 }
  0x68   :  { %1765 = vmatpush3.bf16.msra.mxu0 %v1911_v7 }
  0x69   :  { %1766 = vmatprep.subr.bf16.mxu0 %v1913_v8 }
  0x6a   :  { %1787 = vmatpush3.bf16.msra.mxu1 %v1912_v9 }
  0x6b   :  { %1788 = vmatprep.subr.bf16.mxu1 %v1914_v10 }
  0x6c   :  { %1767 = vmatpush3.bf16.msra.mxu0 %v1915_v11 }
  0x6d   :  { %1768 = vmatprep.subr.bf16.mxu0 %v1917_v12 }
  0x6e   :  { %1789 = vmatpush3.bf16.msra.mxu1 %v1916_v13 }
  0x6f   :  { %1790 = vmatprep.subr.bf16.mxu1 %v1918_v14 }
  0x70   :  { %1769 = vmatpush3.bf16.msra.mxu0 %v1919_v15 }
  0x71   :  { %1770 = vmatprep.subr.bf16.mxu0 %v1921_v16 }
  0x72   :  { %1791 = vmatpush3.bf16.msra.mxu1 %v1920_v17 }
  0x73   :  { %1792 = vmatprep.subr.bf16.mxu1 %v1922_v18 }
  0x74   :  { %1771 = vmatpush3.bf16.msra.mxu0 %v1923_v19 }
  0x75   :  { %1772 = vmatprep.subr.bf16.mxu0 %v1925_v20 }
  0x76   :  { %8 = vsyncpa [#allocation3], 0  ;;  %1793 = vmatpush3.bf16.msra.mxu1 %v1924_v21  ;;  %v1928_v25 = vld [vmem:[%s2414_s1 + $0x3a8] sm:$0xff]   ;;  %v1930_v26 = vld [vmem:[%s2414_s1 + $0x3f0] sm:$0xff]   ;;  %v362_v32 = vrot.slane %v2278_v52, %v2089_v41  ;;  %vm1485_vm0 = vcmask 74752  }
  0x77   :  { %1794 = vmatprep.subr.bf16.mxu1 %v1926_v22  ;;  %v1931_v27 = vld [vmem:[%s2414_s1 + $0x330] sm:$0xff]   ;;  %v1933_v28 = vld [vmem:[%s2414_s1 + $0x378] sm:$0xff]   ;;  %v1501_v36 = vld [vmem:[%s2415_s2] ss:$0 sm:$0xff] }
  0x78   :  { %1773 = vmatpush3.bf16.msra.mxu0 %v1927_v23  ;;  %v1932_v29 = vld [vmem:[%s2414_s1 + $0x3b0] sm:$0xff]   ;;  %v1934_v30 = vld [vmem:[%s2414_s1 + $0x3f8] sm:$0xff]   ;;  %v378_v34 = vcombine.high %v362_v32, %v362_v32 }
  0x79   :  { %1774 = vmatprep.subr.bf16.mxu0 %v1929_v24  ;;  %v1935_v31 = vld [vmem:[%s2414_s1 + $0x338] sm:$0xff]  }
  0x7a   :  { %1795 = vmatpush3.bf16.msra.mxu1 %v1928_v25  ;;  %v1936_v33 = vld [vmem:[%s2414_s1 + $0x3b8] sm:$0xff]   ;;  %s1963_s1 = smov [#allocation2]  }
  0x7b   :  { %1796 = vmatprep.subr.bf16.mxu1 %v1930_v26  ;;  %s1493_s2 = sshll.u32 %s1963_s1, 4  ;;  %s1494_s2 = int_to_ptr.vmem [resolvable:$true] %s1493_s2 }
  0x7c   :  { %1775 = vmatpush3.bf16.msra.mxu0 %v1931_v27  ;;  %s1938_s28 = scalar_lea.vmem %s1494_s2, 32  ;;  %p1943_p1 = scmp.lt.s32.totalorder %s1494_s2, %s1494_s2 }
  0x7d   :  { %1776 = vmatprep.subr.bf16.mxu0 %v1933_v28  ;;  %p1939_p0 = scmp.ne.s32.totalorder %s1494_s2, %s1938_s28  ;;  %p1944_p2 = scmp.lt.s32.totalorder %s1938_s28, %s1938_s28 }
  0x7e   :  { %1797 = vmatpush3.bf16.msra.mxu1 %v1932_v29 }
  0x7f   :  { %1798 = vmatprep.subr.bf16.mxu1 %v1934_v30  ;;  %p1945_p3 = por %p1944_p2, %p1943_p1 }
  0x80   :  { %1777 = vmatpush3.bf16.msra.mxu0 %v1935_v31 }
  0x81   :  { %p1946_p4 = pnand %p1945_p3, %p1939_p0 }
  0x82   :  { %1799 = vmatpush3.bf16.msra.mxu1 %v1936_v33 }
  0x83   :  { %1438 = vmatmul.mubr.bf16.vlgmr.msra.gmra.mrb[12].mxu0 %v362_v32 }
  0x85   :  { %1478 = vmatmul.mubr.bf16.vlgmr.msra.gmra.mrb[12].mxu1 %v378_v34 }
  0xf6   :  { %v1646_v35 = vpop.f32.mrb[0].mxu0 }
  0xf7   :  { %v1647_v37 = vpop.f32.mrb[1].mxu0  ;;  %v1668_v38 = vpop.f32.mrb[0].mxu1 }
  0xf8   :  { %v1648_v39 = vadd.f32 %v1647_v37, %v1646_v35  ;;  %v1649_v41 = vpop.f32.mrb[2].mxu0  ;;  %v1669_v40 = vpop.f32.mrb[1].mxu1 }
  0xf9   :  { %v1650_v42 = vpop.f32.mrb[3].mxu0  ;;  %v1670_v44 = vadd.f32 %v1669_v40, %v1668_v38  ;;  %v1671_v45 = vpop.f32.mrb[2].mxu1 }
  0xfa   :  { %v1200_v43 = vadd.f32 %v1648_v39, %v1501_v36  ;;  %v1672_v46 = vpop.f32.mrb[3].mxu1 }
  0xfc   :  { %v1240_v47 = vadd.f32 %v1670_v44, %v1200_v43 }
 0x116   :  { %v1690_v48 = vpop.f32.mrb[4].mxu0 }
 0x117   :  { %v1691_v49 = vpop.f32.mrb[5].mxu0  ;;  %v1712_v50 = vpop.f32.mrb[4].mxu1 }
 0x118   :  { %v1692_v51 = vadd.f32 %v1691_v49, %v1690_v48  ;;  %v1693_v52 = vpop.f32.mrb[6].mxu0  ;;  %v1713_v53 = vpop.f32.mrb[5].mxu1 }
 0x119   :  { %v1694_v54 = vpop.f32.mrb[7].mxu0  ;;  %v1714_v56 = vadd.f32 %v1713_v53, %v1712_v50  ;;  %v1715_v57 = vpop.f32.mrb[6].mxu1 }
 0x11a   :  { %v1280_v55 = vadd.f32 %v1692_v51, %v1240_v47  ;;  %v1716_v58 = vpop.f32.mrb[7].mxu1 }
 0x11c   :  { %v1320_v59 = vadd.f32 %v1714_v56, %v1280_v55 }
 0x136   :  { %v1734_v60 = vpop.f32.mrb[8].mxu0 }
 0x137   :  { %v1735_v61 = vpop.f32.mrb[9].mxu0 }
 0x138   :  { %v1756_v62 = vpop.f32.mrb[8].mxu1  ;;  %v1736_v63 = vadd.f32 %v1735_v61, %v1734_v60  ;;  %v1737_v0 = vpop.f32.mrb[10].mxu0 }
 0x139   :  { %v1757_v1 = vpop.f32.mrb[9].mxu1  ;;  %v1738_v2 = vpop.f32.mrb[11].mxu0 }
 0x13a   :  { %v1360_v3 = vadd.f32 %v1736_v63, %v1320_v59  ;;  %v1758_v4 = vadd.f32 %v1757_v1, %v1756_v62  ;;  %v1759_v5 = vpop.f32.mrb[10].mxu1 }
 0x13b   :  { %v1760_v6 = vpop.f32.mrb[11].mxu1 }
 0x13c   :  { %v1400_v7 = vadd.f32 %v1758_v4, %v1360_v3 }
 0x156   :  { %v1778_v8 = vpop.f32.mrb[12].mxu0 }
 0x157   :  { %v1779_v9 = vpop.f32.mrb[13].mxu0 }
 0x158   :  { %v1800_v10 = vpop.f32.mrb[12].mxu1  ;;  %v1780_v11 = vadd.f32 %v1779_v9, %v1778_v8  ;;  %v1781_v12 = vpop.f32.mrb[14].mxu0 }
 0x159   :  { %v1801_v13 = vpop.f32.mrb[13].mxu1  ;;  %v1782_v14 = vpop.f32.mrb[15].mxu0 }
 0x15a   :  { %v1440_v15 = vadd.f32 %v1780_v11, %v1400_v7  ;;  %v1802_v16 = vadd.f32 %v1801_v13, %v1800_v10  ;;  %v1803_v17 = vpop.f32.mrb[14].mxu1 }
 0x15b   :  { %v1804_v18 = vpop.f32.mrb[15].mxu1 }
 0x15c   :  { %v1480_v19 = vadd.f32 %v1802_v16, %v1440_v15 }
 0x15e   :  { %1486 = vst.msk [vmem:[#allocation2] sm:$0x3] %vm1485_vm0, %v1480_v19 }
 0x15f   :  { %1949 = shalt.err (!%p1946_p4)
}
 0x160   :  { %s1950_s4 = scalar_lea.hbm %s2416_s3, 32 }
 0x161   :  { %p1951_p5 = scmp.ne.s32.totalorder %s2416_s3, %s1950_s4  ;;  %p1954_p6 = scmp.lt.u32.totalorder %s1950_s4, %s2416_s3 }
 0x163   :  { %p1956_p7 = pnand %p1954_p6, %p1951_p5 }
 0x165   :  { %1959 = shalt.err (!%p1956_p7)
}
 0x166   :  { %1496 = dma.vmem_to_hbm [thread:$0]  %s1494_s2, 32, %s2416_s3, [#allocation3]  }
 0x167   :  { %1960 = dma.done.wait [#allocation3], 32  }
 0x168   :  { %1961 = vsyncadd [#allocation3], 4294967264 }
 0x169   :  { %1500 = vsyncpa [#allocation3], 1 }

</bundles_post_ra>
